<compile_context>
chip_gen: v7x
topology: tpu7x:2x2x1
jax: 0.10.0
libtpu: 0.0.40
codegen_flags: <defaults>
</compile_context>

<pallas_src>
import functools
import numpy as np
import jax
import jax.numpy as jnp
from jax.experimental import pallas as pl
from jax.experimental.pallas import tpu as pltpu

# Small but tile-friendly shapes (feature dims multiples of 128, batch/loc of 8).
B = 8          # batch
R = 128        # rnn_size == input_size (required: xt = x + previous top_h)
A = 128        # att_size
O = 128        # output_size
L = 8          # number of attention locations
NL = 2         # num_layers
NP = 2         # num_parallels
DROPOUT = 0.0  # dropout prob; 0 => the F.dropout branch is skipped (deterministic)
NA = 2 * NL    # number of attention modules
NC = NL * NP   # number of LSTM cores
G4 = NP * 4 * R  # fused gate width per layer (all parallel cores, 4 gates)


def lstm_layer_kernel(
    x_ref, att_ref, state_ref, pwW_ref, pwb_ref,
    aWa_ref, aba_ref, aWxh_ref, abxh_ref, aWal_ref,
    aW2h_ref, gW_ref, gb_ref, pW_ref, pb_ref,
    out_ref, logp_ref, projw_ref,
    topH_sc, projw_sc,
):
    f32 = jnp.float32
    bf16 = jnp.bfloat16
    layer = pl.program_id(0)

    x = x_ref[...]                         # (B, R) f32
    att = att_ref[...]                     # (B, L, R) f32
    att2d_bf = att.reshape(B * L, R).astype(bf16)

    @pl.when(layer == 0)
    def _():
        # proj_w = sigmoid(proj_weight(x)); computed once, reused by all layers.
        projw_sc[...] = jax.nn.sigmoid(
            jnp.dot(x.astype(bf16), pwW_ref[...], preferred_element_type=f32)
            + pwb_ref[...])
        topH_sc[...] = jnp.zeros_like(topH_sc)     # so xt = x at layer 0

    proj_w = projw_sc[...]                 # (B, O)
    prev_c = state_ref[0]                  # (B, R)
    prev_h = state_ref[1]                  # (B, R)
    xt = x + topH_sc[...]                  # layer i>0: x + top_h_{i-1}
    xt_bf = xt.astype(bf16)
    prev_h_bf = prev_h.astype(bf16)

    # Projections of the attention features; independent of the layer chain,
    # so they overlap with the gate weight push.
    a_p = (jnp.dot(att2d_bf, aWa_ref[...], preferred_element_type=f32)
           + aba_ref[...])                                           # (B*L, 2A)
    ha = jnp.dot(att2d_bf, aW2h_ref[...],
                 preferred_element_type=f32).reshape(B, L, G4)       # (B, L, NP*4R)

    def attention_weights(idx, xh_bf):
        # Fused x2att|h2att: one (B,2R)@(2R,A) matmul.
        hx_p = (jnp.dot(xh_bf, aWxh_ref[idx], preferred_element_type=f32)
                + abxh_ref[pl.ds(idx, 1), :])                        # (B, A)
        a_sl = a_p[:, idx * A:(idx + 1) * A].reshape(B, L, A)
        dot = jnp.tanh(a_sl + hx_p[:, None, :])                      # (B, L, A)
        alpha = aWal_ref[pl.ds(idx, 1), :]                           # (1, A)
        # alpha_net bias is a per-module scalar -> cancels in softmax; dropped.
        e = jnp.sum(dot * alpha[None, :, :], axis=-1)                # (B, L)
        return jax.nn.softmax(e, axis=-1)                            # (B, L)

    # Gate matmul (K = 2R, exact MXU K tile), independent of attention #1; the
    # a2h term is added afterwards from the hoisted `ha` via the identity
    # (sum_l w_l*att_l) @ Wa == sum_l w_l * (att_l @ Wa).
    xh_prev = jnp.concatenate([xt_bf, prev_h_bf], axis=-1)           # (B, 2R)
    s = (jnp.dot(xh_prev, gW_ref[...], preferred_element_type=f32)
         + gb_ref[...])                                              # (B, NP*4R)
    w1 = attention_weights(0, xh_prev)                               # (B, L)
    s = s + jnp.sum(w1[:, :, None] * ha, axis=1)                     # (B, NP*4R)

    # Columns ordered [i | f | o | g] x parallel cores -> two wide activations.
    sig = jax.nn.sigmoid(s[:, :3 * NP * R])
    g_all = jnp.tanh(s[:, 3 * NP * R:])
    i_all = sig[:, :NP * R]
    f_all = sig[:, NP * R:2 * NP * R]
    o_all = sig[:, 2 * NP * R:3 * NP * R]
    prev_c_rep = jnp.concatenate([prev_c] * NP, axis=-1)             # (B, NP*R)
    nc_all = f_all * prev_c_rep + i_all * g_all
    nh_all = o_all * jnp.tanh(nc_all)
    inv_np = 1.0 / NP
    next_c = sum(nc_all[:, j * R:(j + 1) * R] for j in range(NP)) * inv_np
    next_h = sum(nh_all[:, j * R:(j + 1) * R] for j in range(NP)) * inv_np

    xh_next = jnp.concatenate([xt_bf, next_h.astype(bf16)], axis=-1)
    w2 = attention_weights(1, xh_next)
    att_res2 = jnp.sum(att * w2[:, :, None], axis=1)                 # (B, R)
    top_h = att_res2 + next_h
    # TODO(synk): F.dropout(top_h, p) is skipped because DROPOUT == 0.0.

    logits = (jnp.dot(top_h.astype(bf16), pW_ref[...], preferred_element_type=f32)
              + pb_ref[...]) * proj_w
    logp = jax.nn.log_softmax(logits, axis=-1)   # matches F.log_softmax dim=1 for 2-D

    out_ref[0] = next_c
    out_ref[1] = top_h
    logp_ref[...] = logp
    projw_ref[...] = proj_w
    topH_sc[...] = top_h


@jax.jit
def run(x, att, state, fp):
    c2 = lambda i: (0, 0)        # layer-invariant 2-D
    c3 = lambda i: (0, 0, 0)     # layer-invariant 3-D
    l3 = lambda i: (i, 0, 0)     # per-layer block

    in_specs = [
        pl.BlockSpec((B, R), c2),                        # x
        pl.BlockSpec((B, L, R), c3),                     # att
        pl.BlockSpec((2, B, R), l3),                     # state: [prev_c, prev_h] of layer i
        pl.BlockSpec((R, O), c2),                        # pwW
        pl.BlockSpec((1, O), c2),                        # pwb
        pl.BlockSpec((None, R, 2 * A), l3),              # aWa   (layer's 2 att modules)
        pl.BlockSpec((None, 1, 2 * A), l3),              # aba
        pl.BlockSpec((2, 2 * R, A), l3),                 # aWxh  (modules 2i, 2i+1)
        pl.BlockSpec((None, 2, A), l3),                  # abxh
        pl.BlockSpec((None, 2, A), l3),                  # aWal
        pl.BlockSpec((None, R, G4), l3),                 # aW2h  (hoisted a2h weights)
        pl.BlockSpec((None, 2 * R, G4), l3),             # gW    (fused i2h|h2h, NP cores)
        pl.BlockSpec((None, 1, G4), l3),                 # gb
        pl.BlockSpec((None, R, O), l3),                  # pW
        pl.BlockSpec((None, 1, O), l3),                  # pb
    ]
    out_specs = (
        pl.BlockSpec((2, B, R), l3),                     # [next_c, top_h] per layer
        pl.BlockSpec((None, B, O), l3),                  # logprobs per layer
        pl.BlockSpec((B, O), c2),                        # proj_w (layer-invariant)
    )
    return pl.pallas_call(
        lstm_layer_kernel,
        grid=(NL,),
        in_specs=in_specs,
        out_specs=out_specs,
        out_shape=(
            jax.ShapeDtypeStruct((2 * NL, B, R), jnp.float32),
            jax.ShapeDtypeStruct((NL, B, O), jnp.float32),
            jax.ShapeDtypeStruct((B, O), jnp.float32),
        ),
        scratch_shapes=[
            pltpu.VMEM((B, R), jnp.float32),   # top_h carried across layers
            pltpu.VMEM((B, O), jnp.float32),   # proj_w computed once at layer 0
        ],
        compiler_params=pltpu.CompilerParams(
            dimension_semantics=("arbitrary",)),         # serial layer chain
        cost_estimate=pl.CostEstimate(
            flops=54_000_000, transcendentals=70_000, bytes_accessed=2_600_000),
    )(x, att, state,
      fp["pwW"], fp["pwb"],
      fp["aWa"], fp["aba"], fp["aWxh"], fp["abxh"], fp["aWal"],
      fp["aW2h"], fp["gW"], fp["gb"], fp["pW"], fp["pb"])


def init_params(seed=0):
    key = jax.random.PRNGKey(seed)
    ks = iter(jax.random.split(key, 64))

    def lin(kw, kb, fan_in, fan_out, scale=None):
        s = (1.0 / np.sqrt(fan_in)) if scale is None else scale
        w = jax.random.normal(kw, (fan_in, fan_out), jnp.float32) * s
        b = jax.random.normal(kb, (fan_out,), jnp.float32) * 0.01
        return w, b

    def stacked(n, fan_in, fan_out):
        ws, bs = [], []
        for _ in range(n):
            w, b = lin(next(ks), next(ks), fan_in, fan_out)
            ws.append(w)
            bs.append(b)
        return jnp.stack(ws), jnp.stack(bs)

    p = {}
    # proj_weight: xavier_normal on the weight
    pwW, pwb = lin(next(ks), next(ks), R, O, scale=np.sqrt(2.0 / (R + O)))
    p["pwW"] = pwW
    p["pwb"] = pwb.reshape(1, O)
    # attention modules (2 per layer): a2att, h2att, x2att, alpha_net
    p["aWa"], p["aba"] = stacked(NA, R, A)
    p["aWh"], p["abh"] = stacked(NA, R, A)
    p["aWx"], p["abx"] = stacked(NA, R, A)
    aWal, abal = stacked(NA, A, 1)
    p["aWal"] = aWal[..., 0]          # (NA, A)
    p["abal"] = abal                  # (NA, 1) — scalar per module (softmax-invariant)
    assert p["abal"].shape == (NA, 1)
    # LSTM cores (num_layers * num_parallels): i2h, h2h, a2h (each -> 4R)
    p["cWi"], p["cbi"] = stacked(NC, R, 4 * R)
    p["cWh"], p["cbh"] = stacked(NC, R, 4 * R)
    p["cWa"], p["cba"] = stacked(NC, R, 4 * R)
    # per-layer output projection
    p["pW"], p["pb"] = stacked(NL, R, O)
    return p


def prepare_fused_params(p):
    """Host-side weight fusion + bf16 cast (matmul weights only; biases stay f32)."""
    bf16 = jnp.bfloat16
    fp = {}
    fp["pwW"] = p["pwW"].astype(bf16)                         # (R, O)
    fp["pwb"] = p["pwb"]                                      # (1, O)

    # a2att per layer: N-concat the layer's two attention modules.
    fp["aWa"] = jnp.stack(
        [jnp.concatenate([p["aWa"][2 * i], p["aWa"][2 * i + 1]], axis=1)
         for i in range(NL)]).astype(bf16)                    # (NL, R, 2A)
    fp["aba"] = jnp.stack(
        [jnp.concatenate([p["aba"][2 * i], p["aba"][2 * i + 1]], axis=0)
         for i in range(NL)]).reshape(NL, 1, 2 * A)           # (NL, 1, 2A)

    # Per-module fused x2att|h2att (K-concat): kernel LHS is [xt, h].
    fp["aWxh"] = jnp.stack(
        [jnp.concatenate([p["aWx"][n], p["aWh"][n]], axis=0) for n in range(NA)]
    ).astype(bf16)                                            # (NA, 2R, A)
    fp["abxh"] = (p["abx"] + p["abh"]).reshape(NL, 2, A)      # (NL, 2, A)
    fp["aWal"] = p["aWal"].reshape(NL, 2, A)                  # (NL, 2, A) f32 (VPU path)

    # Fused gate weights per layer: K-concat (i2h|h2h) and N-concat the NP
    # parallel cores, columns grouped by gate type [i f o g] x cores.
    # The a2h weights use the SAME column ordering (hoisted path).
    gW, gb, aW2h = [], [], []
    for i in range(NL):
        Wcols, bcols, Acols = [], [], []
        for gate in range(4):
            sl = slice(gate * R, (gate + 1) * R)
            for j in range(NP):
                k = i * NP + j
                Wcols.append(jnp.concatenate(
                    [p["cWi"][k][:, sl], p["cWh"][k][:, sl]], axis=0))    # (2R, R)
                Acols.append(p["cWa"][k][:, sl])                          # (R, R)
                bcols.append(p["cbi"][k][sl] + p["cbh"][k][sl] + p["cba"][k][sl])
        gW.append(jnp.concatenate(Wcols, axis=1))             # (2R, NP*4R)
        aW2h.append(jnp.concatenate(Acols, axis=1))           # (R, NP*4R)
        gb.append(jnp.concatenate(bcols, axis=0))             # (NP*4R,)
    fp["gW"] = jnp.stack(gW).astype(bf16)                     # (NL, 2R, NP*4R)
    fp["aW2h"] = jnp.stack(aW2h).astype(bf16)                 # (NL, R, NP*4R)
    fp["gb"] = jnp.stack(gb).reshape(NL, 1, G4)               # (NL, 1, NP*4R)

    fp["pW"] = p["pW"].astype(bf16)                           # (NL, R, O)
    fp["pb"] = p["pb"].reshape(NL, 1, O)                      # (NL, 1, O)
    return fp


def reference_forward(x, att, state, p):
    hp = functools.partial(jnp.dot, precision=jax.lax.Precision.HIGHEST)
    proj_w = jax.nn.sigmoid(hp(x, p["pwW"]) + p["pwb"])
    att2d = att.reshape(B * L, R)

    def attention(idx, xt, h):
        a_p = (hp(att2d, p["aWa"][idx]) + p["aba"][idx]).reshape(B, L, A)
        h_p = hp(h, p["aWh"][idx]) + p["abh"][idx]
        x_p = hp(xt, p["aWx"][idx]) + p["abx"][idx]
        dot = jnp.tanh(a_p + (h_p + x_p)[:, None, :])
        e = jnp.sum(dot * p["aWal"][idx][None, None, :], axis=-1) + p["abal"][idx]
        w = jax.nn.softmax(e, axis=-1)
        return jnp.sum(att * w[:, :, None], axis=1)

    outs, logps = [], []
    prev_top = None
    for i in range(NL):
        prev_c, prev_h = state[2 * i], state[2 * i + 1]
        xt = x if i == 0 else x + prev_top
        prev_att_res = attention(2 * i, xt, prev_h)
        ncs, nhs = [], []
        for j in range(NP):
            k = i * NP + j
            s = (hp(xt, p["cWi"][k]) + p["cbi"][k]
                 + hp(prev_h, p["cWh"][k]) + p["cbh"][k]
                 + hp(prev_att_res, p["cWa"][k]) + p["cba"][k])
            ig = jax.nn.sigmoid(s[:, :R])
            fg = jax.nn.sigmoid(s[:, R:2 * R])
            og = jax.nn.sigmoid(s[:, 2 * R:3 * R])
            it = jnp.tanh(s[:, 3 * R:])
            nc = fg * prev_c + ig * it
            nh = og * jnp.tanh(nc)
            ncs.append(nc)
            nhs.append(nh)
        next_c = sum(ncs) / NP
        next_h = sum(nhs) / NP
        att_res = attention(2 * i + 1, xt, next_h)
        top_h = att_res + next_h
        logits = (hp(top_h, p["pW"][i]) + p["pb"][i]) * proj_w
        logps.append(jax.nn.log_softmax(logits, axis=-1))
        outs.extend([next_c, top_h])
        prev_top = top_h
    return jnp.stack(outs), jnp.stack(logps), proj_w


if __name__ == "__main__":
    key = jax.random.PRNGKey(0)
    kx, ka, kst = jax.random.split(key, 3)
    x = jax.random.normal(kx, (B, R), jnp.float32)
    att = jax.random.normal(ka, (B, L, R), jnp.float32)
    state = jax.random.normal(kst, (2 * NL, B, R), jnp.float32) * 0.1  # [prev_c, prev_h] per layer
    params = init_params(0)
    fused = prepare_fused_params(params)

    outs, logps, proj_w = jax.block_until_ready(run(x, att, state, fused))

    r_outs, r_logps, r_projw = reference_forward(x, att, state, params)
    # Tolerances account for bf16 matmul weights vs fp32 HIGHEST-precision reference.
    np.testing.assert_allclose(np.asarray(outs), np.asarray(r_outs), rtol=5e-2, atol=5e-2)
    np.testing.assert_allclose(np.asarray(logps), np.asarray(r_logps), rtol=5e-2, atol=5e-2)
    np.testing.assert_allclose(np.asarray(proj_w), np.asarray(r_projw), rtol=5e-2, atol=5e-2)
    print("KERNEL_OK")
</pallas_src>

<mosaic_0001>
module attributes {stable_mosaic.version = 11 : i64} {
  func.func @lstm_layer_kernel(%arg0: i32, %arg1: memref<8x128xf32, #tpu.memory_space<vmem>>, %arg2: memref<8x8x128xf32, #tpu.memory_space<vmem>>, %arg3: memref<2x8x128xf32, #tpu.memory_space<vmem>>, %arg4: memref<128x128xbf16, #tpu.memory_space<vmem>>, %arg5: memref<1x128xf32, #tpu.memory_space<vmem>>, %arg6: memref<1x128x256xbf16, #tpu.memory_space<vmem>>, %arg7: memref<1x1x256xf32, #tpu.memory_space<vmem>>, %arg8: memref<2x256x128xbf16, #tpu.memory_space<vmem>>, %arg9: memref<1x2x128xf32, #tpu.memory_space<vmem>>, %arg10: memref<1x2x128xf32, #tpu.memory_space<vmem>>, %arg11: memref<1x128x1024xbf16, #tpu.memory_space<vmem>>, %arg12: memref<1x256x1024xbf16, #tpu.memory_space<vmem>>, %arg13: memref<1x1x1024xf32, #tpu.memory_space<vmem>>, %arg14: memref<1x128x128xbf16, #tpu.memory_space<vmem>>, %arg15: memref<1x1x128xf32, #tpu.memory_space<vmem>>, %arg16: memref<2x8x128xf32, #tpu.memory_space<vmem>>, %arg17: memref<1x8x128xf32, #tpu.memory_space<vmem>>, %arg18: memref<8x128xf32, #tpu.memory_space<vmem>>, %arg19: memref<8x128xf32, #tpu.memory_space<vmem>>, %arg20: memref<8x128xf32, #tpu.memory_space<vmem>>) attributes {dimension_semantics = [#tpu.dimension_semantics<arbitrary>], iteration_bounds = array<i64: 2>, scalar_prefetch = 0 : i64, scratch_operands = 2 : i64, tpu.core_type = #tpu.core_type<tc>, window_params = [{pipeline_mode = #tpu.pipeline_mode<synchronous>, transform_indices = @transform_0, window_bounds = array<i64: 8, 128>}, {pipeline_mode = #tpu.pipeline_mode<synchronous>, transform_indices = @transform_1, window_bounds = array<i64: 8, 8, 128>}, {transform_indices = @transform_2, window_bounds = array<i64: 2, 8, 128>}, {pipeline_mode = #tpu.pipeline_mode<synchronous>, transform_indices = @transform_3, window_bounds = array<i64: 128, 128>}, {pipeline_mode = #tpu.pipeline_mode<synchronous>, transform_indices = @transform_4, window_bounds = array<i64: 1, 128>}, {transform_indices = @transform_5, window_bounds = array<i64: 1, 128, 256>}, {transform_indices = @transform_6, window_bounds = array<i64: 1, 1, 256>}, {transform_indices = @transform_7, window_bounds = array<i64: 2, 256, 128>}, {transform_indices = @transform_8, window_bounds = array<i64: 1, 2, 128>}, {transform_indices = @transform_9, window_bounds = array<i64: 1, 2, 128>}, {transform_indices = @transform_10, window_bounds = array<i64: 1, 128, 1024>}, {transform_indices = @transform_11, window_bounds = array<i64: 1, 256, 1024>}, {transform_indices = @transform_12, window_bounds = array<i64: 1, 1, 1024>}, {transform_indices = @transform_13, window_bounds = array<i64: 1, 128, 128>}, {transform_indices = @transform_14, window_bounds = array<i64: 1, 1, 128>}, {transform_indices = @transform_15, window_bounds = array<i64: 2, 8, 128>}, {transform_indices = @transform_16, window_bounds = array<i64: 1, 8, 128>}, {pipeline_mode = #tpu.pipeline_mode<synchronous>, transform_indices = @transform_17, window_bounds = array<i64: 8, 128>}]} {
    %c0 = arith.constant 0 : index
    %c0_0 = arith.constant 0 : index
    %0 = vector.load %arg1[%c0, %c0_0] : memref<8x128xf32, #tpu.memory_space<vmem>>, vector<8x128xf32>
    %c0_1 = arith.constant 0 : index
    %c0_2 = arith.constant 0 : index
    %c0_3 = arith.constant 0 : index
    %1 = vector.load %arg2[%c0_1, %c0_2, %c0_3] : memref<8x8x128xf32, #tpu.memory_space<vmem>>, vector<8x8x128xf32>
    %2 = vector.shape_cast %1 : vector<8x8x128xf32> to vector<64x128xf32>
    %3 = arith.truncf %2 : vector<64x128xf32> to vector<64x128xbf16>
    %c0_i32 = arith.constant 0 : i32
    %4 = arith.cmpi eq, %arg0, %c0_i32 : i32
    %5 = arith.extui %4 : i1 to i32
    %c0_i32_4 = arith.constant 0 : i32
    %6 = arith.cmpi ne, %5, %c0_i32_4 : i32
    scf.if %6 {
      %170 = arith.truncf %0 : vector<8x128xf32> to vector<8x128xbf16>
      %c0_89 = arith.constant 0 : index
      %c0_90 = arith.constant 0 : index
      %171 = vector.load %arg4[%c0_89, %c0_90] : memref<128x128xbf16, #tpu.memory_space<vmem>>, vector<128x128xbf16>
      %cst_91 = arith.constant dense<0.000000e+00> : vector<8x128xf32>
      %172 = tpu.matmul %170, %171, %cst_91 {dimension_numbers = #tpu.dot_dimension_numbers<[1], [0], [0], [1], [0, 0, 1, 1], [], []>} : vector<8x128xbf16>, vector<128x128xbf16>, vector<8x128xf32> -> vector<8x128xf32>
      %c0_92 = arith.constant 0 : index
      %c0_93 = arith.constant 0 : index
      %173 = vector.load %arg5[%c0_92, %c0_93] : memref<1x128xf32, #tpu.memory_space<vmem>>, vector<1x128xf32>
      %174 = vector.broadcast %173 : vector<1x128xf32> to vector<8x128xf32>
      %175 = arith.addf %172, %174 : vector<8x128xf32>
      %176 = arith.negf %175 : vector<8x128xf32>
      %177 = math.exp %176 : vector<8x128xf32>
      %cst_94 = arith.constant 1.000000e+00 : f32
      %178 = vector.broadcast %cst_94 : f32 to vector<8x128xf32>
      %179 = arith.addf %178, %177 : vector<8x128xf32>
      %180 = arith.divf %178, %179 : vector<8x128xf32>
      %c0_95 = arith.constant 0 : index
      %c0_96 = arith.constant 0 : index
      %181 = vector.load %arg20[%c0_95, %c0_96] : memref<8x128xf32, #tpu.memory_space<vmem>>, vector<8x128xf32>
      tpu.vector_store %arg20[%c0_95, %c0_96], %180 {strides = array<i32>} : memref<8x128xf32, #tpu.memory_space<vmem>>, vector<8x128xf32>,
      %cst_97 = arith.constant 0.000000e+00 : f32
      %182 = vector.broadcast %cst_97 : f32 to vector<8x128xf32>
      %c0_98 = arith.constant 0 : index
      %c0_99 = arith.constant 0 : index
      %183 = vector.load %arg19[%c0_98, %c0_99] : memref<8x128xf32, #tpu.memory_space<vmem>>, vector<8x128xf32>
      tpu.vector_store %arg19[%c0_98, %c0_99], %182 {strides = array<i32>} : memref<8x128xf32, #tpu.memory_space<vmem>>, vector<8x128xf32>,
    } else {
    }
    %c0_5 = arith.constant 0 : index
    %c0_6 = arith.constant 0 : index
    %7 = vector.load %arg20[%c0_5, %c0_6] : memref<8x128xf32, #tpu.memory_space<vmem>>, vector<8x128xf32>
    %c0_7 = arith.constant 0 : index
    %c0_8 = arith.constant 0 : index
    %c0_9 = arith.constant 0 : index
    %8 = vector.load %arg3[%c0_7, %c0_8, %c0_9] : memref<2x8x128xf32, #tpu.memory_space<vmem>>, vector<1x8x128xf32>
    %9 = vector.shape_cast %8 : vector<1x8x128xf32> to vector<8x128xf32>
    %c1 = arith.constant 1 : index
    %c0_10 = arith.constant 0 : index
    %c0_11 = arith.constant 0 : index
    %10 = vector.load %arg3[%c1, %c0_10, %c0_11] : memref<2x8x128xf32, #tpu.memory_space<vmem>>, vector<1x8x128xf32>
    %11 = vector.shape_cast %10 : vector<1x8x128xf32> to vector<8x128xf32>
    %c0_12 = arith.constant 0 : index
    %c0_13 = arith.constant 0 : index
    %12 = vector.load %arg19[%c0_12, %c0_13] : memref<8x128xf32, #tpu.memory_space<vmem>>, vector<8x128xf32>
    %13 = arith.addf %0, %12 : vector<8x128xf32>
    %14 = arith.truncf %13 : vector<8x128xf32> to vector<8x128xbf16>
    %15 = arith.truncf %11 : vector<8x128xf32> to vector<8x128xbf16>
    %c0_14 = arith.constant 0 : index
    %c0_15 = arith.constant 0 : index
    %c0_16 = arith.constant 0 : index
    %16 = vector.load %arg6[%c0_14, %c0_15, %c0_16] : memref<1x128x256xbf16, #tpu.memory_space<vmem>>, vector<1x128x256xbf16>
    %17 = vector.shape_cast %16 : vector<1x128x256xbf16> to vector<128x256xbf16>
    %cst = arith.constant dense<0.000000e+00> : vector<64x256xf32>
    %18 = tpu.matmul %3, %17, %cst {dimension_numbers = #tpu.dot_dimension_numbers<[1], [0], [0], [1], [0, 0, 1, 1], [], []>} : vector<64x128xbf16>, vector<128x256xbf16>, vector<64x256xf32> -> vector<64x256xf32>
    %c0_17 = arith.constant 0 : index
    %c0_18 = arith.constant 0 : index
    %c0_19 = arith.constant 0 : index
    %19 = vector.load %arg7[%c0_17, %c0_18, %c0_19] : memref<1x1x256xf32, #tpu.memory_space<vmem>>, vector<1x1x256xf32>
    %20 = vector.shape_cast %19 : vector<1x1x256xf32> to vector<1x256xf32>
    %21 = vector.broadcast %20 : vector<1x256xf32> to vector<64x256xf32>
    %22 = arith.addf %18, %21 : vector<64x256xf32>
    %c0_20 = arith.constant 0 : index
    %c0_21 = arith.constant 0 : index
    %c0_22 = arith.constant 0 : index
    %23 = vector.load %arg11[%c0_20, %c0_21, %c0_22] : memref<1x128x1024xbf16, #tpu.memory_space<vmem>>, vector<1x128x1024xbf16>
    %24 = vector.shape_cast %23 : vector<1x128x1024xbf16> to vector<128x1024xbf16>
    %cst_23 = arith.constant dense<0.000000e+00> : vector<64x1024xf32>
    %25 = tpu.matmul %3, %24, %cst_23 {dimension_numbers = #tpu.dot_dimension_numbers<[1], [0], [0], [1], [0, 0, 1, 1], [], []>} : vector<64x128xbf16>, vector<128x1024xbf16>, vector<64x1024xf32> -> vector<64x1024xf32>
    %26 = vector.shape_cast %25 : vector<64x1024xf32> to vector<8x8x1024xf32>
    %27 = tpu.concatenate %14, %15 in 1 : vector<8x128xbf16>, vector<8x128xbf16> -> vector<8x256xbf16>
    %c0_24 = arith.constant 0 : index
    %c0_25 = arith.constant 0 : index
    %c0_26 = arith.constant 0 : index
    %28 = vector.load %arg12[%c0_24, %c0_25, %c0_26] : memref<1x256x1024xbf16, #tpu.memory_space<vmem>>, vector<1x256x1024xbf16>
    %29 = vector.shape_cast %28 : vector<1x256x1024xbf16> to vector<256x1024xbf16>
    %cst_27 = arith.constant dense<0.000000e+00> : vector<8x1024xf32>
    %30 = tpu.matmul %27, %29, %cst_27 {dimension_numbers = #tpu.dot_dimension_numbers<[1], [0], [0], [1], [0, 0, 1, 1], [], []>} : vector<8x256xbf16>, vector<256x1024xbf16>, vector<8x1024xf32> -> vector<8x1024xf32>
    %c0_28 = arith.constant 0 : index
    %c0_29 = arith.constant 0 : index
    %c0_30 = arith.constant 0 : index
    %31 = vector.load %arg13[%c0_28, %c0_29, %c0_30] : memref<1x1x1024xf32, #tpu.memory_space<vmem>>, vector<1x1x1024xf32>
    %32 = vector.shape_cast %31 : vector<1x1x1024xf32> to vector<1x1024xf32>
    %33 = vector.broadcast %32 : vector<1x1024xf32> to vector<8x1024xf32>
    %34 = arith.addf %30, %33 : vector<8x1024xf32>
    %c0_31 = arith.constant 0 : index
    %c0_32 = arith.constant 0 : index
    %c0_33 = arith.constant 0 : index
    %35 = vector.load %arg8[%c0_31, %c0_32, %c0_33] : memref<2x256x128xbf16, #tpu.memory_space<vmem>>, vector<1x256x128xbf16>
    %36 = vector.shape_cast %35 : vector<1x256x128xbf16> to vector<256x128xbf16>
    %cst_34 = arith.constant dense<0.000000e+00> : vector<8x128xf32>
    %37 = tpu.matmul %27, %36, %cst_34 {dimension_numbers = #tpu.dot_dimension_numbers<[1], [0], [0], [1], [0, 0, 1, 1], [], []>} : vector<8x256xbf16>, vector<256x128xbf16>, vector<8x128xf32> -> vector<8x128xf32>
    %c0_35 = arith.constant 0 : index
    %c0_36 = arith.constant 0 : index
    %c0_37 = arith.constant 0 : index
    %38 = vector.load %arg9[%c0_35, %c0_36, %c0_37] : memref<1x2x128xf32, #tpu.memory_space<vmem>>, vector<1x1x128xf32>
    %39 = vector.shape_cast %38 : vector<1x1x128xf32> to vector<1x128xf32>
    %40 = vector.broadcast %39 : vector<1x128xf32> to vector<8x128xf32>
    %41 = arith.addf %37, %40 : vector<8x128xf32>
    %42 = vector.extract_strided_slice %22 {offsets = [0, 0], sizes = [64, 128], strides = [1, 1]} : vector<64x256xf32> to vector<64x128xf32>
    %43 = vector.shape_cast %42 : vector<64x128xf32> to vector<8x8x128xf32>
    %44 = vector.shape_cast %41 : vector<8x128xf32> to vector<8x1x128xf32>
    %45 = vector.broadcast %44 : vector<8x1x128xf32> to vector<8x8x128xf32>
    %46 = arith.addf %43, %45 : vector<8x8x128xf32>
    %47 = math.tanh %46 : vector<8x8x128xf32>
    %c0_38 = arith.constant 0 : index
    %c0_39 = arith.constant 0 : index
    %c0_40 = arith.constant 0 : index
    %48 = vector.load %arg10[%c0_38, %c0_39, %c0_40] : memref<1x2x128xf32, #tpu.memory_space<vmem>>, vector<1x1x128xf32>
    %49 = vector.shape_cast %48 : vector<1x1x128xf32> to vector<1x128xf32>
    %50 = vector.shape_cast %49 : vector<1x128xf32> to vector<1x1x128xf32>
    %51 = vector.broadcast %50 : vector<1x1x128xf32> to vector<8x8x128xf32>
    %52 = arith.mulf %47, %51 : vector<8x8x128xf32>
    %cst_41 = arith.constant dense<0.000000e+00> : vector<8x8xf32>
    %53 = vector.multi_reduction <add>, %52, %cst_41 [2] : vector<8x8x128xf32> to vector<8x8xf32>
    %cst_42 = arith.constant dense<0xFF800000> : vector<8xf32>
    %54 = vector.multi_reduction <maximumf>, %53, %cst_42 [1] : vector<8x8xf32> to vector<8xf32>
    %cst_43 = arith.constant 0xFF800000 : f32
    %55 = vector.broadcast %cst_43 : f32 to vector<8xf32>
    %56 = arith.maximumf %55, %54 : vector<8xf32>
    %57 = vector.shape_cast %56 : vector<8xf32> to vector<8x1xf32>
    %58 = vector.broadcast %57 : vector<8x1xf32> to vector<8x8xf32>
    %59 = arith.subf %53, %58 : vector<8x8xf32>
    %60 = math.exp %59 : vector<8x8xf32>
    %cst_44 = arith.constant dense<0.000000e+00> : vector<8xf32>
    %61 = vector.multi_reduction <add>, %60, %cst_44 [1] : vector<8x8xf32> to vector<8xf32>
    %62 = vector.shape_cast %61 : vector<8xf32> to vector<8x1xf32>
    %63 = vector.broadcast %62 : vector<8x1xf32> to vector<8x8xf32>
    %64 = arith.divf %60, %63 : vector<8x8xf32>
    %65 = vector.shape_cast %64 : vector<8x8xf32> to vector<8x8x1xf32>
    %66 = vector.broadcast %65 : vector<8x8x1xf32> to vector<8x8x1024xf32>
    %67 = arith.mulf %66, %26 : vector<8x8x1024xf32>
    %cst_45 = arith.constant dense<0.000000e+00> : vector<8x1024xf32>
    %68 = vector.multi_reduction <add>, %67, %cst_45 [1] : vector<8x8x1024xf32> to vector<8x1024xf32>
    %69 = arith.addf %34, %68 : vector<8x1024xf32>
    %70 = vector.extract_strided_slice %69 {offsets = [0, 0], sizes = [8, 768], strides = [1, 1]} : vector<8x1024xf32> to vector<8x768xf32>
    %71 = arith.negf %70 : vector<8x768xf32>
    %72 = math.exp %71 : vector<8x768xf32>
    %cst_46 = arith.constant 1.000000e+00 : f32
    %73 = vector.broadcast %cst_46 : f32 to vector<8x768xf32>
    %74 = arith.addf %73, %72 : vector<8x768xf32>
    %75 = arith.divf %73, %74 : vector<8x768xf32>
    %76 = vector.extract_strided_slice %69 {offsets = [0, 768], sizes = [8, 256], strides = [1, 1]} : vector<8x1024xf32> to vector<8x256xf32>
    %77 = math.tanh %76 : vector<8x256xf32>
    %78 = vector.extract_strided_slice %75 {offsets = [0, 0], sizes = [8, 256], strides = [1, 1]} : vector<8x768xf32> to vector<8x256xf32>
    %79 = vector.extract_strided_slice %75 {offsets = [0, 256], sizes = [8, 256], strides = [1, 1]} : vector<8x768xf32> to vector<8x256xf32>
    %80 = vector.extract_strided_slice %75 {offsets = [0, 512], sizes = [8, 256], strides = [1, 1]} : vector<8x768xf32> to vector<8x256xf32>
    %81 = tpu.concatenate %9, %9 in 1 : vector<8x128xf32>, vector<8x128xf32> -> vector<8x256xf32>
    %82 = arith.mulf %79, %81 : vector<8x256xf32>
    %83 = arith.mulf %78, %77 : vector<8x256xf32>
    %84 = arith.addf %82, %83 : vector<8x256xf32>
    %85 = math.tanh %84 : vector<8x256xf32>
    %86 = arith.mulf %80, %85 : vector<8x256xf32>
    %87 = vector.extract_strided_slice %84 {offsets = [0, 0], sizes = [8, 128], strides = [1, 1]} : vector<8x256xf32> to vector<8x128xf32>
    %cst_47 = arith.constant 0.000000e+00 : f32
    %88 = vector.broadcast %cst_47 : f32 to vector<8x128xf32>
    %89 = arith.addf %88, %87 : vector<8x128xf32>
    %90 = vector.extract_strided_slice %84 {offsets = [0, 128], sizes = [8, 128], strides = [1, 1]} : vector<8x256xf32> to vector<8x128xf32>
    %91 = arith.addf %89, %90 : vector<8x128xf32>
    %cst_48 = arith.constant 5.000000e-01 : f32
    %92 = vector.broadcast %cst_48 : f32 to vector<8x128xf32>
    %93 = arith.mulf %91, %92 : vector<8x128xf32>
    %94 = vector.extract_strided_slice %86 {offsets = [0, 0], sizes = [8, 128], strides = [1, 1]} : vector<8x256xf32> to vector<8x128xf32>
    %cst_49 = arith.constant 0.000000e+00 : f32
    %95 = vector.broadcast %cst_49 : f32 to vector<8x128xf32>
    %96 = arith.addf %95, %94 : vector<8x128xf32>
    %97 = vector.extract_strided_slice %86 {offsets = [0, 128], sizes = [8, 128], strides = [1, 1]} : vector<8x256xf32> to vector<8x128xf32>
    %98 = arith.addf %96, %97 : vector<8x128xf32>
    %cst_50 = arith.constant 5.000000e-01 : f32
    %99 = vector.broadcast %cst_50 : f32 to vector<8x128xf32>
    %100 = arith.mulf %98, %99 : vector<8x128xf32>
    %101 = arith.truncf %100 : vector<8x128xf32> to vector<8x128xbf16>
    %102 = tpu.concatenate %14, %101 in 1 : vector<8x128xbf16>, vector<8x128xbf16> -> vector<8x256xbf16>
    %c1_51 = arith.constant 1 : index
    %c0_52 = arith.constant 0 : index
    %c0_53 = arith.constant 0 : index
    %103 = vector.load %arg8[%c1_51, %c0_52, %c0_53] : memref<2x256x128xbf16, #tpu.memory_space<vmem>>, vector<1x256x128xbf16>
    %104 = vector.shape_cast %103 : vector<1x256x128xbf16> to vector<256x128xbf16>
    %cst_54 = arith.constant dense<0.000000e+00> : vector<8x128xf32>
    %105 = tpu.matmul %102, %104, %cst_54 {dimension_numbers = #tpu.dot_dimension_numbers<[1], [0], [0], [1], [0, 0, 1, 1], [], []>} : vector<8x256xbf16>, vector<256x128xbf16>, vector<8x128xf32> -> vector<8x128xf32>
    %c0_55 = arith.constant 0 : index
    %c1_56 = arith.constant 1 : index
    %c0_57 = arith.constant 0 : index
    %106 = vector.load %arg9[%c0_55, %c1_56, %c0_57] : memref<1x2x128xf32, #tpu.memory_space<vmem>>, vector<1x1x128xf32>
    %107 = vector.shape_cast %106 : vector<1x1x128xf32> to vector<1x128xf32>
    %108 = vector.broadcast %107 : vector<1x128xf32> to vector<8x128xf32>
    %109 = arith.addf %105, %108 : vector<8x128xf32>
    %110 = vector.extract_strided_slice %22 {offsets = [0, 128], sizes = [64, 128], strides = [1, 1]} : vector<64x256xf32> to vector<64x128xf32>
    %111 = vector.shape_cast %110 : vector<64x128xf32> to vector<8x8x128xf32>
    %112 = vector.shape_cast %109 : vector<8x128xf32> to vector<8x1x128xf32>
    %113 = vector.broadcast %112 : vector<8x1x128xf32> to vector<8x8x128xf32>
    %114 = arith.addf %111, %113 : vector<8x8x128xf32>
    %115 = math.tanh %114 : vector<8x8x128xf32>
    %c0_58 = arith.constant 0 : index
    %c1_59 = arith.constant 1 : index
    %c0_60 = arith.constant 0 : index
    %116 = vector.load %arg10[%c0_58, %c1_59, %c0_60] : memref<1x2x128xf32, #tpu.memory_space<vmem>>, vector<1x1x128xf32>
    %117 = vector.shape_cast %116 : vector<1x1x128xf32> to vector<1x128xf32>
    %118 = vector.shape_cast %117 : vector<1x128xf32> to vector<1x1x128xf32>
    %119 = vector.broadcast %118 : vector<1x1x128xf32> to vector<8x8x128xf32>
    %120 = arith.mulf %115, %119 : vector<8x8x128xf32>
    %cst_61 = arith.constant dense<0.000000e+00> : vector<8x8xf32>
    %121 = vector.multi_reduction <add>, %120, %cst_61 [2] : vector<8x8x128xf32> to vector<8x8xf32>
    %cst_62 = arith.constant dense<0xFF800000> : vector<8xf32>
    %122 = vector.multi_reduction <maximumf>, %121, %cst_62 [1] : vector<8x8xf32> to vector<8xf32>
    %cst_63 = arith.constant 0xFF800000 : f32
    %123 = vector.broadcast %cst_63 : f32 to vector<8xf32>
    %124 = arith.maximumf %123, %122 : vector<8xf32>
    %125 = vector.shape_cast %124 : vector<8xf32> to vector<8x1xf32>
    %126 = vector.broadcast %125 : vector<8x1xf32> to vector<8x8xf32>
    %127 = arith.subf %121, %126 : vector<8x8xf32>
    %128 = math.exp %127 : vector<8x8xf32>
    %cst_64 = arith.constant dense<0.000000e+00> : vector<8xf32>
    %129 = vector.multi_reduction <add>, %128, %cst_64 [1] : vector<8x8xf32> to vector<8xf32>
    %130 = vector.shape_cast %129 : vector<8xf32> to vector<8x1xf32>
    %131 = vector.broadcast %130 : vector<8x1xf32> to vector<8x8xf32>
    %132 = arith.divf %128, %131 : vector<8x8xf32>
    %133 = vector.shape_cast %132 : vector<8x8xf32> to vector<8x8x1xf32>
    %134 = vector.broadcast %133 : vector<8x8x1xf32> to vector<8x8x128xf32>
    %135 = arith.mulf %1, %134 : vector<8x8x128xf32>
    %cst_65 = arith.constant dense<0.000000e+00> : vector<8x128xf32>
    %136 = vector.multi_reduction <add>, %135, %cst_65 [1] : vector<8x8x128xf32> to vector<8x128xf32>
    %137 = arith.addf %136, %100 : vector<8x128xf32>
    %138 = arith.truncf %137 : vector<8x128xf32> to vector<8x128xbf16>
    %c0_66 = arith.constant 0 : index
    %c0_67 = arith.constant 0 : index
    %c0_68 = arith.constant 0 : index
    %139 = vector.load %arg14[%c0_66, %c0_67, %c0_68] : memref<1x128x128xbf16, #tpu.memory_space<vmem>>, vector<1x128x128xbf16>
    %140 = vector.shape_cast %139 : vector<1x128x128xbf16> to vector<128x128xbf16>
    %cst_69 = arith.constant dense<0.000000e+00> : vector<8x128xf32>
    %141 = tpu.matmul %138, %140, %cst_69 {dimension_numbers = #tpu.dot_dimension_numbers<[1], [0], [0], [1], [0, 0, 1, 1], [], []>} : vector<8x128xbf16>, vector<128x128xbf16>, vector<8x128xf32> -> vector<8x128xf32>
    %c0_70 = arith.constant 0 : index
    %c0_71 = arith.constant 0 : index
    %c0_72 = arith.constant 0 : index
    %142 = vector.load %arg15[%c0_70, %c0_71, %c0_72] : memref<1x1x128xf32, #tpu.memory_space<vmem>>, vector<1x1x128xf32>
    %143 = vector.shape_cast %142 : vector<1x1x128xf32> to vector<1x128xf32>
    %144 = vector.broadcast %143 : vector<1x128xf32> to vector<8x128xf32>
    %145 = arith.addf %141, %144 : vector<8x128xf32>
    %146 = arith.mulf %145, %7 : vector<8x128xf32>
    %cst_73 = arith.constant dense<0xFF800000> : vector<8xf32>
    %147 = vector.multi_reduction <maximumf>, %146, %cst_73 [1] : vector<8x128xf32> to vector<8xf32>
    %cst_74 = arith.constant 0xFF800000 : f32
    %148 = vector.broadcast %cst_74 : f32 to vector<8xf32>
    %149 = arith.maximumf %148, %147 : vector<8xf32>
    %150 = vector.shape_cast %149 : vector<8xf32> to vector<8x1xf32>
    %151 = vector.broadcast %150 : vector<8x1xf32> to vector<8x128xf32>
    %152 = arith.subf %146, %151 : vector<8x128xf32>
    %153 = math.exp %152 : vector<8x128xf32>
    %cst_75 = arith.constant dense<0.000000e+00> : vector<8xf32>
    %154 = vector.multi_reduction <add>, %153, %cst_75 [1] : vector<8x128xf32> to vector<8xf32>
    %155 = vector.shape_cast %154 : vector<8xf32> to vector<8x1xf32>
    %156 = math.log %155 : vector<8x1xf32>
    %157 = vector.broadcast %156 : vector<8x1xf32> to vector<8x128xf32>
    %158 = arith.subf %152, %157 : vector<8x128xf32>
    %c0_76 = arith.constant 0 : index
    %c0_77 = arith.constant 0 : index
    %c0_78 = arith.constant 0 : index
    %159 = vector.load %arg16[%c0_76, %c0_77, %c0_78] : memref<2x8x128xf32, #tpu.memory_space<vmem>>, vector<1x8x128xf32>
    %160 = vector.shape_cast %159 : vector<1x8x128xf32> to vector<8x128xf32>
    %161 = vector.shape_cast %93 : vector<8x128xf32> to vector<1x8x128xf32>
    tpu.vector_store %arg16[%c0_76, %c0_77, %c0_78], %161 {strides = array<i32>} : memref<2x8x128xf32, #tpu.memory_space<vmem>>, vector<1x8x128xf32>,
    %c1_79 = arith.constant 1 : index
    %c0_80 = arith.constant 0 : index
    %c0_81 = arith.constant 0 : index
    %162 = vector.load %arg16[%c1_79, %c0_80, %c0_81] : memref<2x8x128xf32, #tpu.memory_space<vmem>>, vector<1x8x128xf32>
    %163 = vector.shape_cast %162 : vector<1x8x128xf32> to vector<8x128xf32>
    %164 = vector.shape_cast %137 : vector<8x128xf32> to vector<1x8x128xf32>
    tpu.vector_store %arg16[%c1_79, %c0_80, %c0_81], %164 {strides = array<i32>} : memref<2x8x128xf32, #tpu.memory_space<vmem>>, vector<1x8x128xf32>,
    %c0_82 = arith.constant 0 : index
    %c0_83 = arith.constant 0 : index
    %c0_84 = arith.constant 0 : index
    %165 = vector.load %arg17[%c0_82, %c0_83, %c0_84] : memref<1x8x128xf32, #tpu.memory_space<vmem>>, vector<1x8x128xf32>
    %166 = vector.shape_cast %165 : vector<1x8x128xf32> to vector<8x128xf32>
    %167 = vector.shape_cast %158 : vector<8x128xf32> to vector<1x8x128xf32>
    tpu.vector_store %arg17[%c0_82, %c0_83, %c0_84], %167 {strides = array<i32>} : memref<1x8x128xf32, #tpu.memory_space<vmem>>, vector<1x8x128xf32>,
    %c0_85 = arith.constant 0 : index
    %c0_86 = arith.constant 0 : index
    %168 = vector.load %arg18[%c0_85, %c0_86] : memref<8x128xf32, #tpu.memory_space<vmem>>, vector<8x128xf32>
    tpu.vector_store %arg18[%c0_85, %c0_86], %7 {strides = array<i32>} : memref<8x128xf32, #tpu.memory_space<vmem>>, vector<8x128xf32>,
    %c0_87 = arith.constant 0 : index
    %c0_88 = arith.constant 0 : index
    %169 = vector.load %arg19[%c0_87, %c0_88] : memref<8x128xf32, #tpu.memory_space<vmem>>, vector<8x128xf32>
    tpu.vector_store %arg19[%c0_87, %c0_88], %137 {strides = array<i32>} : memref<8x128xf32, #tpu.memory_space<vmem>>, vector<8x128xf32>,
    return
  }
  func.func @transform_0(%arg0: i32) -> (i32, i32) {
    %c0_i32 = arith.constant 0 : i32
    %c0_i32_0 = arith.constant 0 : i32
    %c0_i32_1 = arith.constant 0 : i32
    return %c0_i32, %c0_i32_0 : i32, i32
  }
  func.func @transform_1(%arg0: i32) -> (i32, i32, i32) {
    %c0_i32 = arith.constant 0 : i32
    %c0_i32_0 = arith.constant 0 : i32
    %c0_i32_1 = arith.constant 0 : i32
    %c0_i32_2 = arith.constant 0 : i32
    return %c0_i32, %c0_i32_0, %c0_i32_1 : i32, i32, i32
  }
  func.func @transform_2(%arg0: i32) -> (i32, i32, i32) {
    %c0_i32 = arith.constant 0 : i32
    %c0_i32_0 = arith.constant 0 : i32
    %c0_i32_1 = arith.constant 0 : i32
    return %arg0, %c0_i32, %c0_i32_0 : i32, i32, i32
  }
  func.func @transform_3(%arg0: i32) -> (i32, i32) {
    %c0_i32 = arith.constant 0 : i32
    %c0_i32_0 = arith.constant 0 : i32
    %c0_i32_1 = arith.constant 0 : i32
    return %c0_i32, %c0_i32_0 : i32, i32
  }
  func.func @transform_4(%arg0: i32) -> (i32, i32) {
    %c0_i32 = arith.constant 0 : i32
    %c0_i32_0 = arith.constant 0 : i32
    %c0_i32_1 = arith.constant 0 : i32
    return %c0_i32, %c0_i32_0 : i32, i32
  }
  func.func @transform_5(%arg0: i32) -> (i32, i32, i32) {
    %c0_i32 = arith.constant 0 : i32
    %c0_i32_0 = arith.constant 0 : i32
    %c0_i32_1 = arith.constant 0 : i32
    return %arg0, %c0_i32, %c0_i32_0 : i32, i32, i32
  }
  func.func @transform_6(%arg0: i32) -> (i32, i32, i32) {
    %c0_i32 = arith.constant 0 : i32
    %c0_i32_0 = arith.constant 0 : i32
    %c0_i32_1 = arith.constant 0 : i32
    return %arg0, %c0_i32, %c0_i32_0 : i32, i32, i32
  }
  func.func @transform_7(%arg0: i32) -> (i32, i32, i32) {
    %c0_i32 = arith.constant 0 : i32
    %c0_i32_0 = arith.constant 0 : i32
    %c0_i32_1 = arith.constant 0 : i32
    return %arg0, %c0_i32, %c0_i32_0 : i32, i32, i32
  }
  func.func @transform_8(%arg0: i32) -> (i32, i32, i32) {
    %c0_i32 = arith.constant 0 : i32
    %c0_i32_0 = arith.constant 0 : i32
    %c0_i32_1 = arith.constant 0 : i32
    return %arg0, %c0_i32, %c0_i32_0 : i32, i32, i32
  }
  func.func @transform_9(%arg0: i32) -> (i32, i32, i32) {
    %c0_i32 = arith.constant 0 : i32
    %c0_i32_0 = arith.constant 0 : i32
    %c0_i32_1 = arith.constant 0 : i32
    return %arg0, %c0_i32, %c0_i32_0 : i32, i32, i32
  }
  func.func @transform_10(%arg0: i32) -> (i32, i32, i32) {
    %c0_i32 = arith.constant 0 : i32
    %c0_i32_0 = arith.constant 0 : i32
    %c0_i32_1 = arith.constant 0 : i32
    return %arg0, %c0_i32, %c0_i32_0 : i32, i32, i32
  }
  func.func @transform_11(%arg0: i32) -> (i32, i32, i32) {
    %c0_i32 = arith.constant 0 : i32
    %c0_i32_0 = arith.constant 0 : i32
    %c0_i32_1 = arith.constant 0 : i32
    return %arg0, %c0_i32, %c0_i32_0 : i32, i32, i32
  }
  func.func @transform_12(%arg0: i32) -> (i32, i32, i32) {
    %c0_i32 = arith.constant 0 : i32
    %c0_i32_0 = arith.constant 0 : i32
    %c0_i32_1 = arith.constant 0 : i32
    return %arg0, %c0_i32, %c0_i32_0 : i32, i32, i32
  }
  func.func @transform_13(%arg0: i32) -> (i32, i32, i32) {
    %c0_i32 = arith.constant 0 : i32
    %c0_i32_0 = arith.constant 0 : i32
    %c0_i32_1 = arith.constant 0 : i32
    return %arg0, %c0_i32, %c0_i32_0 : i32, i32, i32
  }
  func.func @transform_14(%arg0: i32) -> (i32, i32, i32) {
    %c0_i32 = arith.constant 0 : i32
    %c0_i32_0 = arith.constant 0 : i32
    %c0_i32_1 = arith.constant 0 : i32
    return %arg0, %c0_i32, %c0_i32_0 : i32, i32, i32
  }
  func.func @transform_15(%arg0: i32) -> (i32, i32, i32) {
    %c0_i32 = arith.constant 0 : i32
    %c0_i32_0 = arith.constant 0 : i32
    %c0_i32_1 = arith.constant 0 : i32
    return %arg0, %c0_i32, %c0_i32_0 : i32, i32, i32
  }
  func.func @transform_16(%arg0: i32) -> (i32, i32, i32) {
    %c0_i32 = arith.constant 0 : i32
    %c0_i32_0 = arith.constant 0 : i32
    %c0_i32_1 = arith.constant 0 : i32
    return %arg0, %c0_i32, %c0_i32_0 : i32, i32, i32
  }
  func.func @transform_17(%arg0: i32) -> (i32, i32) {
    %c0_i32 = arith.constant 0 : i32
    %c0_i32_0 = arith.constant 0 : i32
    %c0_i32_1 = arith.constant 0 : i32
    return %c0_i32, %c0_i32_0 : i32, i32
  }
}

</mosaic_0001>

<bundles_post_ra>
// kernel: run.1
= control target key start
LH: loop header
LB: loop body
LE: loop exit
PB: predicated region body
PF: predicated region fallthrough
CT: control target
= control target key end

     0   :  { %s8382_s0 = inlined_call_operand.hbm [shape: f32[8,128], index: 0, kind: input, shape index: {}]   ;;  %s8383_s1 = inlined_call_operand.hbm [shape: f32[8,8,128], index: 1, kind: input, shape index: {}]   ;;  %s8384_s2 = inlined_call_operand.hbm [shape: f32[4,8,128], index: 2, kind: input, shape index: {}]   ;;  %s8385_s3 = inlined_call_operand.hbm [shape: bf16[128,128], index: 3, kind: input, shape index: {}]   ;;  %s8386_s4 = inlined_call_operand.vmem [shape: f32[1,128], index: 4, kind: input, shape index: {}]   ;;  %s8387_s5 = inlined_call_operand.hbm [shape: bf16[2,128,256], index: 5, kind: input, shape index: {}]   ;;  %s8388_s6 = inlined_call_operand.vmem [shape: f32[2,1,256], index: 6, kind: input, shape index: {}]   ;;  %s8389_s7 = inlined_call_operand.hbm [shape: bf16[4,256,128], index: 7, kind: input, shape index: {}]   ;;  %s8390_s8 = inlined_call_operand.vmem [shape: f32[2,2,128], index: 8, kind: input, shape index: {}]   ;;  %s8391_s9 = inlined_call_operand.vmem [shape: f32[2,2,128], index: 9, kind: input, shape index: {}]   ;;  %s8392_s10 = inlined_call_operand.hbm [shape: bf16[2,128,1024], index: 10, kind: input, shape index: {}]   ;;  %s8393_s11 = inlined_call_operand.hbm [shape: bf16[2,256,1024], index: 11, kind: input, shape index: {}]   ;;  %s8394_s12 = inlined_call_operand.vmem [shape: f32[2,1,1024], index: 12, kind: input, shape index: {}]   ;;  %s8395_s13 = inlined_call_operand.hbm [shape: bf16[2,128,128], index: 13, kind: input, shape index: {}]   ;;  %s8396_s14 = inlined_call_operand.vmem [shape: f32[2,1,128], index: 14, kind: input, shape index: {}]   ;;  %s8397_s15 = inlined_call_operand.hbm [shape: f32[4,8,128], index: 15, kind: output, shape index: {0}]   ;;  %s8398_s16 = inlined_call_operand.hbm [shape: f32[2,8,128], index: 16, kind: output, shape index: {1}]   ;;  %s8399_s17 = inlined_call_operand.hbm [shape: f32[8,128], index: 17, kind: output, shape index: {2}]  }
   0x1   :  { %8464 = sst [smem:[#allocation103_spill]] %s8382_s0 }
   0x2   :  { %8465 = sst [smem:[#allocation104_spill]] %s8383_s1 }
   0x3   :  { %8466 = sst [smem:[#allocation105_spill]] %s8384_s2 }
   0x4   :  { %8467 = sst [smem:[#allocation106_spill]] %s8385_s3 }
   0x5   :  { %8468 = sst [smem:[#allocation107_spill]] %s8386_s4 }
   0x6   :  { %8469 = sst [smem:[#allocation108_spill]] %s8387_s5 }
   0x7   :  { %8470 = sst [smem:[#allocation109_spill]] %s8388_s6 }
   0x8   :  { %8471 = sst [smem:[#allocation110_spill]] %s8390_s8 }
   0x9   :  { %8472 = sst [smem:[#allocation111_spill]] %s8391_s9 }
   0xa   :  { %8473 = sst [smem:[#allocation112_spill]] %s8392_s10 }
   0xb   :  { %8474 = sst [smem:[#allocation113_spill]] %s8394_s12 }
   0xc   :  { %8475 = sst [smem:[#allocation114_spill]] %s8396_s14 }
   0xd   :  { %8476 = sst [smem:[#allocation115_spill]] %s8397_s15 }
   0xe   :  { %8477 = sst [smem:[#allocation116_spill]] %s8398_s16 }
   0xf   :  { %8478 = sst [smem:[#allocation117_spill]] %s8399_s17 }
  0x10   :  { %23 = vsyncpa [#allocation5], 0 }
  0x11   :  { %24 = vsyncpa [#allocation8], 0 }
  0x12   :  { %25 = vsyncpa [#allocation12], 0 }
  0x13   :  { %27 = vsyncpa [#allocation12 + $0x1], 0 }
  0x14   :  { %28 = vsyncpa [#allocation15], 0 }
  0x15   :  { %30 = vsyncpa [#allocation15 + $0x1], 0 }
  0x16   :  { %31 = vsyncpa [#allocation18], 0 }
  0x17   :  { %33 = vsyncpa [#allocation18 + $0x1], 0 }
  0x18   :  { %34 = vsyncpa [#allocation6], 0 }
  0x19   :  { %36 = vsyncpa [#allocation6 + $0x1], 0 }
  0x1a   :  { %37 = vsyncpa [#allocation21], 0 }
  0x1b   :  { %39 = vsyncpa [#allocation21 + $0x1], 0  ;;  %s6673_s24 = smov 0   ;;  %s6675_s25 = smov 0  }
  0x1c   :  { %s6677_s26 = smov 0   ;;  %s6679_s27 = smov 0  }
  0x1d LB: > { %8479 = sst [smem:[#allocation33_spill]] %s6543_s24  ;;  %s6694_s28 = sadd.s32 4294967295, %s6555_s27   ;;  %s6555_s27 = sphi %s6679_s27, %s8674_s27   ;;  %s6551_s26 = sphi %s6677_s26, %s8676_s26   ;;  %s6547_s25 = sphi %s6675_s25, %s8678_s25   ;;  %s6543_s24 = sphi %s6673_s24, %s8677_s24  }
  0x1e   : > { %8480 = sst [smem:[#allocation34_spill]] %s6551_s26  ;;  %s8405_s29 = sadd.s32 4294967294, %s6555_s27  }
  0x1f   : > { %s6698_s0 = sadd.s32 1, %s6555_s27   ;;  %s94_s30 = sadd.s32 1, %s6551_s26 }
  0x20   : > { %8481 = sst [smem:[#allocation35_spill]] %s6698_s0  ;;  %s91_s18 = ssub.s32 %s6555_s27, %s6698_s0 }
  0x21   : > { %p101_p0 = scmp.ne.s32.totalorder %s6551_s26, %s6547_s25  ;;  %p92_p1 = scmp.eq.s32.totalorder %s91_s18, 0 }
  0x22   : > { %p102_p2 = scmp.eq.s32.totalorder %s6555_s27, 0  ;;  %p107_p3 = scmp.ne.s32.totalorder %s6547_s25, %s6543_s24 }
  0x23   : > { %p8402_p4 = scmp.eq.s32.totalorder %s6694_s28, 0  ;;  %p8403_p7 = scmp.eq.s32.totalorder %s6694_s28, 1 }
  0x24   : > { %s6710_s19 = scalar_select %p92_p1, %s6551_s26, %s94_s30  }
  0x25   : > { %p6712_p5 = por %p102_p2, %p101_p0  ;;  %p6718_p6 = por %p8402_p4, %p107_p3 }
  0x26   : > { %8482 = sst [smem:[#allocation36_spill]] %s6710_s19  ;;  %p439_p8 = scmp.eq.s32.totalorder %s8405_s29, 1 }
  0x27   : > { %s8484_s20 = scalar_select %p6718_p6, 1, 0 }
  0x28   : > { %p5337_p9 = scmp.ge.s32.totalorder %s6555_s27, 1  ;;  %p493_p10 = scmp.lt.s32.totalorder %s6555_s27, 3 }
  0x29   : > { %p6729_p11 = por %p8403_p7, %p101_p0  ;;  %p6733_p12 = por %p439_p8, %p107_p3 }
  0x2a   : > { %p6737_p13 = pnand %p5337_p9, %p493_p10  ;;  %s6557_s30 = smov [#allocation4]  }
  0x2b   : > { %s8485_s21 = scalar_select %p6729_p11, 1, 0 }
  0x2c   : > { %s8487_s22 = scalar_select %p6733_p12, 1, 0 }
  0x2d   : > { %8486 = sst [smem:[#allocation37_spill]] %s8485_s21  ;;  %p5832_p4 = pneg %p6737_p13 }
  0x2e   : > { %8488 = sst [smem:[#allocation38_spill]] %s8487_s22  ;;  %s506_s18 = sshll.u32 %s6557_s30, 4  ;;  %s507_s18 = int_to_ptr.vmem [resolvable:$true] %s506_s18 }
  0x2f   : > { %s8489_s23 = scalar_select %p6737_p13, 1, 0 }
  0x30   : > { %p5871_p0 = scmp.lt.s32.totalorder %s6555_s27, 2  ;;  %p8490_p7 = scmp.eq.s32.totalorder %s6694_s28, 0 }
  0x31   : > { %s6558_s0 = smov [#allocation7]   ;;  %s8493_s30 = sld [smem:[#allocation103_spill]] }
  0x32   : > { %p6748_p6 = pnand %p5832_p4, %p8490_p7  ;;  %p6754_p3 = pnand %p5871_p0, %p6712_p5 }
  0x33   : > { %s516_s22 = sshll.u32 %s6558_s0, 4  ;;  %s6758_s22 = int_to_ptr.vmem [resolvable:$true] %s516_s22 }
  0x34   : > { %s8491_s29 = scalar_select %p6748_p6, 1, 0 }
  0x35   : > { %s8492_s19 = scalar_select %p6754_p3, 1, 0 }
  0x36   : > { %p6768_p7 = pneg %p6748_p6 }
  0x37   : > { %s6139_s16 = scalar_lea.hbm %s8493_s30, 128 }
  0x38   : > { %p6140_p4 = scmp.ne.s32.totalorder %s8493_s30, %s6139_s16  ;;  %p6146_p9 = scmp.lt.u32.totalorder %s6139_s16, %s8493_s30 }
  0x39   : > { %s8494_s1 = scalar_select %p6768_p7, 1, 0 }
  0x3a   : > { %p6142_p5 = pnand %p6768_p7, %p6140_p4 }
  0x3c   : > { %p6143_p8 = pneg %p6142_p5 }
  0x3e   : > { %p6148_p10 = pnand %p6146_p9, %p6143_p8 }
  0x40   : > { %6151 = shalt.err (!%p6148_p10)
}
  0x41   : > { %s6152_s17 = scalar_lea.vmem %s507_s18, 128  ;;  %p6160_p12 = scmp.lt.s32.totalorder %s507_s18, %s507_s18 }
  0x42   : > { %p6153_p0 = scmp.ne.s32.totalorder %s507_s18, %s6152_s17  ;;  %p6161_p11 = scmp.lt.s32.totalorder %s6152_s17, %s6152_s17 }
  0x44   : > { %p6155_p2 = pnand %p6153_p0, %p6768_p7  ;;  %p6162_p13 = por %p6161_p11, %p6160_p12 }
  0x46   : > { %p6156_p1 = pneg %p6155_p2 }
  0x48   : > { %p6163_p3 = pnand %p6162_p13, %p6156_p1 }
  0x4a   : > { %6166 = shalt.err (!%p6163_p3)
}
  0x4b   : > { %5835 = dma.hbm_to_vmem [thread:$0]  (!%p6748_p6), %s8493_s30, 128, %s507_s18, [#allocation5]  }
  0x4c   : > { %s6785_s4 = sand.u32 1, %s6555_s27   ;;  %s8495_s0 = sld [smem:[#allocation104_spill]] }
  0x52   : > { %s6167_s14 = scalar_lea.hbm %s8495_s0, 1024 }
  0x53   : > { %p6168_p11 = scmp.ne.s32.totalorder %s8495_s0, %s6167_s14  ;;  %p6174_p1 = scmp.lt.u32.totalorder %s6167_s14, %s8495_s0 }
  0x55   : > { %p6170_p12 = pnand %p6168_p11, %p6768_p7 }
  0x57   : > { %p6171_p13 = pneg %p6170_p12 }
  0x59   : > { %p6176_p2 = pnand %p6174_p1, %p6171_p13 }
  0x5b   : > { %6179 = shalt.err (!%p6176_p2)
}
  0x5c   : > { %s6180_s18 = scalar_lea.vmem %s6758_s22, 1024  ;;  %p6188_p8 = scmp.lt.s32.totalorder %s6758_s22, %s6758_s22 }
  0x5d   : > { %p6181_p3 = scmp.ne.s32.totalorder %s6758_s22, %s6180_s18  ;;  %p6189_p9 = scmp.lt.s32.totalorder %s6180_s18, %s6180_s18 }
  0x5f   : > { %p6183_p4 = pnand %p6181_p3, %p6768_p7  ;;  %p6190_p10 = por %p6189_p9, %p6188_p8 }
  0x61   : > { %p6184_p5 = pneg %p6183_p4 }
  0x63   : > { %p6191_p0 = pnand %p6190_p10, %p6184_p5 }
  0x65   : > { %6194 = shalt.err (!%p6191_p0)
}
  0x66   : > { %s8419_s9 = smov 128   ;;  %s8427_s8 = smov 8  }
  0x67   : > { %5838 = dma.hbm_to_vmem [thread:$0]  (!%p6748_p6), %s8495_s0, 1024, %s6758_s22, [#allocation8], %s8419_s9, %s8419_s9, %s8427_s8  }
  0x68   : > { %s6814_s15 = sand.u32 1, %s6551_s26   ;;  %s5691_s16 = sshll.u32 %s6555_s27, 11 }
  0x69   : > { %s5345_s24 = sshll.u32 %s6814_s15, 7  ;;  %s8496_s5 = sld [smem:[#allocation108_spill]] }
  0x6a   : > { %s571_s30 = scalar_lea.vmem [#allocation11], %s5345_s24  ;;  %s8426_s12 = scalar_lea.sflag [#allocation12], %s6785_s4 }
  0x6b   : > { %s578_s6 = sshll.u32 %s571_s30, 4  ;;  %p8497_p12 = scmp.ne.s32.totalorder %s8492_s19, 0  ;;  %s6823_s6 = int_to_ptr.vmem [resolvable:$true] %s578_s6 }
  0x6d   : > { %p6831_p13 = pneg %p8497_p12 }
  0x6f   : > { %s6821_s18 = scalar_lea.hbm %s8496_s5, %s5691_s16  ;;  %s6200_s24 = scalar_lea.hbm %s8496_s5, 4096 }
  0x70   : > { %s6195_s14 = scalar_lea.hbm %s6821_s18, 2048  ;;  %p6201_p3 = scmp.lt.u32.totalorder %s6821_s18, %s8496_s5 }
  0x71   : > { %p6196_p11 = scmp.ne.s32.totalorder %s6821_s18, %s6195_s14  ;;  %p6202_p4 = scmp.lt.u32.totalorder %s6200_s24, %s6195_s14 }
  0x72   : > { %p6204_p8 = scmp.lt.u32.totalorder %s6195_s14, %s6821_s18 }
  0x73   : > { %p6198_p1 = pnand %p6831_p13, %p6196_p11  ;;  %p6203_p5 = por %p6202_p4, %p6201_p3 }
  0x75   : > { %p6199_p2 = pneg %p6198_p1  ;;  %p6205_p9 = por %p6204_p8, %p6203_p5 }
  0x77   : > { %p6206_p10 = pnand %p6205_p9, %p6199_p2 }
  0x79   : > { %6209 = shalt.err (!%p6206_p10)
}
  0x7a   : > { %s6210_s22 = scalar_lea.vmem %s6823_s6, 2048  ;;  %s6561_s16 = smov [#allocation11]  }
  0x7b   : > { %p6211_p0 = scmp.ne.s32.totalorder %s6823_s6, %s6210_s22  ;;  %s6215_s21 = sshll.u32 %s6561_s16, 4  ;;  %s6216_s21 = int_to_ptr.vmem [resolvable:$false] %s6215_s21 }
  0x7c   : > { %s6217_s30 = scalar_lea.vmem %s6216_s21, 4096  ;;  %p6218_p6 = scmp.lt.s32.totalorder %s6823_s6, %s6216_s21 }
  0x7d   : > { %p6213_p11 = pnand %p6211_p0, %p6831_p13  ;;  %p6219_p7 = scmp.lt.s32.totalorder %s6217_s30, %s6210_s22 }
  0x7f   : > { %p6214_p1 = pneg %p6213_p11  ;;  %p6220_p3 = por %p6219_p7, %p6218_p6 }
  0x81   : > { %p6221_p4 = pnand %p6220_p3, %p6214_p1 }
  0x83   : > { %6224 = shalt.err (!%p6221_p4)
}
  0x84   : > { %s8499_s14 = smov 128   ;;  %s5694_s24 = sshll.u32 %s6555_s27, 13 }
  0x85   : > { %5848 = dma.hbm_to_vmem [thread:$0]  (!%p8497_p12), %s6821_s18, 2048, %s6823_s6, %s8426_s12, %s8499_s14, %s8499_s14, %s8427_s8  }
  0x86   : > { %s8500_s10 = sld [smem:[#allocation112_spill]]  ;;  %s8501_s21 = sshll.u32 %s6814_s15, 9 }
  0x87   : > { %s635_s30 = scalar_lea.vmem [#allocation14], %s8501_s21  ;;  %s8429_s5 = scalar_lea.sflag [#allocation15], %s6785_s4 }
  0x88   : > { %s642_s0 = sshll.u32 %s635_s30, 4  ;;  %s6867_s0 = int_to_ptr.vmem [resolvable:$true] %s642_s0 }
  0x8c   : > { %s6863_s16 = scalar_lea.hbm %s8500_s10, %s5694_s24  ;;  %s6230_s24 = scalar_lea.hbm %s8500_s10, 16384 }
  0x8d   : > { %s6225_s26 = scalar_lea.hbm %s6863_s16, 8192  ;;  %p6231_p5 = scmp.lt.u32.totalorder %s6863_s16, %s8500_s10 }
  0x8e   : > { %p6226_p6 = scmp.ne.s32.totalorder %s6863_s16, %s6225_s26  ;;  %p6232_p8 = scmp.lt.u32.totalorder %s6230_s24, %s6225_s26 }
  0x8f   : > { %p6234_p10 = scmp.lt.u32.totalorder %s6225_s26, %s6863_s16 }
  0x90   : > { %p6228_p7 = pnand %p6226_p6, %p6831_p13  ;;  %p6233_p9 = por %p6232_p8, %p6231_p5 }
  0x92   : > { %p6229_p2 = pneg %p6228_p7  ;;  %p6235_p0 = por %p6234_p10, %p6233_p9 }
  0x94   : > { %p6236_p11 = pnand %p6235_p0, %p6229_p2 }
  0x96   : > { %6239 = shalt.err (!%p6236_p11)
}
  0x97   : > { %s6240_s21 = scalar_lea.vmem %s6867_s0, 8192  ;;  %s6562_s30 = smov [#allocation14]  }
  0x98   : > { %p6241_p1 = scmp.ne.s32.totalorder %s6867_s0, %s6240_s21  ;;  %s6245_s6 = sshll.u32 %s6562_s30, 4  ;;  %s6246_s6 = int_to_ptr.vmem [resolvable:$false] %s6245_s6 }
  0x99   : > { %s6247_s18 = scalar_lea.vmem %s6246_s6, 16384  ;;  %p6248_p6 = scmp.lt.s32.totalorder %s6867_s0, %s6246_s6 }
  0x9a   : > { %p6243_p3 = pnand %p6241_p1, %p6831_p13  ;;  %p6249_p7 = scmp.lt.s32.totalorder %s6247_s18, %s6240_s21 }
  0x9c   : > { %p6244_p4 = pneg %p6243_p3  ;;  %p6250_p5 = por %p6249_p7, %p6248_p6 }
  0x9e   : > { %p6251_p8 = pnand %p6250_p5, %p6244_p4 }
  0xa0   : > { %6254 = shalt.err (!%p6251_p8)
}
  0xa1   : > { %s8430_s26 = smov 512   ;;  %s6564_s24 = smov 32  }
  0xa2   : > { %5854 = dma.hbm_to_vmem [thread:$0]  (!%p8497_p12), %s6863_s16, 8192, %s6867_s0, %s8429_s5, %s8430_s26, %s8430_s26, %s6564_s24  }
  0xa3   : > { %s6565_s17 = smov [#allocation10]   ;;  %s8502_s3 = sld [smem:[#allocation106_spill]] }
  0xa4   : > { %s529_s22 = sshll.u32 %s6565_s17, 4  ;;  %p8503_p9 = scmp.ne.s32.totalorder %s8494_s1, 0  ;;  %s530_s22 = int_to_ptr.vmem [resolvable:$true] %s529_s22 }
  0xa9   : > { %s6255_s6 = scalar_lea.hbm %s8502_s3, 1024 }
  0xaa   : > { %p6256_p2 = scmp.ne.s32.totalorder %s8502_s3, %s6255_s6  ;;  %p6262_p11 = scmp.lt.u32.totalorder %s6255_s6, %s8502_s3 }
  0xac   : > { %p6258_p10 = pnand %p6256_p2, %p8503_p9 }
  0xae   : > { %p6259_p0 = pneg %p6258_p10 }
  0xb0   : > { %p6264_p1 = pnand %p6262_p11, %p6259_p0 }
  0xb2   : > { %6267 = shalt.err (!%p6264_p1)
}
  0xb3   : > { %s6268_s0 = scalar_lea.vmem %s530_s22, 1024  ;;  %p6276_p7 = scmp.lt.s32.totalorder %s530_s22, %s530_s22 }
  0xb4   : > { %p6269_p3 = scmp.ne.s32.totalorder %s530_s22, %s6268_s0  ;;  %p6277_p5 = scmp.lt.s32.totalorder %s6268_s0, %s6268_s0 }
  0xb6   : > { %p6271_p4 = pnand %p6269_p3, %p8503_p9  ;;  %p6278_p8 = por %p6277_p5, %p6276_p7 }
  0xb8   : > { %p6272_p6 = pneg %p6271_p4 }
  0xba   : > { %p6279_p12 = pnand %p6278_p8, %p6272_p6 }
  0xbc   : > { %6282 = shalt.err (!%p6279_p12)
}
  0xbd   : > { %s6566_s12 = smov 64   ;;  %s6567_s10 = smov 4  }
  0xbe   : > { %p8504_p2 = scmp.ne.s32.totalorder %s8491_s29, 0  ;;  %s5342_s16 = sshll.u32 %s6814_s15, 4 }
  0xbf   : > { %s5690_s17 = sshll.u32 %s6555_s27, 8  ;;  %s8505_s2 = sld [smem:[#allocation105_spill]] }
  0xc0   : > { %5841 = dma.hbm_to_vmem [thread:$0]  (!%p8504_p2), %s8502_s3, 1024, %s530_s22, [#allocation8], %s6566_s12, %s6566_s12, %s6567_s10  }
  0xc1   : > { %s550_s18 = scalar_lea.vmem [#allocation9], %s5342_s16  ;;  %s5348_s0 = sshll.u32 %s6814_s15, 8 }
  0xc2   : > { %s557_s29 = sshll.u32 %s550_s18, 4  ;;  %s547_s5 = scalar_lea.sflag [#allocation5], %s6785_s4  ;;  %s6924_s29 = int_to_ptr.vmem [resolvable:$true] %s557_s29 }
  0xc5   : > { %s6922_s6 = scalar_lea.hbm %s8505_s2, %s5690_s17  ;;  %s6288_s8 = scalar_lea.hbm %s8505_s2, 512 }
  0xc6   : > { %s6283_s26 = scalar_lea.hbm %s6922_s6, 256  ;;  %p6289_p0 = scmp.lt.u32.totalorder %s6922_s6, %s8505_s2 }
  0xc7   : > { %p6284_p12 = scmp.ne.s32.totalorder %s6922_s6, %s6283_s26  ;;  %p6290_p11 = scmp.lt.u32.totalorder %s6288_s8, %s6283_s26 }
  0xc8   : > { %p6292_p3 = scmp.lt.u32.totalorder %s6283_s26, %s6922_s6 }
  0xc9   : > { %p6286_p9 = pnand %p6284_p12, %p6831_p13  ;;  %p6291_p1 = por %p6290_p11, %p6289_p0 }
  0xcb   : > { %p6287_p10 = pneg %p6286_p9  ;;  %p6293_p4 = por %p6292_p3, %p6291_p1 }
  0xcd   : > { %p6294_p6 = pnand %p6293_p4, %p6287_p10 }
  0xcf   : > { %6297 = shalt.err (!%p6294_p6)
}
  0xd0   : > { %s6298_s16 = scalar_lea.vmem %s6924_s29, 256  ;;  %s6568_s30 = smov [#allocation9]  }
  0xd1   : > { %p6299_p7 = scmp.ne.s32.totalorder %s6924_s29, %s6298_s16  ;;  %s6303_s18 = sshll.u32 %s6568_s30, 4  ;;  %s6304_s18 = int_to_ptr.vmem [resolvable:$false] %s6303_s18 }
  0xd2   : > { %s6305_s22 = scalar_lea.vmem %s6304_s18, 512  ;;  %p6306_p2 = scmp.lt.s32.totalorder %s6924_s29, %s6304_s18 }
  0xd3   : > { %p6301_p5 = pnand %p6299_p7, %p6831_p13  ;;  %p6307_p12 = scmp.lt.s32.totalorder %s6305_s22, %s6298_s16 }
  0xd5   : > { %p6302_p8 = pneg %p6301_p5  ;;  %p6308_p9 = por %p6307_p12, %p6306_p2 }
  0xd7   : > { %p6309_p0 = pnand %p6308_p9, %p6302_p8 }
  0xd9   : > { %6312 = shalt.err (!%p6309_p0)
}
  0xda   : > { %p8506_p10 = scmp.ne.s32.totalorder %s8492_s19, 0  ;;  %s8507_s26 = smov 8  }
  0xdb   : > { %s5693_s1 = sshll.u32 %s6555_s27, 12  ;;  %s599_s16 = scalar_lea.vmem [#allocation13], %s5348_s0 }
  0xdc   : > { %5845 = dma.hbm_to_vmem [thread:$0]  (!%p8506_p10), %s6922_s6, 256, %s6924_s29, %s547_s5, %s8499_s14, %s8499_s14, %s8507_s26  }
  0xdd   : > { %s6958_s21 = scalar_lea.hbm %s8389_s7, %s5693_s1  ;;  %s607_s30 = sshll.u32 %s599_s16, 4  ;;  %s6962_s30 = int_to_ptr.vmem [resolvable:$true] %s607_s30 }
  0xde   : > { %s5355_s18 = sshll.u32 %s6814_s15, 10  ;;  %s6313_s22 = scalar_lea.hbm %s6958_s21, 4096 }
  0xdf   : > { %p6314_p11 = scmp.ne.s32.totalorder %s6958_s21, %s6313_s22  ;;  %s6318_s6 = scalar_lea.hbm %s8389_s7, 8192 }
  0xe0   : > { %p6319_p4 = scmp.lt.u32.totalorder %s6958_s21, %s8389_s7  ;;  %p6320_p6 = scmp.lt.u32.totalorder %s6318_s6, %s6313_s22 }
  0xe1   : > { %p6316_p1 = pnand %p6314_p11, %p6831_p13  ;;  %p6322_p5 = scmp.lt.u32.totalorder %s6313_s22, %s6958_s21 }
  0xe2   : > { %p6321_p7 = por %p6320_p6, %p6319_p4 }
  0xe3   : > { %p6317_p3 = pneg %p6316_p1 }
  0xe4   : > { %p6323_p8 = por %p6322_p5, %p6321_p7 }
  0xe6   : > { %p6324_p2 = pnand %p6323_p8, %p6317_p3 }
  0xe8   : > { %6327 = shalt.err (!%p6324_p2)
}
  0xe9   : > { %s6328_s0 = scalar_lea.vmem %s6962_s30, 4096  ;;  %s6569_s1 = smov [#allocation13]  }
  0xea   : > { %p6329_p12 = scmp.ne.s32.totalorder %s6962_s30, %s6328_s0  ;;  %s6333_s8 = sshll.u32 %s6569_s1, 4  ;;  %s6334_s8 = int_to_ptr.vmem [resolvable:$false] %s6333_s8 }
  0xeb   : > { %s6335_s17 = scalar_lea.vmem %s6334_s8, 8192  ;;  %p6336_p11 = scmp.lt.s32.totalorder %s6962_s30, %s6334_s8 }
  0xec   : > { %p6331_p9 = pnand %p6329_p12, %p6831_p13  ;;  %p6337_p1 = scmp.lt.s32.totalorder %s6335_s17, %s6328_s0 }
  0xee   : > { %p6332_p0 = pneg %p6331_p9  ;;  %p6338_p4 = por %p6337_p1, %p6336_p11 }
  0xf0   : > { %p6339_p6 = pnand %p6338_p4, %p6332_p0 }
  0xf2   : > { %6342 = shalt.err (!%p6339_p6)
}
  0xf3   : > { %s8508_s16 = scalar_lea.sflag [#allocation12], %s6785_s4  ;;  %s5695_s22 = sshll.u32 %s6555_s27, 14 }
  0xf4   : > { %5851 = dma.hbm_to_vmem [thread:$0]  (!%p8506_p10), %s6958_s21, 4096, %s6962_s30, %s8508_s16, %s6566_s12, %s6566_s12, %s6567_s10  }
  0xf5   : > { %s6995_s6 = scalar_lea.hbm %s8393_s11, %s5695_s22  ;;  %s656_s29 = scalar_lea.vmem [#allocation16], %s5355_s18 }
  0xf6   : > { %s663_s26 = sshll.u32 %s656_s29, 4  ;;  %s6343_s0 = scalar_lea.hbm %s6995_s6, 16384  ;;  %s6999_s26 = int_to_ptr.vmem [resolvable:$true] %s663_s26 }
  0xf7   : > { %p6344_p3 = scmp.ne.s32.totalorder %s6995_s6, %s6343_s0  ;;  %s6348_s1 = scalar_lea.hbm %s8393_s11, 32768 }
  0xf8   : > { %p6349_p8 = scmp.lt.u32.totalorder %s6995_s6, %s8393_s11  ;;  %p6350_p2 = scmp.lt.u32.totalorder %s6348_s1, %s6343_s0 }
  0xf9   : > { %p6346_p7 = pnand %p6344_p3, %p6831_p13  ;;  %p6352_p9 = scmp.lt.u32.totalorder %s6343_s0, %s6995_s6 }
  0xfa   : > { %p6351_p12 = por %p6350_p2, %p6349_p8 }
  0xfb   : > { %p6347_p5 = pneg %p6346_p7 }
  0xfc   : > { %p6353_p0 = por %p6352_p9, %p6351_p12 }
  0xfe   : > { %p6354_p11 = pnand %p6353_p0, %p6347_p5 }
 0x100   : > { %6357 = shalt.err (!%p6354_p11)
}
 0x101   : > { %s6358_s18 = scalar_lea.vmem %s6999_s26, 16384  ;;  %s6570_s16 = smov [#allocation16]  }
 0x102   : > { %p6359_p1 = scmp.ne.s32.totalorder %s6999_s26, %s6358_s18  ;;  %s6363_s22 = sshll.u32 %s6570_s16, 4  ;;  %s6364_s22 = int_to_ptr.vmem [resolvable:$false] %s6363_s22 }
 0x103   : > { %s6365_s5 = scalar_lea.vmem %s6364_s22, 32768  ;;  %p6366_p3 = scmp.lt.s32.totalorder %s6999_s26, %s6364_s22 }
 0x104   : > { %p6361_p4 = pnand %p6359_p1, %p6831_p13  ;;  %p6367_p7 = scmp.lt.s32.totalorder %s6365_s5, %s6358_s18 }
 0x106   : > { %p6362_p6 = pneg %p6361_p4  ;;  %p6368_p8 = por %p6367_p7, %p6366_p3 }
 0x108   : > { %p6369_p2 = pnand %p6368_p8, %p6362_p6 }
 0x10a   : > { %6372 = shalt.err (!%p6369_p2)
}
 0x10b   : > { %s8509_s14 = smov 512   ;;  %s8510_s29 = scalar_lea.sflag [#allocation15], %s6785_s4 }
 0x10c   : > { %5857 = dma.hbm_to_vmem [thread:$0]  (!%p8506_p10), %s6995_s6, 16384, %s6999_s26, %s8510_s29, %s8509_s14, %s8509_s14, %s6564_s24  }
 0x10d   : > { %s5358_s0 = sshll.u32 %s6814_s15, 6  ;;  %s5696_s21 = sshll.u32 %s6555_s27, 10 }
 0x10e   : > { %s7032_s8 = scalar_lea.hbm %s8395_s13, %s5696_s21  ;;  %s684_s17 = scalar_lea.vmem [#allocation17], %s5358_s0 }
 0x10f   : > { %s691_s4 = sshll.u32 %s684_s17, 4  ;;  %s681_s18 = scalar_lea.sflag [#allocation18], %s6814_s15  ;;  %s7034_s4 = int_to_ptr.vmem [resolvable:$true] %s691_s4 }
 0x110   : > { %s6373_s16 = scalar_lea.hbm %s7032_s8, 1024  ;;  %s6378_s26 = scalar_lea.hbm %s8395_s13, 2048 }
 0x111   : > { %p6374_p5 = scmp.ne.s32.totalorder %s7032_s8, %s6373_s16  ;;  %p6379_p0 = scmp.lt.u32.totalorder %s7032_s8, %s8395_s13 }
 0x112   : > { %p6380_p11 = scmp.lt.u32.totalorder %s6378_s26, %s6373_s16  ;;  %p6382_p4 = scmp.lt.u32.totalorder %s6373_s16, %s7032_s8 }
 0x113   : > { %p6376_p12 = pnand %p6374_p5, %p6831_p13 }
 0x114   : > { %p6381_p1 = por %p6380_p11, %p6379_p0 }
 0x115   : > { %p6377_p9 = pneg %p6376_p12 }
 0x116   : > { %p6383_p6 = por %p6382_p4, %p6381_p1 }
 0x118   : > { %p6384_p3 = pnand %p6383_p6, %p6377_p9 }
 0x11a   : > { %6387 = shalt.err (!%p6384_p3)
}
 0x11b   : > { %s6388_s14 = scalar_lea.vmem %s7034_s4, 1024  ;;  %s6571_s29 = smov [#allocation17]  }
 0x11c   : > { %p6389_p7 = scmp.ne.s32.totalorder %s7034_s4, %s6388_s14  ;;  %s6393_s0 = sshll.u32 %s6571_s29, 4  ;;  %s6394_s0 = int_to_ptr.vmem [resolvable:$false] %s6393_s0 }
 0x11d   : > { %s6395_s21 = scalar_lea.vmem %s6394_s0, 2048  ;;  %p6396_p5 = scmp.lt.s32.totalorder %s7034_s4, %s6394_s0 }
 0x11e   : > { %p6391_p8 = pnand %p6389_p7, %p6831_p13  ;;  %p6397_p12 = scmp.lt.s32.totalorder %s6395_s21, %s6388_s14 }
 0x120   : > { %p6392_p2 = pneg %p6391_p8  ;;  %p6398_p0 = por %p6397_p12, %p6396_p5 }
 0x122   : > { %p6399_p11 = pnand %p6398_p0, %p6392_p2 }
 0x124   : > { %6402 = shalt.err (!%p6399_p11)
}
 0x125   : > { %5860 = dma.hbm_to_vmem [thread:$0]  (!%p8506_p10), %s7032_s8, 1024, %s7034_s4, %s681_s18, %s6566_s12, %s6566_s12, %s6567_s10  }
 0x126   : > { %p8511_p13 = scmp.ne.s32.totalorder %s8489_s23, 0 }
 0x128   : > { %709 = sbr.rel (%p8511_p13) target bundleno = 3646 (0xe3e), region = 80 }
 0x12f   : > { %p8512_p9 = scmp.eq.s32.totalorder %s6694_s28, 0 }
 0x131   : > { %6502 = dma.done.wait (%p8512_p9), [#allocation5], 128   ;;  %p8513_p1 = pmov %p8512_p9 }
 0x133   : > { %6504 = vsyncadd (%p8513_p1), [#allocation5], 4294967168  ;;  %p8514_p4 = pmov %p8513_p1 }
 0x134   : > { %p8515_p6 = pmov %p8513_p1 }
 0x135   : > { %6506 = dma.done.wait (%p8514_p4), [#allocation8], 1024  }
 0x136   : > { %6508 = vsyncadd (%p8515_p6), [#allocation8], 4294966272  ;;  %s7074_s19 = sand.u32 1, %s6694_s28   ;;  %s7077_s23 = sand.u32 1, %s6547_s25  }
 0x137   : > { %s8431_s9 = sshll.u32 %s7077_s23, 4  ;;  %s720_s15 = scalar_lea.sflag [#allocation5], %s7074_s19 }
 0x138   : > { %s7083_s12 = scalar_lea.vmem [#allocation9], %s8431_s9  ;;  %p8516_p10 = scmp.ne.s32.totalorder %s8484_s20, 0 }
 0x13a   : > { %6510 = dma.done.wait (%p8516_p10), %s720_s15, 256  }
 0x13b   : > { %6512 = vsyncadd (%p8516_p10), %s720_s15, 4294967040  ;;  %p8517_p3 = pmov %p8513_p1 }
 0x13c   : > { %p8518_p7 = pmov %p8513_p1 }
 0x13d   : > { %6514 = dma.done.wait (%p8517_p3), [#allocation8], 1024  }
 0x13e   : > { %6516 = vsyncadd (%p8518_p7), [#allocation8], 4294966272  ;;  %s5366_s10 = sshll.u32 %s7077_s23, 7  ;;  %s733_s30 = scalar_lea.sflag [#allocation12], %s7074_s19 }
 0x13f   : > { %s7095_s1 = scalar_lea.vmem [#allocation11], %s5366_s10 }
 0x140   : > { %6518 = dma.done.wait (%p8516_p10), %s733_s30, 6144  }
 0x141   : > { %6520 = vsyncadd (%p8516_p10), %s733_s30, 4294961152  ;;  %s5367_s8 = sshll.u32 %s7077_s23, 8  ;;  %s5368_s17 = sshll.u32 %s7077_s23, 9 }
 0x142   : > { %s7103_s4 = scalar_lea.vmem [#allocation13], %s5367_s8  ;;  %s751_s18 = scalar_lea.sflag [#allocation15], %s7074_s19 }
 0x143   : > { %s7106_s16 = scalar_lea.vmem [#allocation14], %s5368_s17 }
 0x144   : > { %6522 = dma.done.wait (%p8516_p10), %s751_s18, 24576  }
 0x145   : > { %6524 = vsyncadd (%p8516_p10), %s751_s18, 4294942720  ;;  %s5369_s24 = sshll.u32 %s7077_s23, 10  ;;  %s5370_s6 = sshll.u32 %s7077_s23, 6 }
 0x146   : > { %s7114_s26 = scalar_lea.vmem [#allocation16], %s5369_s24  ;;  %s769_s22 = scalar_lea.sflag [#allocation18], %s7077_s23 }
 0x147   : > { %s7117_s5 = scalar_lea.vmem [#allocation17], %s5370_s6 }
 0x148   : > { %6526 = dma.done.wait (%p8516_p10), %s769_s22, 1024  }
 0x149   : > { %6528 = vsyncadd (%p8516_p10), %s769_s22, 4294966272  ;;  %s5372_s14 = sshll.u32 %s7077_s23, 3  ;;  %p873_p8 = scmp.lt.s32.totalorder %s6694_s28, 1  ;;  %v7142_v0 = vld [vmem:[#allocation4] sm:$0xff]  ;;  %v7144_v1 = vld [vmem:[#allocation7] sm:$0xff] }
 0x14a   : > { %s8519_s20 = sld [smem:[#allocation109_spill]]  ;;  %s8520_s18 = sld [smem:[#allocation110_spill]]  ;;  %8521 = vst [vmem:[#allocation39_spill] sm:$0xff] %v7144_v1  ;;  %v7146_v2 = vld [vmem:[#allocation7 + $0x8] sm:$0xff]  ;;  %v7159_v3 = vld [vmem:[#allocation7 + $0x10] sm:$0xff]  ;;  %v7161_v4 = vld [vmem:[#allocation7 + $0x18] sm:$0xff] }
 0x14b   : > { %s7126_s29 = scalar_select %p873_p8, %s6694_s28, 1  ;;  %8522 = vst [vmem:[#allocation40_spill] sm:$0xff] %v7146_v2  ;;  %8525 = vst [vmem:[#allocation41_spill] sm:$0xff] %v7159_v3  ;;  %v7163_v5 = vld [vmem:[#allocation7 + $0x20] sm:$0xff]  ;;  %v7167_v6 = vpack.c.bf16 %v7146_v2, %v7144_v1  ;;  %v7173_v7 = vld [vmem:[#allocation7 + $0x28] sm:$0xff]  ;;  %v7181_v10 = vpack.c.bf16 %v7161_v4, %v7159_v3 }
 0x14c   : > { %s8523_s9 = sld [smem:[#allocation111_spill]]  ;;  %s8524_s10 = sld [smem:[#allocation113_spill]]  ;;  %8526 = vst [vmem:[#allocation42_spill] sm:$0xff] %v7161_v4  ;;  %8527 = vst [vmem:[#allocation43_spill] sm:$0xff] %v7163_v5  ;;  %v7175_v8 = vld [vmem:[#allocation7 + $0x30] sm:$0xff]  ;;  %v7177_v9 = vld [vmem:[#allocation7 + $0x38] sm:$0xff]  ;;  %v7185_v11 = vpack.c.bf16 %v7173_v7, %v7163_v5 }
 0x14d   : > { %s7129_s0 = sshll.u32 %s7126_s29, 1  ;;  %s5376_s21 = sshll.u32 %s7126_s29, 3  ;;  %8529 = vst [vmem:[#allocation44_spill] sm:$0xff] %v7173_v7  ;;  %8530 = vst [vmem:[#allocation45_spill] sm:$0xff] %v7175_v8  ;;  %v7189_v12 = vpack.c.bf16 %v7177_v9, %v7175_v8 }
 0x14e   : > { %8531 = vst [vmem:[#allocation46_spill] sm:$0xff] %v7177_v9  ;;  %s8532_s3 = sshll.u32 %s7077_s23, 4  ;;  %s7195_s6 = scalar_lea.vmem [#allocation20], %s5372_s14 }
 0x14f   : > { %p8533_p2 = scmp.ne.s32.totalorder %s6694_s28, 0 }
 0x150   : > { %s876_s30 = scalar_lea.vmem %s8519_s20, %s7129_s0  ;;  %s7140_s24 = scalar_lea.vmem %s8520_s18, %s7129_s0  ;;  %v5928_v13 = vld [vmem:[#allocation10] sm:$0xff] (!%p8533_p2)   ;;  %v6572_v14 = vmov (!%p8533_p2), 0.0   ;;  %v5929_v15 = vld [vmem:[#allocation10 + $0x8] sm:$0xff] (!%p8533_p2)   ;;  %vm6573_vm0 = vmmov (!%p8533_p2), 0   ;;  %v5930_v16 = vld [vmem:[#allocation10 + $0x10] sm:$0xff] (!%p8533_p2)   ;;  %v912_v22 = vpack.c.bf16 (!%p8533_p2), %v7142_v0, %v7142_v0 }
 0x151   : > { %s8528_s18 = sld [smem:[#allocation114_spill]]  ;;  %911 = sbr.rel (%p8533_p2) target bundleno = 610 (0x262), region = 120  ;;  %5760 = vmatprep.subr.bf16.mxu0 (!%p8533_p2), %v6572_v14  ;;  %1031 = vst [vmem:[#allocation2] sm:$0xff] (!%p8533_p2), %v6572_v14  ;;  %5776 = vmatprep.mubr.msk.bf16.mxu0 (!%p8533_p2), %vm6573_vm0, %v6572_v14  ;;  %v5931_v17 = vld [vmem:[#allocation10 + $0x18] sm:$0xff] (!%p8533_p2)   ;;  %v5932_v18 = vld [vmem:[#allocation10 + $0x20] sm:$0xff] (!%p8533_p2)   ;;  %v5933_v19 = vld [vmem:[#allocation10 + $0x28] sm:$0xff] (!%p8533_p2)  }
 0x152   : > { %s7152_s2 = scalar_lea.vmem %s8523_s9, %s7129_s0  ;;  %s7157_s20 = scalar_lea.vmem %s8524_s10, %s5376_s21  ;;  %5761 = vmatpush3.bf16.msra.mxu0 (!%p8533_p2), %v5928_v13  ;;  %v5934_v20 = vld [vmem:[#allocation10 + $0x30] sm:$0xff] (!%p8533_p2)   ;;  %v5935_v21 = vld [vmem:[#allocation10 + $0x38] sm:$0xff] (!%p8533_p2)  }
 0x153   : > { %s7193_s21 = scalar_lea.vmem [#allocation19], %s8532_s3  ;;  %5762 = vmatprep.subr.bf16.mxu0 (!%p8533_p2), %v6572_v14  ;;  %s8534_s15 = sld [smem:[#allocation107_spill]] (!%p8533_p2) }
 0x156   : > { %5763 = vmatpush3.bf16.msra.mxu0 (!%p8533_p2), %v5929_v15 }
 0x157   : > { %s892_s9 = scalar_lea.vmem %s8528_s18, %s7126_s29  ;;  %5764 = vmatprep.subr.bf16.mxu0 (!%p8533_p2), %v6572_v14 }
 0x159   : > { %v5378_v23 = vld [vmem:[%s8534_s15] ss:$0 sm:$0xff] }
 0x15a   : > { %5765 = vmatpush3.bf16.msra.mxu0 %v5930_v16 }
 0x15b   : > { %5766 = vmatprep.subr.bf16.mxu0 %v6572_v14 }
 0x15e   : > { %5767 = vmatpush3.bf16.msra.mxu0 %v5931_v17 }
 0x15f   : > { %5768 = vmatprep.subr.bf16.mxu0 %v6572_v14 }
 0x162   : > { %5769 = vmatpush3.bf16.msra.mxu0 %v5932_v18 }
 0x163   : > { %5770 = vmatprep.subr.bf16.mxu0 %v6572_v14 }
 0x166   : > { %5771 = vmatpush3.bf16.msra.mxu0 %v5933_v19 }
 0x167   : > { %5772 = vmatprep.subr.bf16.mxu0 %v6572_v14 }
 0x16a   : > { %5773 = vmatpush3.bf16.msra.mxu0 %v5934_v20 }
 0x16b   : > { %5774 = vmatprep.subr.bf16.mxu0 %v6572_v14 }
 0x16e   : > { %5775 = vmatpush3.bf16.msra.mxu0 %v5935_v21 }
 0x171   : > { %5777 = vmatmul.mubr.bf16.vlgmr.msra.gmra.mrb[0].mxu0 %v912_v22 }
 0x244   : > { %v1018_v24 = vpop.f32.mrb[0].mxu0 }
 0x245   : > { %v1019_v25 = vadd.f32 %v5378_v23, %v1018_v24  ;;  %v5778_v26 = vpop.f32.mrb[1].mxu0 }
 0x246   : > { %v1021_v27 = vpop.f32.mrb[2].mxu0 }
 0x247   : > { %v5387_v28 = vmul.f32 -1.442695, %v1019_v25  ;;  %v5779_v29 = vpop.f32.mrb[3].mxu0 }
 0x249   : > { %5936 = vpow2.f32 %v5387_v28 }
 0x253   : > { %v5937_v30 = vpop.eup %5936 }
 0x254   : > { %v1027_v31 = vadd.f32 1.0, %v5937_v30 }
 0x256   : > { %5938 = vrcp.f32 %v1027_v31 }
 0x260   : > { %v5939_v32 = vpop.eup %5938 }
 0x261   : > { %1030 = vst [vmem:[#allocation3] sm:$0xff] %v5939_v32 }
 0x262 PF: > { %v1221_v33 = vld [vmem:[%s7106_s16] sm:$0xff]  ;;  %v8432_v39 = vmov 0   ;;  %v1223_v14 = vld [vmem:[%s7106_s16 + $0x10] sm:$0xff]  ;;  %vm3221_vm1 = vcmask 1041409   ;;  %vm3223_vm2 = vcmask 1042434   ;;  %vm3225_vm3 = vcmask 1043459  }
 0x263   : > { %v1225_v34 = vld [vmem:[%s7106_s16 + $0x20] sm:$0xff]  ;;  %1637 = vmatprep.mubr.bf16.mxu1 %v8432_v39  ;;  %1180 = vmatprep.mubr.bf16.mxu0 %v8432_v39  ;;  %v1227_v15 = vld [vmem:[%s7106_s16 + $0x30] sm:$0xff]  ;;  %vm3227_vm4 = vcmask 1044484   ;;  %vm3229_vm5 = vcmask 1045509   ;;  %vm3231_vm6 = vcmask 1046534   ;;  %vm3233_vm7 = vcmask 1047559  }
 0x264   : > { %v1229_v35 = vld [vmem:[%s7106_s16 + $0x40] sm:$0xff]  ;;  %v5406_v36 = vcombine.high %v1221_v33, %v1225_v34  ;;  %v5405_v37 = vcombine.low %v1221_v33, %v1225_v34  ;;  %5941 = vset.pattern.permute.xlu0 %v8432_v39  ;;  %5940 = vset.pattern.permute.xlu1 %v8432_v39  ;;  %v1231_v17 = vld [vmem:[%s7106_s16 + $0x50] sm:$0xff]  ;;  %v5410_v19 = vcombine.high %v1223_v14, %v1227_v15  ;;  %vm3236_vm8 = vcmask 64512   ;;  %s6578_s18 = smov [#allocation19]  }
 0x265   : > { %v1233_v38 = vld [vmem:[%s7106_s16 + $0x60] sm:$0xff]  ;;  %v1235_v18 = vld [vmem:[%s7106_s16 + $0x70] sm:$0xff]  ;;  %v5409_v20 = vcombine.low %v1223_v14, %v1227_v15  ;;  %vm6577_vm9 = vmmov 0  }
 0x266   : > { %v5414_v40 = vcombine.high %v1229_v35, %v1233_v38  ;;  %v1237_v41 = vld [vmem:[%s7106_s16 + $0x80] sm:$0xff]  ;;  %1605 = vmatprep.subr.bf16.mxu1 %v5406_v36  ;;  %v5413_v43 = vcombine.low %v1229_v35, %v1233_v38  ;;  %v1239_v21 = vld [vmem:[%s7106_s16 + $0x90] sm:$0xff]  ;;  %v5418_v23 = vcombine.high %v1231_v17, %v1235_v18  ;;  %v5417_v24 = vcombine.low %v1231_v17, %v1235_v18 }
 0x267   : > { %v1241_v42 = vld [vmem:[%s7106_s16 + $0xa0] sm:$0xff]  ;;  %1606 = vmatpush1.bf16.msra.mxu1 %v5405_v37  ;;  %v1243_v22 = vld [vmem:[%s7106_s16 + $0xb0] sm:$0xff] }
 0x268   : > { %1607 = vmatprep.subr.bf16.mxu1 %v5414_v40  ;;  %v5422_v44 = vcombine.high %v1237_v41, %v1241_v42  ;;  %v1245_v45 = vld [vmem:[%s7106_s16 + $0xc0] sm:$0xff]  ;;  %v5421_v47 = vcombine.low %v1237_v41, %v1241_v42  ;;  %v1247_v25 = vld [vmem:[%s7106_s16 + $0xd0] sm:$0xff]  ;;  %v5426_v27 = vcombine.high %v1239_v21, %v1243_v22  ;;  %v5425_v28 = vcombine.low %v1239_v21, %v1243_v22 }
 0x269   : > { %v1249_v46 = vld [vmem:[%s7106_s16 + $0xe0] sm:$0xff]  ;;  %v1251_v26 = vld [vmem:[%s7106_s16 + $0xf0] sm:$0xff] }
 0x26a   : > { %v5430_v48 = vcombine.high %v1245_v45, %v1249_v46  ;;  %v1253_v49 = vld [vmem:[%s7106_s16 + $0x100] sm:$0xff]  ;;  %v5429_v51 = vcombine.low %v1245_v45, %v1249_v46  ;;  %v1255_v29 = vld [vmem:[%s7106_s16 + $0x110] sm:$0xff]  ;;  %v5434_v31 = vcombine.high %v1247_v25, %v1251_v26  ;;  %v5433_v32 = vcombine.low %v1247_v25, %v1251_v26 }
 0x26b   : > { %1608 = vmatpush1.bf16.msra.mxu1 %v5413_v43  ;;  %v1257_v50 = vld [vmem:[%s7106_s16 + $0x120] sm:$0xff]  ;;  %v1259_v30 = vld [vmem:[%s7106_s16 + $0x130] sm:$0xff] }
 0x26c   : > { %1609 = vmatprep.subr.bf16.mxu1 %v5422_v44  ;;  %v5438_v52 = vcombine.high %v1253_v49, %v1257_v50  ;;  %v1261_v53 = vld [vmem:[%s7106_s16 + $0x140] sm:$0xff]  ;;  %v5437_v55 = vcombine.low %v1253_v49, %v1257_v50  ;;  %v1263_v33 = vld [vmem:[%s7106_s16 + $0x150] sm:$0xff]  ;;  %v5442_v35 = vcombine.high %v1255_v29, %v1259_v30  ;;  %v5441_v36 = vcombine.low %v1255_v29, %v1259_v30 }
 0x26d   : > { %v1265_v54 = vld [vmem:[%s7106_s16 + $0x160] sm:$0xff]  ;;  %v1267_v34 = vld [vmem:[%s7106_s16 + $0x170] sm:$0xff] }
 0x26e   : > { %v5446_v56 = vcombine.high %v1261_v53, %v1265_v54  ;;  %v1269_v57 = vld [vmem:[%s7106_s16 + $0x180] sm:$0xff]  ;;  %v5445_v59 = vcombine.low %v1261_v53, %v1265_v54  ;;  %v1271_v37 = vld [vmem:[%s7106_s16 + $0x190] sm:$0xff]  ;;  %v5450_v40 = vcombine.high %v1263_v33, %v1267_v34  ;;  %v5449_v41 = vcombine.low %v1263_v33, %v1267_v34 }
 0x26f   : > { %1610 = vmatpush1.bf16.msra.mxu1 %v5421_v47  ;;  %v1273_v58 = vld [vmem:[%s7106_s16 + $0x1a0] sm:$0xff]  ;;  %v1275_v38 = vld [vmem:[%s7106_s16 + $0x1b0] sm:$0xff] }
 0x270   : > { %1611 = vmatprep.subr.bf16.mxu1 %v5430_v48  ;;  %v5454_v60 = vcombine.high %v1269_v57, %v1273_v58  ;;  %v1277_v61 = vld [vmem:[%s7106_s16 + $0x1c0] sm:$0xff]  ;;  %v5453_v63 = vcombine.low %v1269_v57, %v1273_v58  ;;  %v1279_v42 = vld [vmem:[%s7106_s16 + $0x1d0] sm:$0xff]  ;;  %v5458_v44 = vcombine.high %v1271_v37, %v1275_v38  ;;  %v5457_v47 = vcombine.low %v1271_v37, %v1275_v38 }
 0x271   : > { %v1281_v62 = vld [vmem:[%s7106_s16 + $0x1e0] sm:$0xff]  ;;  %v1283_v43 = vld [vmem:[%s7106_s16 + $0x1f0] sm:$0xff] }
 0x272   : > { %v5462_v13 = vcombine.high %v1277_v61, %v1281_v62  ;;  %v5461_v16 = vcombine.low %v1277_v61, %v1281_v62  ;;  %v5942_v45 = vld [vmem:[%s7095_s1 + $0x4] ss:$8 sps:$4 sm:$0xff]   ;;  %v5944_v46 = vld [vmem:[%s7095_s1] ss:$8 sps:$4 sm:$0xff]   ;;  %v5466_v50 = vcombine.high %v1279_v42, %v1283_v43  ;;  %v5465_v53 = vcombine.low %v1279_v42, %v1283_v43  ;;  %v5962_v22 = vld [vmem:[%s7095_s1 + $0x54] ss:$8 sps:$4 sm:$0xff]  }
 0x273   : > { %1612 = vmatpush1.bf16.msra.mxu1 %v5429_v51  ;;  %1148 = vmatprep.subr.bf16.mxu0 %v5942_v45  ;;  %v1897_v48 = vld [vmem:[%s7114_s26] sm:$0xff]  ;;  %v5945_v51 = vld [vmem:[%s7095_s1 + $0x14] ss:$8 sps:$4 sm:$0xff]   ;;  %v5965_v25 = vld [vmem:[%s7095_s1 + $0x50] ss:$8 sps:$4 sm:$0xff]  }
 0x274   : > { %1613 = vmatprep.subr.bf16.mxu1 %v5438_v52  ;;  %v1901_v49 = vld [vmem:[%s7114_s26 + $0x20] sm:$0xff]  ;;  %1149 = vmatpush1.bf16.msra.mxu0 %v5944_v46  ;;  %v5947_v52 = vld [vmem:[%s7095_s1 + $0x10] ss:$8 sps:$4 sm:$0xff]   ;;  %v5972_v34 = vld [vmem:[%s7095_s1 + $0x74] ss:$8 sps:$4 sm:$0xff]  }
 0x275   : > { %1150 = vmatprep.subr.bf16.mxu0 %v5945_v51  ;;  %v1905_v54 = vld [vmem:[%s7114_s26 + $0x40] sm:$0xff]  ;;  %v5975_v37 = vld [vmem:[%s7095_s1 + $0x70] ss:$8 sps:$4 sm:$0xff]  }
 0x276   : > { %v5948_v57 = vld [vmem:[%s7095_s1 + $0x24] ss:$8 sps:$4 sm:$0xff]   ;;  %v5950_v58 = vld [vmem:[%s7095_s1 + $0x20] ss:$8 sps:$4 sm:$0xff]  }
 0x277   : > { %1614 = vmatpush1.bf16.msra.mxu1 %v5437_v55  ;;  %v1909_v55 = vld [vmem:[%s7114_s26 + $0x60] sm:$0xff] }
 0x278   : > { %1615 = vmatprep.subr.bf16.mxu1 %v5446_v56  ;;  %v5470_v56 = vcombine.high %v1897_v48, %v1901_v49  ;;  %1151 = vmatpush1.bf16.msra.mxu0 %v5947_v52  ;;  %v1913_v61 = vld [vmem:[%s7114_s26 + $0x80] sm:$0xff]  ;;  %v5477_v14 = vcombine.low %v1905_v54, %v1909_v55 }
 0x279   : > { %1152 = vmatprep.subr.bf16.mxu0 %v5948_v57  ;;  %v1917_v62 = vld [vmem:[%s7114_s26 + $0xa0] sm:$0xff] }
 0x27a   : > { %v5486_v15 = vcombine.high %v1913_v61, %v1917_v62  ;;  %v1921_v17 = vld [vmem:[%s7114_s26 + $0xc0] sm:$0xff] }
 0x27b   : > { %1616 = vmatpush1.bf16.msra.mxu1 %v5445_v59  ;;  %v5469_v59 = vcombine.low %v1897_v48, %v1901_v49  ;;  %v1925_v18 = vld [vmem:[%s7114_s26 + $0xe0] sm:$0xff] }
 0x27c   : > { %1617 = vmatprep.subr.bf16.mxu1 %v5454_v60  ;;  %v5478_v60 = vcombine.high %v1905_v54, %v1909_v55  ;;  %1153 = vmatpush1.bf16.msra.mxu0 %v5950_v58  ;;  %v5494_v21 = vcombine.high %v1921_v17, %v1925_v18  ;;  %v5493_v26 = vcombine.low %v1921_v17, %v1925_v18  ;;  %v1937_v29 = vld [vmem:[%s7114_s26 + $0x140] sm:$0xff] }
 0x27d   : > { %v1941_v30 = vld [vmem:[%s7114_s26 + $0x160] sm:$0xff] }
 0x27e   : > { %v5510_v33 = vcombine.high %v1937_v29, %v1941_v30  ;;  %v5509_v38 = vcombine.low %v1937_v29, %v1941_v30  ;;  %v1953_v42 = vld [vmem:[%s7114_s26 + $0x1c0] sm:$0xff]  ;;  %v1899_v29 = vld [vmem:[%s7114_s26 + $0x10] sm:$0xff] }
 0x27f   : > { %1618 = vmatpush1.bf16.msra.mxu1 %v5453_v63  ;;  %v5952_v63 = vld [vmem:[%s7095_s1 + $0x34] ss:$8 sps:$4 sm:$0xff]   ;;  %v1957_v43 = vld [vmem:[%s7114_s26 + $0x1e0] sm:$0xff] }
 0x280   : > { %1619 = vmatprep.subr.bf16.mxu1 %v5462_v13  ;;  %v5955_v13 = vld [vmem:[%s7095_s1 + $0x30] ss:$8 sps:$4 sm:$0xff]   ;;  %1154 = vmatprep.subr.bf16.mxu0 %v5952_v63  ;;  %v5526_v46 = vcombine.high %v1953_v42, %v1957_v43  ;;  %v1965_v48 = vld [vmem:[%s7114_s26 + $0x220] sm:$0xff]  ;;  %v5525_v49 = vcombine.low %v1953_v42, %v1957_v43 }
 0x281   : > { %1155 = vmatpush1.bf16.msra.mxu0 %v5955_v13  ;;  %v1969_v51 = vld [vmem:[%s7114_s26 + $0x240] sm:$0xff]  ;;  %v1903_v30 = vld [vmem:[%s7114_s26 + $0x30] sm:$0xff] }
 0x282   : > { %v1973_v52 = vld [vmem:[%s7114_s26 + $0x260] sm:$0xff]  ;;  %v1923_v43 = vld [vmem:[%s7114_s26 + $0xd0] sm:$0xff] }
 0x283   : > { %1620 = vmatpush1.bf16.msra.mxu1 %v5461_v16  ;;  %v5957_v16 = vld [vmem:[%s7095_s1 + $0x44] ss:$8 sps:$4 sm:$0xff]   ;;  %v5542_v54 = vcombine.high %v1969_v51, %v1973_v52  ;;  %v5541_v57 = vcombine.low %v1969_v51, %v1973_v52  ;;  %v1939_v52 = vld [vmem:[%s7114_s26 + $0x150] sm:$0xff] }
 0x284   : > { %1751 = vmatprep.subr.bf16.mxu1 %v5410_v19  ;;  %1156 = vmatprep.subr.bf16.mxu0 %v5957_v16  ;;  %v5960_v19 = vld [vmem:[%s7095_s1 + $0x40] ss:$8 sps:$4 sm:$0xff]  }
 0x285   : > { %1157 = vmatpush1.bf16.msra.mxu0 %v5960_v19  ;;  %v1977_v55 = vld [vmem:[%s7114_s26 + $0x280] sm:$0xff] }
 0x286   : > { %1638 = vmatmul.mubr.bf16.vlgmr.msra.gmra.mrb[0].mxu1 %v7167_v6  ;;  %1158 = vmatprep.subr.bf16.mxu0 %v5962_v22  ;;  %v1993_v63 = vld [vmem:[%s7114_s26 + $0x300] sm:$0xff] }
 0x287   : > { %1752 = vmatpush1.bf16.msra.mxu1 %v5409_v20  ;;  %1647 = vmatprep.mubr.bf16.mxu1 %v8432_v39  ;;  %v5485_v20 = vcombine.low %v1913_v61, %v1917_v62  ;;  %v1997_v13 = vld [vmem:[%s7114_s26 + $0x320] sm:$0xff] }
 0x288   : > { %1753 = vmatprep.subr.bf16.mxu1 %v5418_v23  ;;  %v1929_v23 = vld [vmem:[%s7114_s26 + $0x100] sm:$0xff]  ;;  %v5565_v18 = vcombine.low %v1993_v63, %v1997_v13 }
 0x289   : > { %1159 = vmatpush1.bf16.msra.mxu0 %v5965_v25  ;;  %v2001_v16 = vld [vmem:[%s7114_s26 + $0x340] sm:$0xff] }
 0x28a   : > { %v2005_v17 = vld [vmem:[%s7114_s26 + $0x360] sm:$0xff] }
 0x28b   : > { %1754 = vmatpush1.bf16.msra.mxu1 %v5417_v24  ;;  %v1933_v24 = vld [vmem:[%s7114_s26 + $0x120] sm:$0xff]  ;;  %v5574_v19 = vcombine.high %v2001_v16, %v2005_v17  ;;  %v5573_v22 = vcombine.low %v2001_v16, %v2005_v17  ;;  %v1971_v17 = vld [vmem:[%s7114_s26 + $0x250] sm:$0xff] }
 0x28c   : > { %1755 = vmatprep.subr.bf16.mxu1 %v5426_v27  ;;  %v5502_v27 = vcombine.high %v1929_v23, %v1933_v24  ;;  %v2021_v25 = vld [vmem:[%s7114_s26 + $0x3e0] sm:$0xff] }
 0x28e   : > { %1648 = vmatmul.mubr.bf16.gmra.mrb[4].mxu1 %v7181_v10 }
 0x28f   : > { %1756 = vmatpush1.bf16.msra.mxu1 %v5425_v28  ;;  %1657 = vmatprep.mubr.bf16.mxu1 %v8432_v39  ;;  %v5967_v28 = vld [vmem:[%s7095_s1 + $0x64] ss:$8 sps:$4 sm:$0xff]  }
 0x290   : > { %1757 = vmatprep.subr.bf16.mxu1 %v5434_v31  ;;  %1160 = vmatprep.subr.bf16.mxu0 %v5967_v28  ;;  %v5970_v31 = vld [vmem:[%s7095_s1 + $0x60] ss:$8 sps:$4 sm:$0xff]  }
 0x291   : > { %1161 = vmatpush1.bf16.msra.mxu0 %v5970_v31 }
 0x292   : > { %1162 = vmatprep.subr.bf16.mxu0 %v5972_v34  ;;  %v1907_v34 = vld [vmem:[%s7114_s26 + $0x50] sm:$0xff] }
 0x293   : > { %1758 = vmatpush1.bf16.msra.mxu1 %v5433_v32  ;;  %v5501_v32 = vcombine.low %v1929_v23, %v1933_v24  ;;  %v2017_v24 = vld [vmem:[%s7114_s26 + $0x3c0] sm:$0xff] }
 0x294   : > { %1759 = vmatprep.subr.bf16.mxu1 %v5442_v35  ;;  %v1945_v35 = vld [vmem:[%s7114_s26 + $0x180] sm:$0xff]  ;;  %v5590_v28 = vcombine.high %v2017_v24, %v2021_v25 }
 0x295   : > { %1163 = vmatpush1.bf16.msra.mxu0 %v5975_v37  ;;  %v5473_v37 = vcombine.low %v1899_v29, %v1903_v30 }
 0x296   : > { %1658 = vmatmul.mubr.bf16.gmra.mrb[8].mxu1 %v7185_v11 }
 0x297   : > { %1760 = vmatpush1.bf16.msra.mxu1 %v5441_v36  ;;  %1667 = vmatprep.mubr.bf16.mxu1 %v8432_v39  ;;  %v1949_v36 = vld [vmem:[%s7114_s26 + $0x1a0] sm:$0xff] }
 0x298   : > { %1761 = vmatprep.subr.bf16.mxu1 %v5450_v40  ;;  %v5518_v40 = vcombine.high %v1945_v35, %v1949_v36  ;;  %1181 = vmatmul.mubr.bf16.vlgmr.msra.gmra.mrb[0].mxu0 %v7167_v6 }
 0x299   : > { %1190 = vmatprep.mubr.bf16.mxu0 %v8432_v39 }
 0x29b   : > { %1762 = vmatpush1.bf16.msra.mxu1 %v5449_v41  ;;  %v5388_v41 = vld [vmem:[%s7083_s12 + $0x8] sm:$0xff] }
 0x29c   : > { %1763 = vmatprep.subr.bf16.mxu1 %v5458_v44  ;;  %v5517_v44 = vcombine.low %v1945_v35, %v1949_v36  ;;  %v7287_v45 = vpack.c.bf16 %v5388_v41, %v5388_v41  ;;  %v1911_v35 = vld [vmem:[%s7114_s26 + $0x70] sm:$0xff] }
 0x29d   : > { %v1919_v41 = vld [vmem:[%s7114_s26 + $0xb0] sm:$0xff] }
 0x29e   : > { %1668 = vmatmul.mubr.bf16.gmra.mrb[12].mxu1 %v7189_v12 }
 0x29f   : > { %1764 = vmatpush1.bf16.msra.mxu1 %v5457_v47  ;;  %1783 = vmatprep.mubr.bf16.mxu1 %v8432_v39  ;;  %v1961_v47 = vld [vmem:[%s7114_s26 + $0x200] sm:$0xff] }
 0x2a0   : > { %1765 = vmatprep.subr.bf16.mxu1 %v5466_v50  ;;  %v5534_v50 = vcombine.high %v1961_v47, %v1965_v48  ;;  %1191 = vmatmul.mubr.bf16.gmra.mrb[4].mxu0 %v7181_v10 }
 0x2a1   : > { %1200 = vmatprep.mubr.bf16.mxu0 %v8432_v39 }
 0x2a3   : > { %1766 = vmatpush1.bf16.msra.mxu1 %v5465_v53  ;;  %v5533_v53 = vcombine.low %v1961_v47, %v1965_v48  ;;  %v1931_v48 = vld [vmem:[%s7114_s26 + $0x110] sm:$0xff] }
 0x2a4   : > { %2707 = vmatprep.subr.bf16.mxu1 %v5470_v56  ;;  %v1981_v56 = vld [vmem:[%s7114_s26 + $0x2a0] sm:$0xff] }
 0x2a5   : > { %v5550_v58 = vcombine.high %v1977_v55, %v1981_v56  ;;  %v5549_v61 = vcombine.low %v1977_v55, %v1981_v56  ;;  %v1947_v56 = vld [vmem:[%s7114_s26 + $0x190] sm:$0xff] }
 0x2a6   : > { %1784 = vmatmul.mubr.bf16.vlgmr.msra.gmra.mrb[16].mxu1 %v7167_v6 }
 0x2a7   : > { %2708 = vmatpush1.bf16.msra.mxu1 %v5469_v59  ;;  %1793 = vmatprep.mubr.bf16.mxu1 %v8432_v39  ;;  %v1985_v59 = vld [vmem:[%s7114_s26 + $0x2c0] sm:$0xff] }
 0x2a8   : > { %2709 = vmatprep.subr.bf16.mxu1 %v5478_v60  ;;  %v1989_v60 = vld [vmem:[%s7114_s26 + $0x2e0] sm:$0xff]  ;;  %1201 = vmatmul.mubr.bf16.gmra.mrb[8].mxu0 %v7185_v11 }
 0x2a9   : > { %v5558_v62 = vcombine.high %v1985_v59, %v1989_v60  ;;  %1210 = vmatprep.mubr.bf16.mxu0 %v8432_v39 }
 0x2ab   : > { %2710 = vmatpush1.bf16.msra.mxu1 %v5477_v14  ;;  %v5557_v14 = vcombine.low %v1985_v59, %v1989_v60  ;;  %v1955_v60 = vld [vmem:[%s7114_s26 + $0x1d0] sm:$0xff] }
 0x2ac   : > { %2711 = vmatprep.subr.bf16.mxu1 %v5486_v15  ;;  %v5566_v15 = vcombine.high %v1993_v63, %v1997_v13  ;;  %v1963_v13 = vld [vmem:[%s7114_s26 + $0x210] sm:$0xff] }
 0x2ae   : > { %1794 = vmatmul.mubr.bf16.gmra.mrb[20].mxu1 %v7181_v10 }
 0x2af   : > { %2712 = vmatpush1.bf16.msra.mxu1 %v5485_v20  ;;  %1803 = vmatprep.mubr.bf16.mxu1 %v8432_v39  ;;  %v2009_v20 = vld [vmem:[%s7114_s26 + $0x380] sm:$0xff] }
 0x2b0   : > { %2713 = vmatprep.subr.bf16.mxu1 %v5494_v21  ;;  %1211 = vmatmul.mubr.bf16.gmra.mrb[12].mxu0 %v7189_v12  ;;  %v2013_v21 = vld [vmem:[%s7114_s26 + $0x3a0] sm:$0xff] }
 0x2b1   : > { %1710 = vmatprep.mubr.bf16.mxu0 %v8432_v39  ;;  %v5582_v23 = vcombine.high %v2009_v20, %v2013_v21 }
 0x2b3   : > { %2714 = vmatpush1.bf16.msra.mxu1 %v5493_v26  ;;  %v5581_v26 = vcombine.low %v2009_v20, %v2013_v21  ;;  %v1979_v21 = vld [vmem:[%s7114_s26 + $0x290] sm:$0xff] }
 0x2b4   : > { %2715 = vmatprep.subr.bf16.mxu1 %v5502_v27  ;;  %v1036_v27 = vld [vmem:[#allocation2] sm:$0xff] }
 0x2b5   : > { %v1037_v31 = vadd.f32 %v1036_v27, %v7142_v0  ;;  %v5481_v0 = vcombine.low %v1907_v34, %v1911_v35 }
 0x2b6   : > { %1804 = vmatmul.mubr.bf16.gmra.mrb[24].mxu1 %v7185_v11 }
 0x2b7   : > { %2716 = vmatpush1.bf16.msra.mxu1 %v5501_v32  ;;  %1813 = vmatprep.mubr.bf16.mxu1 %v8432_v39  ;;  %v5589_v32 = vcombine.low %v2017_v24, %v2021_v25  ;;  %v7320_v36 = vpack.c.bf16 %v1037_v31, %v1037_v31  ;;  %v1987_v25 = vld [vmem:[%s7114_s26 + $0x2d0] sm:$0xff] }
 0x2b8   : > { %2717 = vmatprep.subr.bf16.mxu1 %v5510_v33  ;;  %v5474_v33 = vcombine.high %v1899_v29, %v1903_v30  ;;  %v1995_v29 = vld [vmem:[%s7114_s26 + $0x310] sm:$0xff] }
 0x2b9   : > { %8535 = vst [vmem:[#allocation47_spill] sm:$0xff] %v7320_v36  ;;  %v1999_v30 = vld [vmem:[%s7114_s26 + $0x330] sm:$0xff] }
 0x2bb   : > { %2718 = vmatpush1.bf16.msra.mxu1 %v5509_v38  ;;  %v5482_v38 = vcombine.high %v1907_v34, %v1911_v35  ;;  %v2007_v34 = vld [vmem:[%s7114_s26 + $0x370] sm:$0xff]  ;;  %v5569_v35 = vcombine.low %v1995_v29, %v1999_v30 }
 0x2bc   : > { %2719 = vmatprep.subr.bf16.mxu1 %v5518_v40  ;;  %v1915_v40 = vld [vmem:[%s7114_s26 + $0x90] sm:$0xff] }
 0x2bd   : > { %v5490_v42 = vcombine.high %v1915_v40, %v1919_v41 }
 0x2be   : > { %1814 = vmatmul.mubr.bf16.gmra.mrb[28].mxu1 %v7189_v12 }
 0x2bf   : > { %2720 = vmatpush1.bf16.msra.mxu1 %v5517_v44  ;;  %2739 = vmatprep.mubr.bf16.mxu1 %v7287_v45  ;;  %v1927_v44 = vld [vmem:[%s7114_s26 + $0xf0] sm:$0xff] }
 0x2c0   : > { %2721 = vmatprep.subr.bf16.mxu1 %v5526_v46  ;;  %v5489_v46 = vcombine.low %v1915_v40, %v1919_v41  ;;  %v5498_v47 = vcombine.high %v1923_v43, %v1927_v44  ;;  %v2015_v40 = vld [vmem:[%s7114_s26 + $0x3b0] sm:$0xff] }
 0x2c3   : > { %2722 = vmatpush1.bf16.msra.mxu1 %v5525_v49  ;;  %v1935_v49 = vld [vmem:[%s7114_s26 + $0x130] sm:$0xff] }
 0x2c4   : > { %2723 = vmatprep.subr.bf16.mxu1 %v5534_v50  ;;  %v5497_v50 = vcombine.low %v1923_v43, %v1927_v44  ;;  %v5506_v51 = vcombine.high %v1931_v48, %v1935_v49  ;;  %v2023_v43 = vld [vmem:[%s7114_s26 + $0x3f0] sm:$0xff] }
 0x2c7   : > { %2724 = vmatpush1.bf16.msra.mxu1 %v5533_v53  ;;  %v1943_v53 = vld [vmem:[%s7114_s26 + $0x170] sm:$0xff] }
 0x2c8   : > { %2725 = vmatprep.subr.bf16.mxu1 %v5542_v54  ;;  %v5505_v54 = vcombine.low %v1931_v48, %v1935_v49  ;;  %v5514_v55 = vcombine.high %v1939_v52, %v1943_v53  ;;  %v5951_v48 = vld [vmem:[%s7103_s4 + $0x40] sm:$0xff]  }
 0x2c9   : > { %v5954_v49 = vld [vmem:[%s7103_s4] sm:$0xff]  }
 0x2cb   : > { %2726 = vmatpush1.bf16.msra.mxu1 %v5541_v57  ;;  %v1951_v57 = vld [vmem:[%s7114_s26 + $0x1b0] sm:$0xff] }
 0x2cc   : > { %2727 = vmatprep.subr.bf16.mxu1 %v5550_v58  ;;  %v5513_v58 = vcombine.low %v1939_v52, %v1943_v53  ;;  %v5522_v59 = vcombine.high %v1947_v56, %v1951_v57  ;;  %v5961_v52 = vld [vmem:[%s7103_s4 + $0x50] sm:$0xff]  }
 0x2cd   : > { %v5964_v53 = vld [vmem:[%s7103_s4 + $0x10] sm:$0xff]  }
 0x2cf   : > { %2728 = vmatpush1.bf16.msra.mxu1 %v5549_v61  ;;  %v1959_v61 = vld [vmem:[%s7114_s26 + $0x1f0] sm:$0xff] }
 0x2d0   : > { %2729 = vmatprep.subr.bf16.mxu1 %v5558_v62  ;;  %v5521_v62 = vcombine.low %v1947_v56, %v1951_v57  ;;  %v5530_v63 = vcombine.high %v1955_v60, %v1959_v61  ;;  %v5971_v56 = vld [vmem:[%s7103_s4 + $0x60] sm:$0xff]  }
 0x2d1   : > { %v5974_v57 = vld [vmem:[%s7103_s4 + $0x20] sm:$0xff]  }
 0x2d3   : > { %2730 = vmatpush1.bf16.msra.mxu1 %v5557_v14  ;;  %v1967_v14 = vld [vmem:[%s7114_s26 + $0x230] sm:$0xff] }
 0x2d4   : > { %2731 = vmatprep.subr.bf16.mxu1 %v5566_v15  ;;  %v5529_v15 = vcombine.low %v1955_v60, %v1959_v61  ;;  %v5538_v16 = vcombine.high %v1963_v13, %v1967_v14  ;;  %v5978_v60 = vld [vmem:[%s7103_s4 + $0x70] sm:$0xff]  }
 0x2d5   : > { %v5979_v61 = vld [vmem:[%s7103_s4 + $0x30] sm:$0xff]  }
 0x2d7   : > { %2732 = vmatpush1.bf16.msra.mxu1 %v5565_v18  ;;  %v1975_v18 = vld [vmem:[%s7114_s26 + $0x270] sm:$0xff] }
 0x2d8   : > { %2733 = vmatprep.subr.bf16.mxu1 %v5574_v19  ;;  %v5537_v19 = vcombine.low %v1963_v13, %v1967_v14  ;;  %v5546_v20 = vcombine.high %v1971_v17, %v1975_v18 }
 0x2db   : > { %2734 = vmatpush1.bf16.msra.mxu1 %v5573_v22  ;;  %v1983_v22 = vld [vmem:[%s7114_s26 + $0x2b0] sm:$0xff] }
 0x2dc   : > { %2735 = vmatprep.subr.bf16.mxu1 %v5582_v23  ;;  %v5545_v23 = vcombine.low %v1971_v17, %v1975_v18  ;;  %v5554_v24 = vcombine.high %v1979_v21, %v1983_v22  ;;  %v5553_v27 = vcombine.low %v1979_v21, %v1983_v22 }
 0x2df   : > { %2736 = vmatpush1.bf16.msra.mxu1 %v5581_v26  ;;  %v1991_v26 = vld [vmem:[%s7114_s26 + $0x2f0] sm:$0xff] }
 0x2e0   : > { %2737 = vmatprep.subr.bf16.mxu1 %v5590_v28  ;;  %v5562_v28 = vcombine.high %v1987_v25, %v1991_v26  ;;  %v5561_v31 = vcombine.low %v1987_v25, %v1991_v26 }
 0x2e3   : > { %2738 = vmatpush1.bf16.msra.mxu1 %v5589_v32  ;;  %v5570_v32 = vcombine.high %v1995_v29, %v1999_v30 }
 0x2e4   : > { %2789 = vmatprep.subr.bf16.mxu1 %v5474_v33  ;;  %v2003_v33 = vld [vmem:[%s7114_s26 + $0x350] sm:$0xff] }
 0x2e5   : > { %v5577_v41 = vcombine.low %v2003_v33, %v2007_v34 }
 0x2e6   : > { %2740 = vmatmul.mubr.bf16.vlgmr.msra.gmra.mrb[32].mxu1 %v7320_v36 }
 0x2e7   : > { %2790 = vmatpush1.bf16.msra.mxu1 %v5473_v37  ;;  %2821 = vmatprep.mubr.bf16.mxu1 %v7287_v45  ;;  %v5578_v37 = vcombine.high %v2003_v33, %v2007_v34 }
 0x2e8   : > { %2791 = vmatprep.subr.bf16.mxu1 %v5482_v38  ;;  %v2011_v38 = vld [vmem:[%s7114_s26 + $0x390] sm:$0xff] }
 0x2e9   : > { %v5585_v44 = vcombine.low %v2011_v38, %v2015_v40 }
 0x2eb   : > { %2792 = vmatpush1.bf16.msra.mxu1 %v5481_v0  ;;  %v5586_v0 = vcombine.high %v2011_v38, %v2015_v40 }
 0x2ec   : > { %2793 = vmatprep.subr.bf16.mxu1 %v5490_v42  ;;  %v2019_v42 = vld [vmem:[%s7114_s26 + $0x3d0] sm:$0xff] }
 0x2ef   : > { %2794 = vmatpush1.bf16.msra.mxu1 %v5489_v46  ;;  %v5594_v46 = vcombine.high %v2019_v42, %v2023_v43 }
 0x2f0   : > { %2795 = vmatprep.subr.bf16.mxu1 %v5498_v47  ;;  %v5593_v47 = vcombine.low %v2019_v42, %v2023_v43  ;;  %v1056_v42 = vld [vmem:[%s876_s30] sm:$0x3]  ;;  %s8660_s30 = sld [smem:[#allocation115_spill]] }
 0x2f3   : > { %2796 = vmatpush1.bf16.msra.mxu1 %v5497_v50  ;;  %v5956_v50 = vld [vmem:[%s7103_s4 + $0x48] sm:$0xff]  }
 0x2f4   : > { %2797 = vmatprep.subr.bf16.mxu1 %v5506_v51  ;;  %v5959_v51 = vld [vmem:[%s7103_s4 + $0x8] sm:$0xff]  }
 0x2f7   : > { %2798 = vmatpush1.bf16.msra.mxu1 %v5505_v54  ;;  %v5966_v54 = vld [vmem:[%s7103_s4 + $0x58] sm:$0xff]  }
 0x2f8   : > { %2799 = vmatprep.subr.bf16.mxu1 %v5514_v55  ;;  %v5969_v55 = vld [vmem:[%s7103_s4 + $0x18] sm:$0xff]  }
 0x2fb   : > { %2800 = vmatpush1.bf16.msra.mxu1 %v5513_v58  ;;  %v5976_v58 = vld [vmem:[%s7103_s4 + $0x68] sm:$0xff]  }
 0x2fc   : > { %2801 = vmatprep.subr.bf16.mxu1 %v5522_v59  ;;  %v5977_v59 = vld [vmem:[%s7103_s4 + $0x28] sm:$0xff]  }
 0x2ff   : > { %2802 = vmatpush1.bf16.msra.mxu1 %v5521_v62  ;;  %v5980_v62 = vld [vmem:[%s7103_s4 + $0x78] sm:$0xff]  }
 0x300   : > { %2803 = vmatprep.subr.bf16.mxu1 %v5530_v63  ;;  %v5981_v63 = vld [vmem:[%s7103_s4 + $0x38] sm:$0xff]  }
 0x303   : > { %2804 = vmatpush1.bf16.msra.mxu1 %v5529_v15 }
 0x304   : > { %2805 = vmatprep.subr.bf16.mxu1 %v5538_v16 }
 0x307   : > { %2806 = vmatpush1.bf16.msra.mxu1 %v5537_v19 }
 0x308   : > { %2807 = vmatprep.subr.bf16.mxu1 %v5546_v20 }
 0x30b   : > { %2808 = vmatpush1.bf16.msra.mxu1 %v5545_v23 }
 0x30c   : > { %2809 = vmatprep.subr.bf16.mxu1 %v5554_v24 }
 0x30f   : > { %2810 = vmatpush1.bf16.msra.mxu1 %v5553_v27 }
 0x310   : > { %2811 = vmatprep.subr.bf16.mxu1 %v5562_v28 }
 0x313   : > { %2812 = vmatpush1.bf16.msra.mxu1 %v5561_v31 }
 0x314   : > { %2813 = vmatprep.subr.bf16.mxu1 %v5570_v32 }
 0x317   : > { %2814 = vmatpush1.bf16.msra.mxu1 %v5569_v35 }
 0x318   : > { %2815 = vmatprep.subr.bf16.mxu1 %v5578_v37  ;;  %v8434_v37 = vlaneseq }
 0x31a   : > { %v7420_v40 = vshrl.u32 %v8434_v37, 7 }
 0x31b   : > { %2816 = vmatpush1.bf16.msra.mxu1 %v5577_v41 }
 0x31c   : > { %2817 = vmatprep.subr.bf16.mxu1 %v5586_v0 }
 0x31f   : > { %2818 = vmatpush1.bf16.msra.mxu1 %v5585_v44  ;;  %v7434_v44 = vsub.s32 1, %v7420_v40 }
 0x320   : > { %2819 = vmatprep.subr.bf16.mxu1 %v5594_v46 }
 0x321   : > { %8548 = vst [vmem:[#allocation59_spill] sm:$0xff] %v7434_v44 }
 0x323   : > { %2820 = vmatpush1.bf16.msra.mxu1 %v5593_v47  ;;  %v1065_v47 = vrot.slane %v1056_v42, %v7434_v44 }
 0x324   : > { %5707 = vmatprep.subr.bf16.mxu1 %v5951_v48 }
 0x326   : > { %2822 = vmatmul.mubr.bf16.vlgmr.msra.gmra.mrb[36].mxu1 %v7320_v36 }
 0x327   : > { %5708 = vmatpush3.bf16.msra.mxu1 %v5954_v49  ;;  %3036 = vmatprep.mubr.bf16.mxu1 %v7287_v45 }
 0x328   : > { %5709 = vmatprep.subr.bf16.mxu1 %v5956_v50 }
 0x32b   : > { %5710 = vmatpush3.bf16.msra.mxu1 %v5959_v51 }
 0x32c   : > { %5711 = vmatprep.subr.bf16.mxu1 %v5961_v52 }
 0x32f   : > { %5712 = vmatpush3.bf16.msra.mxu1 %v5964_v53 }
 0x330   : > { %5713 = vmatprep.subr.bf16.mxu1 %v5966_v54 }
 0x333   : > { %5714 = vmatpush3.bf16.msra.mxu1 %v5969_v55 }
 0x334   : > { %5715 = vmatprep.subr.bf16.mxu1 %v5971_v56 }
 0x337   : > { %5716 = vmatpush3.bf16.msra.mxu1 %v5974_v57 }
 0x338   : > { %5717 = vmatprep.subr.bf16.mxu1 %v5976_v58 }
 0x33b   : > { %5718 = vmatpush3.bf16.msra.mxu1 %v5977_v59 }
 0x33c   : > { %5719 = vmatprep.subr.bf16.mxu1 %v5978_v60 }
 0x33f   : > { %5720 = vmatpush3.bf16.msra.mxu1 %v5979_v61 }
 0x340   : > { %5721 = vmatprep.subr.bf16.mxu1 %v5980_v62 }
 0x343   : > { %5722 = vmatpush3.bf16.msra.mxu1 %v5981_v63 }
 0x346   : > { %3037 = vmatmul.mubr.bf16.vlgmr.msra.gmra.mrb[40].mxu1 %v7320_v36 }
 0x359   : > { %v7371_v13 = vpop.f32.mrb[0].mxu1 }
 0x35a   : > { %v7373_v14 = vpop.f32.mrb[1].mxu1 }
 0x35b   : > { %v7375_v15 = vpop.f32.mrb[2].mxu1 }
 0x35c   : > { %v7377_v16 = vpop.f32.mrb[3].mxu1 }
 0x361   : > { %v7379_v17 = vpop.f32.mrb[4].mxu1 }
 0x362   : > { %v7381_v18 = vpop.f32.mrb[5].mxu1 }
 0x363   : > { %v7383_v19 = vpop.f32.mrb[6].mxu1 }
 0x364   : > { %v7385_v20 = vpop.f32.mrb[7].mxu1 }
 0x369   : > { %v7387_v21 = vpop.f32.mrb[8].mxu1 }
 0x36a   : > { %8536 = vst [vmem:[#allocation48_spill] sm:$0xff] %v7387_v21  ;;  %v7389_v22 = vpop.f32.mrb[9].mxu1 }
 0x36b   : > { %8537 = vst [vmem:[#allocation49_spill] sm:$0xff] %v7389_v22  ;;  %v7391_v23 = vpop.f32.mrb[10].mxu1  ;;  %v1182_v48 = vpop.f32.mrb[0].mxu0 }
 0x36c   : > { %8538 = vst [vmem:[#allocation50_spill] sm:$0xff] %v7391_v23  ;;  %v7393_v24 = vpop.f32.mrb[11].mxu1  ;;  %v1184_v49 = vpop.f32.mrb[1].mxu0 }
 0x36d   : > { %8539 = vst [vmem:[#allocation51_spill] sm:$0xff] %v7393_v24  ;;  %v7441_v51 = vadd.f32 %v1184_v49, %v1065_v47  ;;  %v1186_v52 = vpop.f32.mrb[2].mxu0 }
 0x36e   : > { %v1188_v54 = vpop.f32.mrb[3].mxu0 }
 0x36f   : > { %8551 = vst [vmem:[#allocation62_spill] sm:$0xff] %v7441_v51  ;;  %v7447_v56 = vadd.f32 %v1188_v54, %v1065_v47 }
 0x371   : > { %v7395_v25 = vpop.f32.mrb[12].mxu1  ;;  %8554 = vst [vmem:[#allocation65_spill] sm:$0xff] %v7447_v56 }
 0x372   : > { %8540 = vst [vmem:[#allocation52_spill] sm:$0xff] %v7395_v25  ;;  %v7397_v26 = vpop.f32.mrb[13].mxu1 }
 0x373   : > { %8541 = vst [vmem:[#allocation53_spill] sm:$0xff] %v7397_v26  ;;  %v7399_v27 = vpop.f32.mrb[14].mxu1  ;;  %v1192_v58 = vpop.f32.mrb[4].mxu0 }
 0x374   : > { %8542 = vst [vmem:[#allocation54_spill] sm:$0xff] %v7399_v27  ;;  %v7401_v28 = vpop.f32.mrb[15].mxu1  ;;  %v1194_v59 = vpop.f32.mrb[5].mxu0 }
 0x375   : > { %8543 = vst [vmem:[#allocation55_spill] sm:$0xff] %v7401_v28  ;;  %v1196_v60 = vpop.f32.mrb[6].mxu0  ;;  %v7451_v62 = vadd.f32 %v1194_v59, %v1065_v47 }
 0x376   : > { %v1198_v61 = vpop.f32.mrb[7].mxu0 }
 0x377   : > { %8556 = vst [vmem:[#allocation67_spill] sm:$0xff] %v7451_v62  ;;  %v7453_v63 = vadd.f32 %v1198_v61, %v1065_v47 }
 0x379   : > { %v7403_v29 = vpop.f32.mrb[16].mxu1  ;;  %8557 = vst [vmem:[#allocation68_spill] sm:$0xff] %v7453_v63 }
 0x37a   : > { %v7405_v30 = vpop.f32.mrb[17].mxu1 }
 0x37b   : > { %v7407_v31 = vpop.f32.mrb[18].mxu1  ;;  %v1202_v49 = vpop.f32.mrb[8].mxu0 }
 0x37c   : > { %v7409_v32 = vpop.f32.mrb[19].mxu1  ;;  %v1204_v39 = vpop.f32.mrb[9].mxu0 }
 0x37d   : > { %v1206_v37 = vpop.f32.mrb[10].mxu0  ;;  %v7455_v7 = vadd.f32 %v1204_v39, %v1065_v47 }
 0x37e   : > { %v1208_v9 = vpop.f32.mrb[11].mxu0 }
 0x37f   : > { %8558 = vst [vmem:[#allocation69_spill] sm:$0xff] %v7455_v7  ;;  %v7457_v5 = vadd.f32 %v1208_v9, %v1065_v47  ;;  %v6575_v7 = vmov 1966171168  }
 0x380   : > { %v3047_v51 = vunpack.c.l.s4 %v6575_v7 }
 0x381   : > { %v7411_v33 = vpop.f32.mrb[20].mxu1  ;;  %8559 = vst [vmem:[#allocation70_spill] sm:$0xff] %v7457_v5 }
 0x382   : > { %v7413_v34 = vpop.f32.mrb[21].mxu1 }
 0x383   : > { %v7415_v35 = vpop.f32.mrb[22].mxu1  ;;  %v1212_v8 = vpop.f32.mrb[12].mxu0 }
 0x384   : > { %v7417_v38 = vpop.f32.mrb[23].mxu1  ;;  %v1214_v54 = vpop.f32.mrb[13].mxu0 }
 0x385   : > { %v1216_v4 = vpop.f32.mrb[14].mxu0  ;;  %v7459_v1 = vadd.f32 %v1214_v54, %v1065_v47 }
 0x386   : > { %v1218_v3 = vpop.f32.mrb[15].mxu0 }
 0x387   : > { %8560 = vst [vmem:[#allocation71_spill] sm:$0xff] %v7459_v1  ;;  %v7461_v2 = vadd.f32 %v1218_v3, %v1065_v47  ;;  %v5597_v1 = vld [vmem:[%s7140_s24] ss:$0 sm:$0xff] }
 0x389   : > { %v7422_v41 = vpop.f32.mrb[24].mxu1  ;;  %8561 = vst [vmem:[#allocation72_spill] sm:$0xff] %v7461_v2 }
 0x38a   : > { %8544 = vst [vmem:[#allocation56_spill] sm:$0xff] %v7422_v41  ;;  %v7424_v0 = vpop.f32.mrb[25].mxu1 }
 0x38b   : > { %8545 = vst [vmem:[#allocation57_spill] sm:$0xff] %v7424_v0  ;;  %v7431_v43 = vpop.f32.mrb[26].mxu1 }
 0x38c   : > { %8547 = vst [vmem:[#allocation58_spill] sm:$0xff] %v7431_v43  ;;  %v7436_v46 = vpop.f32.mrb[27].mxu1 }
 0x38d   : > { %8549 = vst [vmem:[#allocation60_spill] sm:$0xff] %v7436_v46 }
 0x391   : > { %v7439_v50 = vpop.f32.mrb[28].mxu1 }
 0x392   : > { %8550 = vst [vmem:[#allocation61_spill] sm:$0xff] %v7439_v50  ;;  %v7443_v53 = vpop.f32.mrb[29].mxu1 }
 0x393   : > { %8552 = vst [vmem:[#allocation63_spill] sm:$0xff] %v7443_v53  ;;  %v7445_v55 = vpop.f32.mrb[30].mxu1 }
 0x394   : > { %8553 = vst [vmem:[#allocation64_spill] sm:$0xff] %v7445_v55  ;;  %v7449_v57 = vpop.f32.mrb[31].mxu1 }
 0x395   : > { %8555 = vst [vmem:[#allocation66_spill] sm:$0xff] %v7449_v57  ;;  %v3048_v57 = vunpack.c.0.s8 %v3047_v51 }
 0x397   : > { %v7473_v47 = vsub.s32 %v3048_v57, %v7420_v40 }
 0x399   : > { %8562 = vst [vmem:[#allocation73_spill] sm:$0xff] %v7473_v47 }
 0x3b9   : > { %v7463_v59 = vpop.f32.mrb[32].mxu1 }
 0x3ba   : > { %v7465_v61 = vpop.f32.mrb[33].mxu1 }
 0x3bb   : > { %v2745_v63 = vpop.f32.mrb[34].mxu1 }
 0x3bc   : > { %v2746_v62 = vpop.f32.mrb[35].mxu1  ;;  %v7476_v63 = vsub.s32 0, %v7420_v40 }
 0x3be   : > { %8563 = vst [vmem:[#allocation74_spill] sm:$0xff] %v7476_v63  ;;  %v1061_v27 = vrot.slane %v1056_v42, %v7476_v63 }
 0x3c0   : > { %v1193_v57 = vadd.f32 %v1192_v58, %v1061_v27  ;;  %v1197_v50 = vadd.f32 %v1196_v60, %v1061_v27  ;;  %v1203_v42 = vadd.f32 %v1202_v49, %v1061_v27 }
 0x3f9   : > { %v7467_v56 = vpop.f32.mrb[36].mxu1 }
 0x3fa   : > { %v7469_v39 = vpop.f32.mrb[37].mxu1 }
 0x3fb   : > { %v2827_v9 = vpop.f32.mrb[38].mxu1 }
 0x3fc   : > { %v2828_v5 = vpop.f32.mrb[39].mxu1 }
 0x419   : > { %v5723_v54 = vpop.f32.mrb[40].mxu1 }
 0x41a   : > { %v5724_v55 = vpop.f32.mrb[41].mxu1 }
 0x41b   : > { %v5725_v3 = vadd.f32 %v5724_v55, %v5723_v54  ;;  %v5726_v2 = vpop.f32.mrb[42].mxu1  ;;  %v1183_v55 = vadd.f32 %v1182_v48, %v1061_v27  ;;  %v1187_v54 = vadd.f32 %v1186_v52, %v1061_v27 }
 0x41c   : > { %v5727_v62 = vpop.f32.mrb[43].mxu1 }
 0x41d   : > { %v3039_v28 = vadd.f32 %v5725_v3, %v5597_v1  ;;  %v1207_v3 = vadd.f32 %v1206_v37, %v1061_v27 }
 0x41f   : > { %v3045_v9 = vcombine.high %v3039_v28, %v3039_v28  ;;  %v3052_v5 = vrot.slane %v3039_v28, %v7473_v47  ;;  %v1213_v28 = vadd.f32 %v1212_v8, %v1061_v27 }
 0x421   : > { %v3059_v7 = vrot.slane %v3045_v9, %v7473_v47  ;;  %v3060_v51 = vcombine.high %v3052_v5, %v3052_v5  ;;  %v3068_v53 = vrot.slane %v3052_v5, %v7473_v47 }
 0x423   : > { %v3097_v2 = vrot.slane %v3068_v53, %v7476_v63  ;;  %v3090_v26 = vcombine.high %v3068_v53, %v3068_v53  ;;  %v3082_v62 = vrot.slane %v3060_v51, %v7473_v47  ;;  %v3075_v1 = vrot.slane %v3059_v7, %v7473_v47 }
 0x424   : > { %v3061_v25 = vcombine.high %v3059_v7, %v3059_v7  ;;  %v1217_v53 = vadd.f32 %v1216_v4, %v1061_v27  ;;  %v5614_v27 = vld [vmem:[%s7152_s2] ss:$0 sm:$0xff] }
 0x425   : > { %v3134_v46 = vadd.f32 %v3097_v2, %v1183_v55  ;;  %v3105_v9 = vrot.slane %v3090_v26, %v7476_v63  ;;  %v3092_v43 = vcombine.high %v3082_v62, %v3082_v62  ;;  %v3101_v48 = vrot.slane %v3082_v62, %v7476_v63 }
 0x426   : > { %v3113_v52 = vrot.slane %v3075_v1, %v7476_v63  ;;  %v3089_v58 = vrot.slane %v3061_v25, %v7473_v47  ;;  %v3091_v60 = vcombine.high %v3075_v1, %v3075_v1 }
 0x427   : > { %v3136_v5 = vadd.f32 %v3105_v9, %v1193_v57  ;;  %v3109_v51 = vrot.slane %v3092_v43, %v7476_v63  ;;  %v3135_v49 = vadd.f32 %v3101_v48, %v1187_v54  ;;  %6006 = vtanh.f32 %v3134_v46 }
 0x428   : > { %v3138_v37 = vadd.f32 %v3113_v52, %v1203_v42  ;;  %v3117_v8 = vrot.slane %v3089_v58, %v7476_v63  ;;  %v3121_v26 = vrot.slane %v3091_v60, %v7476_v63  ;;  %v3093_v7 = vcombine.high %v3089_v58, %v3089_v58 }
 0x429   : > { %6008 = vtanh.f32 %v3136_v5  ;;  %v3137_v55 = vadd.f32 %v3109_v51, %v1197_v50  ;;  %v8564_v51 = vlaneseq }
 0x42a   : > { %v3139_v2 = vadd.f32 %v3117_v8, %v1207_v3  ;;  %v3140_v62 = vadd.f32 %v3121_v26, %v1213_v28  ;;  %v3125_v25 = vrot.slane %v3093_v7, %v7476_v63 }
 0x42b   : > { %6010 = vtanh.f32 %v3137_v55 }
 0x42c   : > { %v3141_v4 = vadd.f32 %v3125_v25, %v1217_v53  ;;  %6012 = vtanh.f32 %v3139_v2 }
 0x42d   : > { %6014 = vtanh.f32 %v3135_v49  ;;  %v3188_v49 = vand.u32 127, %v8564_v51  ;;  %v1226_v51 = vld [vmem:[%s7106_s16 + $0x28] sm:$0xff] }
 0x42e   : > { %6016 = vtanh.f32 %v3138_v37 }
 0x42f   : > { %6018 = vtanh.f32 %v3141_v4  ;;  %v7500_v26 = vsub.s32 %v3188_v49, %v7420_v40  ;;  %v1230_v49 = vld [vmem:[%s7106_s16 + $0x48] sm:$0xff] }
 0x430   : > { %6020 = vtanh.f32 %v3140_v62 }
 0x431   : > { %v6007_v43 = vpop.eup %6006  ;;  %8565 = vst [vmem:[#allocation75_spill] sm:$0xff] %v7500_v26 }
 0x432   : > { %v3155_v46 = vmul.f32 %v6007_v43, %v5614_v27 }
 0x433   : > { %v6009_v54 = vpop.eup %6008 }
 0x434   : > { %3163 = vadd.xlane.f32.xlu0 %v3155_v46  ;;  %v3157_v57 = vmul.f32 %v6009_v54, %v5614_v27 }
 0x435   : > { %v6011_v1 = vpop.eup %6010 }
 0x436   : > { %3167 = vadd.xlane.f32.xlu1 %v3157_v57  ;;  %v6013_v50 = vpop.eup %6012  ;;  %v3158_v42 = vmul.f32 %v6011_v1, %v5614_v27 }
 0x437   : > { %v6015_v3 = vpop.eup %6014  ;;  %v3160_v48 = vmul.f32 %v6013_v50, %v5614_v27 }
 0x438   : > { %v3156_v28 = vmul.f32 %v6015_v3, %v5614_v27  ;;  %v6017_v9 = vpop.eup %6016 }
 0x439   : > { %v6019_v52 = vpop.eup %6018  ;;  %v3159_v58 = vmul.f32 %v6017_v9, %v5614_v27 }
 0x43a   : > { %3169 = vadd.xlane.f32.xlu1 %v3158_v42  ;;  %3165 = vadd.xlane.f32.xlu0 %v3156_v28  ;;  %v6021_v60 = vpop.eup %6020  ;;  %v3162_v53 = vmul.f32 %v6019_v52, %v5614_v27 }
 0x43b   : > { %v3161_v5 = vmul.f32 %v6021_v60, %v5614_v27 }
 0x43e   : > { %3173 = vadd.xlane.f32.xlu1 %v3160_v48  ;;  %3171 = vadd.xlane.f32.xlu0 %v3159_v58 }
 0x442   : > { %3177 = vadd.xlane.f32.xlu1 %v3162_v53  ;;  %3175 = vadd.xlane.f32.xlu0 %v3161_v5  ;;  %v1222_v5 = vld [vmem:[%s7106_s16 + $0x8] sm:$0xff] }
 0x4c1   : > { %v7495_v37 = vpop.xlane.xlu0 %3163 }
 0x4c2   : > { %v3192_v2 = vrot.slane %v7495_v37, %v7500_v26 }
 0x4c3   : > { %v7497_v8 = vpop.xlane.xlu1 %3167 }
 0x4c4   : > { %v3200_v4 = vrot.slane %v7497_v8, %v7500_v26 }
 0x4c7   : > { %v7502_v7 = vpop.xlane.xlu1 %3169  ;;  %v7504_v55 = vpop.xlane.xlu0 %3165 }
 0x4c8   : > { %v3196_v62 = vrot.slane %v7504_v55, %v7500_v26  ;;  %v3204_v25 = vrot.slane %v7502_v7, %v7500_v26 }
 0x4ca   : > { %v3222_v43 = vsel %vm3221_vm1, %v3196_v62, %v3192_v2  ;;  %v5407_v2 = vcombine.low %v1222_v5, %v1226_v51  ;;  %v5408_v62 = vcombine.high %v1222_v5, %v1226_v51  ;;  %v1262_v5 = vld [vmem:[%s7106_s16 + $0x148] sm:$0xff] }
 0x4cb   : > { %v7514_v27 = vpop.xlane.xlu1 %3173  ;;  %v3224_v46 = vsel %vm3223_vm2, %v3200_v4, %v3222_v43  ;;  %v7518_v54 = vpop.xlane.xlu0 %3171  ;;  %v1238_v43 = vld [vmem:[%s7106_s16 + $0x88] sm:$0xff] }
 0x4cc   : > { %v3212_v57 = vrot.slane %v7514_v27, %v7500_v26  ;;  %v3226_v1 = vsel %vm3225_vm3, %v3204_v25, %v3224_v46  ;;  %v3208_v50 = vrot.slane %v7518_v54, %v7500_v26  ;;  %v1234_v25 = vld [vmem:[%s7106_s16 + $0x68] sm:$0xff]  ;;  %1678 = vmatprep.subr.bf16.mxu0 %v5408_v62 }
 0x4cd   : > { %v5416_v4 = vcombine.high %v1230_v49, %v1234_v25  ;;  %v1242_v46 = vld [vmem:[%s7106_s16 + $0xa8] sm:$0xff]  ;;  %1679 = vmatpush1.bf16.msra.mxu0 %v5407_v2 }
 0x4ce   : > { %v3228_v3 = vsel %vm3227_vm4, %v3208_v50, %v3226_v1  ;;  %v5424_v1 = vcombine.high %v1238_v43, %v1242_v46  ;;  %v1246_v50 = vld [vmem:[%s7106_s16 + $0xc8] sm:$0xff] }
 0x4cf   : > { %v7525_v42 = vpop.xlane.xlu1 %3177  ;;  %v7528_v28 = vpop.xlane.xlu0 %3175  ;;  %v3230_v48 = vsel %vm3229_vm5, %v3212_v57, %v3228_v3  ;;  %v5415_v57 = vcombine.low %v1230_v49, %v1234_v25  ;;  %1680 = vmatprep.subr.bf16.mxu0 %v5416_v4  ;;  %v1250_v3 = vld [vmem:[%s7106_s16 + $0xe8] sm:$0xff] }
 0x4d0   : > { %v3220_v9 = vrot.slane %v7525_v42, %v7500_v26  ;;  %v3216_v52 = vrot.slane %v7528_v28, %v7500_v26  ;;  %v1266_v51 = vld [vmem:[%s7106_s16 + $0x168] sm:$0xff] }
 0x4d1   : > { %1681 = vmatpush1.bf16.msra.mxu0 %v5415_v57  ;;  %v5448_v2 = vcombine.high %v1262_v5, %v1266_v51  ;;  %v1270_v62 = vld [vmem:[%s7106_s16 + $0x188] sm:$0xff]  ;;  %v5447_v4 = vcombine.low %v1262_v5, %v1266_v51  ;;  %v1240_v51 = vld [vmem:[%s7106_s16 + $0x98] sm:$0xff] }
 0x4d2   : > { %v3232_v58 = vsel %vm3231_vm6, %v3216_v52, %v3230_v48  ;;  %1682 = vmatprep.subr.bf16.mxu0 %v5424_v1  ;;  %v5432_v48 = vcombine.high %v1246_v50, %v1250_v3  ;;  %v1254_v52 = vld [vmem:[%s7106_s16 + $0x108] sm:$0xff] }
 0x4d3   : > { %v3234_v60 = vsel %vm3233_vm7, %v3220_v9, %v3232_v58  ;;  %v5423_v9 = vcombine.low %v1238_v43, %v1242_v46  ;;  %v1258_v58 = vld [vmem:[%s7106_s16 + $0x128] sm:$0xff] }
 0x4d4   : > { %v3237_v53 = vsel %vm3236_vm8, %v3234_v60, -inf  ;;  %v5431_v60 = vcombine.low %v1246_v50, %v1250_v3  ;;  %v5439_v49 = vcombine.low %v1254_v52, %v1258_v58  ;;  %v1274_v25 = vld [vmem:[%s7106_s16 + $0x1a8] sm:$0xff]  ;;  %v1224_v3 = vld [vmem:[%s7106_s16 + $0x18] sm:$0xff] }
 0x4d5   : > { %3238 = vmax.xlane.f32.xlu0 %v3237_v53  ;;  %1683 = vmatpush1.bf16.msra.mxu0 %v5423_v9  ;;  %v5440_v53 = vcombine.high %v1254_v52, %v1258_v58  ;;  %v5456_v43 = vcombine.high %v1270_v62, %v1274_v25  ;;  %v1278_v46 = vld [vmem:[%s7106_s16 + $0x1c8] sm:$0xff]  ;;  %v5455_v1 = vcombine.low %v1270_v62, %v1274_v25  ;;  %v1228_v9 = vld [vmem:[%s7106_s16 + $0x38] sm:$0xff]  ;;  %v8566_v62 = vmov 0  }
 0x4d6   : > { %1684 = vmatprep.subr.bf16.mxu0 %v5432_v48  ;;  %v1282_v57 = vld [vmem:[%s7106_s16 + $0x1e8] sm:$0xff]  ;;  %v5412_v52 = vcombine.high %v1224_v3, %v1228_v9  ;;  %v1232_v58 = vld [vmem:[%s7106_s16 + $0x58] sm:$0xff] }
 0x4d7   : > { %v5464_v50 = vcombine.high %v1278_v46, %v1282_v57  ;;  %v5463_v48 = vcombine.low %v1278_v46, %v1282_v57 }
 0x4d9   : > { %1685 = vmatpush1.bf16.msra.mxu0 %v5431_v60  ;;  %v1236_v60 = vld [vmem:[%s7106_s16 + $0x78] sm:$0xff] }
 0x4da   : > { %1686 = vmatprep.subr.bf16.mxu0 %v5440_v53  ;;  %v5411_v53 = vcombine.low %v1224_v3, %v1228_v9  ;;  %v5420_v5 = vcombine.high %v1232_v58, %v1236_v60 }
 0x4dd   : > { %1687 = vmatpush1.bf16.msra.mxu0 %v5439_v49  ;;  %v1244_v49 = vld [vmem:[%s7106_s16 + $0xb8] sm:$0xff] }
 0x4de   : > { %1688 = vmatprep.subr.bf16.mxu0 %v5448_v2  ;;  %v5419_v2 = vcombine.low %v1232_v58, %v1236_v60  ;;  %v5428_v25 = vcombine.high %v1240_v51, %v1244_v49  ;;  %v5427_v46 = vcombine.low %v1240_v51, %v1244_v49  ;;  %v7576_v58 = vsub.s32 3, %v7420_v40 }
 0x4e0   : > { %8568 = vst [vmem:[#allocation77_spill] sm:$0xff] %v7576_v58 }
 0x4e1   : > { %1689 = vmatpush1.bf16.msra.mxu0 %v5447_v4  ;;  %v1248_v4 = vld [vmem:[%s7106_s16 + $0xd8] sm:$0xff] }
 0x4e2   : > { %1690 = vmatprep.subr.bf16.mxu0 %v5456_v43  ;;  %v1252_v43 = vld [vmem:[%s7106_s16 + $0xf8] sm:$0xff] }
 0x4e3   : > { %v5436_v57 = vcombine.high %v1248_v4, %v1252_v43  ;;  %v5435_v3 = vcombine.low %v1248_v4, %v1252_v43  ;;  %v7586_v43 = vsub.s32 4, %v7420_v40 }
 0x4e5   : > { %1691 = vmatpush1.bf16.msra.mxu0 %v5455_v1  ;;  %v1256_v1 = vld [vmem:[%s7106_s16 + $0x118] sm:$0xff]  ;;  %8569 = vst [vmem:[#allocation78_spill] sm:$0xff] %v7586_v43 }
 0x4e6   : > { %1692 = vmatprep.subr.bf16.mxu0 %v5464_v50  ;;  %v1260_v50 = vld [vmem:[%s7106_s16 + $0x138] sm:$0xff] }
 0x4e7   : > { %v5444_v9 = vcombine.high %v1256_v1, %v1260_v50 }
 0x4e9   : > { %1693 = vmatpush1.bf16.msra.mxu0 %v5463_v48  ;;  %v5443_v48 = vcombine.low %v1256_v1, %v1260_v50 }
 0x4ea   : > { %1824 = vmatprep.subr.bf16.mxu0 %v5412_v52  ;;  %v7573_v52 = vsub.s32 2, %v7420_v40 }
 0x4ec   : > { %1711 = vmatmul.mubr.bf16.vlgmr.msra.gmra.mrb[16].mxu0 %v7167_v6  ;;  %8567 = vst [vmem:[#allocation76_spill] sm:$0xff] %v7573_v52 }
 0x4ed   : > { %1825 = vmatpush1.bf16.msra.mxu0 %v5411_v53  ;;  %1720 = vmatprep.mubr.bf16.mxu0 %v8566_v62 }
 0x4ee   : > { %1826 = vmatprep.subr.bf16.mxu0 %v5420_v5 }
 0x4f1   : > { %1827 = vmatpush1.bf16.msra.mxu0 %v5419_v2 }
 0x4f2   : > { %1828 = vmatprep.subr.bf16.mxu0 %v5428_v25 }
 0x4f4   : > { %1721 = vmatmul.mubr.bf16.gmra.mrb[20].mxu0 %v7181_v10 }
 0x4f5   : > { %1829 = vmatpush1.bf16.msra.mxu0 %v5427_v46  ;;  %1730 = vmatprep.mubr.bf16.mxu0 %v8566_v62 }
 0x4f6   : > { %1830 = vmatprep.subr.bf16.mxu0 %v5436_v57 }
 0x4f9   : > { %1831 = vmatpush1.bf16.msra.mxu0 %v5435_v3 }
 0x4fa   : > { %1832 = vmatprep.subr.bf16.mxu0 %v5444_v9  ;;  %v7591_v9 = vsub.s32 5, %v7420_v40 }
 0x4fc   : > { %1731 = vmatmul.mubr.bf16.gmra.mrb[24].mxu0 %v7185_v11  ;;  %8570 = vst [vmem:[#allocation79_spill] sm:$0xff] %v7591_v9 }
 0x4fd   : > { %1833 = vmatpush1.bf16.msra.mxu0 %v5443_v48  ;;  %1740 = vmatprep.mubr.bf16.mxu0 %v8566_v62 }
 0x504   : > { %1741 = vmatmul.mubr.bf16.gmra.mrb[28].mxu0 %v7189_v12 }
 0x505   : > { %1856 = vmatprep.mubr.bf16.mxu0 %v8566_v62 }
 0x562   : > { %v3239_v60 = vpop.xlane.xlu0 %3238 }
 0x563   : > { %v3244_v53 = vrot.slane %v3239_v60, %v7476_v63  ;;  %v3248_v5 = vrot.slane %v3239_v60, %v7434_v44  ;;  %v3252_v51 = vrot.slane %v3239_v60, %v7573_v52  ;;  %v3256_v49 = vrot.slane %v3239_v60, %v7576_v58 }
 0x564   : > { %v3260_v1 = vrot.slane %v3239_v60, %v7586_v43 }
 0x565   : > { %v3281_v2 = vsub.f32 %v7495_v37, %v3244_v53  ;;  %v3282_v25 = vsub.f32 %v7504_v55, %v3248_v5  ;;  %v3283_v4 = vsub.f32 %v7497_v8, %v3252_v51  ;;  %v3284_v50 = vsub.f32 %v7502_v7, %v3256_v49 }
 0x566   : > { %v7594_v37 = vsub.s32 6, %v7420_v40  ;;  %v3264_v8 = vrot.slane %v3239_v60, %v7591_v9  ;;  %v3285_v55 = vsub.f32 %v7518_v54, %v3260_v1  ;;  %v7599_v53 = vsub.s32 7, %v7420_v40 }
 0x567   : > { %v3289_v46 = vmul.f32 1.442695, %v3281_v2  ;;  %v3291_v57 = vmul.f32 1.442695, %v3282_v25  ;;  %v3293_v3 = vmul.f32 1.442695, %v3283_v4 }
 0x568   : > { %8571 = vst [vmem:[#allocation80_spill] sm:$0xff] %v7594_v37  ;;  %v3295_v48 = vmul.f32 1.442695, %v3284_v50  ;;  %8572 = vst [vmem:[#allocation81_spill] sm:$0xff] %v7599_v53  ;;  %v3268_v7 = vrot.slane %v3239_v60, %v7594_v37  ;;  %v3286_v5 = vsub.f32 %v7514_v27, %v3264_v8  ;;  %v3297_v51 = vmul.f32 1.442695, %v3285_v55 }
 0x569   : > { %6022 = vpow2.f32 %v3289_v46  ;;  %v3272_v54 = vrot.slane %v3239_v60, %v7599_v53  ;;  %v1264_v27 = vld [vmem:[%s7106_s16 + $0x158] sm:$0xff] }
 0x56a   : > { %6024 = vpow2.f32 %v3291_v57  ;;  %v3287_v25 = vsub.f32 %v7528_v28, %v3268_v7  ;;  %v3299_v40 = vmul.f32 1.442695, %v3286_v5  ;;  %v1268_v46 = vld [vmem:[%s7106_s16 + $0x178] sm:$0xff] }
 0x56b   : > { %6026 = vpow2.f32 %v3293_v3  ;;  %v5451_v57 = vcombine.low %v1264_v27, %v1268_v46  ;;  %v5452_v1 = vcombine.high %v1264_v27, %v1268_v46  ;;  %v3288_v50 = vsub.f32 %v7525_v42, %v3272_v54  ;;  %v1272_v28 = vld [vmem:[%s7106_s16 + $0x198] sm:$0xff]  ;;  %v1902_v27 = vld [vmem:[%s7114_s26 + $0x28] sm:$0xff] }
 0x56c   : > { %6028 = vpow2.f32 %v3295_v48  ;;  %v3301_v60 = vmul.f32 1.442695, %v3287_v25  ;;  %v1276_v3 = vld [vmem:[%s7106_s16 + $0x1b8] sm:$0xff] }
 0x56d   : > { %6030 = vpow2.f32 %v3297_v51  ;;  %1834 = vmatprep.subr.bf16.mxu0 %v5452_v1  ;;  %v5459_v55 = vcombine.low %v1272_v28, %v1276_v3  ;;  %v5460_v48 = vcombine.high %v1272_v28, %v1276_v3  ;;  %v3303_v7 = vmul.f32 1.442695, %v3288_v50  ;;  %v1280_v5 = vld [vmem:[%s7106_s16 + $0x1d8] sm:$0xff]  ;;  %v1906_v50 = vld [vmem:[%s7114_s26 + $0x48] sm:$0xff] }
 0x56e   : > { %6032 = vpow2.f32 %v3299_v40  ;;  %1835 = vmatpush1.bf16.msra.mxu0 %v5451_v57  ;;  %v1284_v51 = vld [vmem:[%s7106_s16 + $0x1f8] sm:$0xff]  ;;  %v1898_v40 = vld [vmem:[%s7114_s26 + $0x8] sm:$0xff]  ;;  %s8659_s16 = sld [smem:[#allocation37_spill]] }
 0x56f   : > { %6034 = vpow2.f32 %v3301_v60  ;;  %1836 = vmatprep.subr.bf16.mxu0 %v5460_v48  ;;  %v5467_v54 = vcombine.low %v1280_v5, %v1284_v51  ;;  %v5468_v25 = vcombine.high %v1280_v5, %v1284_v51  ;;  %v5471_v57 = vcombine.low %v1898_v40, %v1902_v27  ;;  %v1910_v60 = vld [vmem:[%s7114_s26 + $0x68] sm:$0xff] }
 0x570   : > { %6036 = vpow2.f32 %v3303_v7  ;;  %v5472_v1 = vcombine.high %v1898_v40, %v1902_v27  ;;  %v5479_v3 = vcombine.low %v1906_v50, %v1910_v60  ;;  %v1914_v48 = vld [vmem:[%s7114_s26 + $0x88] sm:$0xff] }
 0x571   : > { %v1918_v7 = vld [vmem:[%s7114_s26 + $0xa8] sm:$0xff] }
 0x572   : > { %1837 = vmatpush1.bf16.msra.mxu0 %v5459_v55  ;;  %v5480_v55 = vcombine.high %v1906_v50, %v1910_v60  ;;  %v5488_v5 = vcombine.high %v1914_v48, %v1918_v7  ;;  %v5487_v51 = vcombine.low %v1914_v48, %v1918_v7  ;;  %v1938_v60 = vld [vmem:[%s7114_s26 + $0x148] sm:$0xff] }
 0x573   : > { %v7603_v49 = vpop.eup %6022  ;;  %1838 = vmatprep.subr.bf16.mxu0 %v5468_v25  ;;  %v1926_v25 = vld [vmem:[%s7114_s26 + $0xe8] sm:$0xff] }
 0x574   : > { %v7605_v2 = vpop.eup %6024  ;;  %3314 = vperm.xlu1 %5940, %v7603_v49   ;;  %v1946_v7 = vld [vmem:[%s7114_s26 + $0x188] sm:$0xff]  ;;  %p8661_p12 = scmp.ne.s32.totalorder %s8659_s16, 0 }
 0x575   : > { %3317 = vperm.xlu0 %5941, %v7605_v2   ;;  %v7611_v4 = vpop.eup %6026 }
 0x576   : > { %v7619_v8 = vpop.eup %6028  ;;  %1839 = vmatpush1.bf16.msra.mxu0 %v5467_v54  ;;  %v1922_v54 = vld [vmem:[%s7114_s26 + $0xc8] sm:$0xff] }
 0x577   : > { %v7624_v42 = vpop.eup %6030  ;;  %2748 = vmatprep.subr.bf16.mxu0 %v5472_v1  ;;  %v5496_v40 = vcombine.high %v1922_v54, %v1926_v25  ;;  %v5495_v27 = vcombine.low %v1922_v54, %v1926_v25  ;;  %v1934_v1 = vld [vmem:[%s7114_s26 + $0x128] sm:$0xff] }
 0x578   : > { %3320 = vperm.xlu1 %5940, %v7611_v4   ;;  %v7629_v46 = vpop.eup %6032  ;;  %v1954_v54 = vld [vmem:[%s7114_s26 + $0x1c8] sm:$0xff] }
 0x579   : > { %1857 = vmatmul.mubr.bf16.vlgmr.msra.gmra.mrb[32].mxu0 %v7167_v6  ;;  %v7635_v28 = vpop.eup %6034  ;;  %v1958_v25 = vld [vmem:[%s7114_s26 + $0x1e8] sm:$0xff] }
 0x57a   : > { %2749 = vmatpush1.bf16.msra.mxu0 %v5471_v57  ;;  %1866 = vmatprep.mubr.bf16.mxu0 %v8566_v62  ;;  %v7641_v6 = vpop.eup %6036  ;;  %v1930_v57 = vld [vmem:[%s7114_s26 + $0x108] sm:$0xff] }
 0x57b   : > { %2750 = vmatprep.subr.bf16.mxu0 %v5480_v55  ;;  %v5504_v50 = vcombine.high %v1930_v57, %v1934_v1  ;;  %v5503_v55 = vcombine.low %v1930_v57, %v1934_v1  ;;  %v1962_v57 = vld [vmem:[%s7114_s26 + $0x208] sm:$0xff] }
 0x57c   : > { %3323 = vperm.xlu1 %5940, %v7619_v8   ;;  %v1966_v1 = vld [vmem:[%s7114_s26 + $0x228] sm:$0xff] }
 0x57e   : > { %2751 = vmatpush1.bf16.msra.mxu0 %v5479_v3  ;;  %v1942_v3 = vld [vmem:[%s7114_s26 + $0x168] sm:$0xff] }
 0x57f   : > { %2752 = vmatprep.subr.bf16.mxu0 %v5488_v5  ;;  %v5512_v48 = vcombine.high %v1938_v60, %v1942_v3  ;;  %v5511_v5 = vcombine.low %v1938_v60, %v1942_v3  ;;  %v1974_v60 = vld [vmem:[%s7114_s26 + $0x268] sm:$0xff]  ;;  %v5535_v3 = vcombine.low %v1962_v57, %v1966_v1 }
 0x580   : > { %3326 = vperm.xlu1 %5940, %v7624_v42  }
 0x581   : > { %1867 = vmatmul.mubr.bf16.gmra.mrb[36].mxu0 %v7181_v10  ;;  %v1950_v10 = vld [vmem:[%s7114_s26 + $0x1a8] sm:$0xff] }
 0x582   : > { %2753 = vmatpush1.bf16.msra.mxu0 %v5487_v51  ;;  %1876 = vmatprep.mubr.bf16.mxu0 %v8566_v62  ;;  %v5520_v51 = vcombine.high %v1946_v7, %v1950_v10 }
 0x583   : > { %2754 = vmatprep.subr.bf16.mxu0 %v5496_v40  ;;  %v5519_v40 = vcombine.low %v1946_v7, %v1950_v10  ;;  %v1982_v7 = vld [vmem:[%s7114_s26 + $0x2a8] sm:$0xff] }
 0x584   : > { %3329 = vperm.xlu1 %5940, %v7629_v46  }
 0x586   : > { %2755 = vmatpush1.bf16.msra.mxu0 %v5495_v27  ;;  %v5528_v27 = vcombine.high %v1954_v54, %v1958_v25 }
 0x587   : > { %2756 = vmatprep.subr.bf16.mxu0 %v5504_v50  ;;  %v1970_v50 = vld [vmem:[%s7114_s26 + $0x248] sm:$0xff] }
 0x588   : > { %3332 = vperm.xlu1 %5940, %v7635_v28  }
 0x589   : > { %1877 = vmatmul.mubr.bf16.gmra.mrb[40].mxu0 %v7185_v11  ;;  %v5527_v11 = vcombine.low %v1954_v54, %v1958_v25 }
 0x58a   : > { %2757 = vmatpush1.bf16.msra.mxu0 %v5503_v55  ;;  %1886 = vmatprep.mubr.bf16.mxu0 %v8566_v62  ;;  %v5536_v62 = vcombine.high %v1962_v57, %v1966_v1  ;;  %v5544_v55 = vcombine.high %v1970_v50, %v1974_v60 }
 0x58b   : > { %2758 = vmatprep.subr.bf16.mxu0 %v5512_v48  ;;  %v1978_v48 = vld [vmem:[%s7114_s26 + $0x288] sm:$0xff] }
 0x58c   : > { %3335 = vperm.xlu1 %5940, %v7641_v6   ;;  %v5552_v10 = vcombine.high %v1978_v48, %v1982_v7  ;;  %v5551_v54 = vcombine.low %v1978_v48, %v1982_v7 }
 0x58e   : > { %2759 = vmatpush1.bf16.msra.mxu0 %v5511_v5  ;;  %v1986_v5 = vld [vmem:[%s7114_s26 + $0x2c8] sm:$0xff] }
 0x58f   : > { %2760 = vmatprep.subr.bf16.mxu0 %v5520_v51  ;;  %v1990_v51 = vld [vmem:[%s7114_s26 + $0x2e8] sm:$0xff] }
 0x590   : > { %v5560_v25 = vcombine.high %v1986_v5, %v1990_v51  ;;  %v5559_v57 = vcombine.low %v1986_v5, %v1990_v51 }
 0x591   : > { %1887 = vmatmul.mubr.bf16.gmra.mrb[44].mxu0 %v7189_v12  ;;  %v5543_v12 = vcombine.low %v1970_v50, %v1974_v60 }
 0x592   : > { %2761 = vmatpush1.bf16.msra.mxu0 %v5519_v40  ;;  %2780 = vmatprep.mubr.bf16.mxu0 %v7287_v45  ;;  %v1994_v40 = vld [vmem:[%s7114_s26 + $0x308] sm:$0xff] }
 0x593   : > { %2762 = vmatprep.subr.bf16.mxu0 %v5528_v27  ;;  %v1998_v27 = vld [vmem:[%s7114_s26 + $0x328] sm:$0xff] }
 0x594   : > { %v5568_v1 = vcombine.high %v1994_v40, %v1998_v27  ;;  %v5567_v50 = vcombine.low %v1994_v40, %v1998_v27 }
 0x596   : > { %2763 = vmatpush1.bf16.msra.mxu0 %v5527_v11  ;;  %v2002_v11 = vld [vmem:[%s7114_s26 + $0x348] sm:$0xff] }
 0x597   : > { %2764 = vmatprep.subr.bf16.mxu0 %v5536_v62  ;;  %v2006_v62 = vld [vmem:[%s7114_s26 + $0x368] sm:$0xff] }
 0x598   : > { %v5576_v60 = vcombine.high %v2002_v11, %v2006_v62  ;;  %v5575_v48 = vcombine.low %v2002_v11, %v2006_v62 }
 0x59a   : > { %2765 = vmatpush1.bf16.msra.mxu0 %v5535_v3  ;;  %v2010_v3 = vld [vmem:[%s7114_s26 + $0x388] sm:$0xff] }
 0x59b   : > { %2766 = vmatprep.subr.bf16.mxu0 %v5544_v55  ;;  %v2014_v55 = vld [vmem:[%s7114_s26 + $0x3a8] sm:$0xff] }
 0x59c   : > { %v5584_v7 = vcombine.high %v2010_v3, %v2014_v55  ;;  %v5583_v5 = vcombine.low %v2010_v3, %v2014_v55 }
 0x59e   : > { %2767 = vmatpush1.bf16.msra.mxu0 %v5543_v12  ;;  %v2018_v12 = vld [vmem:[%s7114_s26 + $0x3c8] sm:$0xff] }
 0x59f   : > { %2768 = vmatprep.subr.bf16.mxu0 %v5552_v10  ;;  %v2022_v10 = vld [vmem:[%s7114_s26 + $0x3e8] sm:$0xff] }
 0x5a0   : > { %v5592_v51 = vcombine.high %v2018_v12, %v2022_v10  ;;  %v5591_v40 = vcombine.low %v2018_v12, %v2022_v10 }
 0x5a2   : > { %2769 = vmatpush1.bf16.msra.mxu0 %v5551_v54  ;;  %v1900_v54 = vld [vmem:[%s7114_s26 + $0x18] sm:$0xff] }
 0x5a3   : > { %2770 = vmatprep.subr.bf16.mxu0 %v5560_v25  ;;  %v1904_v25 = vld [vmem:[%s7114_s26 + $0x38] sm:$0xff] }
 0x5a4   : > { %v5476_v27 = vcombine.high %v1900_v54, %v1904_v25  ;;  %v5475_v11 = vcombine.low %v1900_v54, %v1904_v25 }
 0x5a6   : > { %2771 = vmatpush1.bf16.msra.mxu0 %v5559_v57  ;;  %v1908_v57 = vld [vmem:[%s7114_s26 + $0x58] sm:$0xff] }
 0x5a7   : > { %2772 = vmatprep.subr.bf16.mxu0 %v5568_v1  ;;  %v1912_v1 = vld [vmem:[%s7114_s26 + $0x78] sm:$0xff] }
 0x5a8   : > { %v5484_v62 = vcombine.high %v1908_v57, %v1912_v1  ;;  %v5483_v3 = vcombine.low %v1908_v57, %v1912_v1  ;;  %v1948_v1 = vld [vmem:[%s7114_s26 + $0x198] sm:$0xff] }
 0x5aa   : > { %2773 = vmatpush1.bf16.msra.mxu0 %v5567_v50  ;;  %v1916_v50 = vld [vmem:[%s7114_s26 + $0x98] sm:$0xff] }
 0x5ab   : > { %2774 = vmatprep.subr.bf16.mxu0 %v5576_v60  ;;  %v1920_v60 = vld [vmem:[%s7114_s26 + $0xb8] sm:$0xff] }
 0x5ac   : > { %v5492_v55 = vcombine.high %v1916_v50, %v1920_v60  ;;  %v5491_v12 = vcombine.low %v1916_v50, %v1920_v60  ;;  %v1956_v60 = vld [vmem:[%s7114_s26 + $0x1d8] sm:$0xff] }
 0x5ae   : > { %2775 = vmatpush1.bf16.msra.mxu0 %v5575_v48  ;;  %v1924_v48 = vld [vmem:[%s7114_s26 + $0xd8] sm:$0xff] }
 0x5af   : > { %2776 = vmatprep.subr.bf16.mxu0 %v5584_v7  ;;  %v1928_v7 = vld [vmem:[%s7114_s26 + $0xf8] sm:$0xff] }
 0x5b0   : > { %v5500_v10 = vcombine.high %v1924_v48, %v1928_v7  ;;  %v5499_v54 = vcombine.low %v1924_v48, %v1928_v7  ;;  %v1964_v7 = vld [vmem:[%s7114_s26 + $0x218] sm:$0xff] }
 0x5b2   : > { %2777 = vmatpush1.bf16.msra.mxu0 %v5583_v5  ;;  %v1932_v5 = vld [vmem:[%s7114_s26 + $0x118] sm:$0xff] }
 0x5b3   : > { %2778 = vmatprep.subr.bf16.mxu0 %v5592_v51  ;;  %v1936_v51 = vld [vmem:[%s7114_s26 + $0x138] sm:$0xff] }
 0x5b4   : > { %v5508_v25 = vcombine.high %v1932_v5, %v1936_v51 }
 0x5b6   : > { %2779 = vmatpush1.bf16.msra.mxu0 %v5591_v40  ;;  %v1944_v40 = vld [vmem:[%s7114_s26 + $0x178] sm:$0xff] }
 0x5b7   : > { %2830 = vmatprep.subr.bf16.mxu0 %v5476_v27  ;;  %v5507_v27 = vcombine.low %v1932_v5, %v1936_v51  ;;  %v1972_v51 = vld [vmem:[%s7114_s26 + $0x258] sm:$0xff] }
 0x5b9   : > { %2781 = vmatmul.mubr.bf16.vlgmr.msra.gmra.mrb[48].mxu0 %v7320_v36 }
 0x5ba   : > { %2831 = vmatpush1.bf16.msra.mxu0 %v5475_v11  ;;  %2862 = vmatprep.mubr.bf16.mxu0 %v7287_v45  ;;  %v1940_v45 = vld [vmem:[%s7114_s26 + $0x158] sm:$0xff] }
 0x5bb   : > { %2832 = vmatprep.subr.bf16.mxu0 %v5484_v62  ;;  %v5516_v57 = vcombine.high %v1940_v45, %v1944_v40  ;;  %v1952_v11 = vld [vmem:[%s7114_s26 + $0x1b8] sm:$0xff]  ;;  %v5515_v62 = vcombine.low %v1940_v45, %v1944_v40 }
 0x5bc   : > { %v5524_v50 = vcombine.high %v1948_v1, %v1952_v11  ;;  %v1980_v40 = vld [vmem:[%s7114_s26 + $0x298] sm:$0xff] }
 0x5be   : > { %2833 = vmatpush1.bf16.msra.mxu0 %v5483_v3  ;;  %v1960_v3 = vld [vmem:[%s7114_s26 + $0x1f8] sm:$0xff] }
 0x5bf   : > { %2834 = vmatprep.subr.bf16.mxu0 %v5492_v55  ;;  %v5523_v55 = vcombine.low %v1948_v1, %v1952_v11  ;;  %v5532_v48 = vcombine.high %v1956_v60, %v1960_v3  ;;  %v1988_v11 = vld [vmem:[%s7114_s26 + $0x2d8] sm:$0xff] }
 0x5c2   : > { %2835 = vmatpush1.bf16.msra.mxu0 %v5491_v12  ;;  %v1968_v12 = vld [vmem:[%s7114_s26 + $0x238] sm:$0xff] }
 0x5c3   : > { %2836 = vmatprep.subr.bf16.mxu0 %v5500_v10  ;;  %v5531_v10 = vcombine.low %v1956_v60, %v1960_v3  ;;  %v5540_v5 = vcombine.high %v1964_v7, %v1968_v12  ;;  %v1996_v3 = vld [vmem:[%s7114_s26 + $0x318] sm:$0xff] }
 0x5c6   : > { %2837 = vmatpush1.bf16.msra.mxu0 %v5499_v54  ;;  %v1976_v54 = vld [vmem:[%s7114_s26 + $0x278] sm:$0xff] }
 0x5c7   : > { %2838 = vmatprep.subr.bf16.mxu0 %v5508_v25  ;;  %v5539_v25 = vcombine.low %v1964_v7, %v1968_v12  ;;  %v5548_v45 = vcombine.high %v1972_v51, %v1976_v54  ;;  %v2004_v12 = vld [vmem:[%s7114_s26 + $0x358] sm:$0xff] }
 0x5ca   : > { %2839 = vmatpush1.bf16.msra.mxu0 %v5507_v27  ;;  %v1984_v27 = vld [vmem:[%s7114_s26 + $0x2b8] sm:$0xff] }
 0x5cb   : > { %2840 = vmatprep.subr.bf16.mxu0 %v5516_v57  ;;  %v5547_v57 = vcombine.low %v1972_v51, %v1976_v54  ;;  %v5556_v1 = vcombine.high %v1980_v40, %v1984_v27 }
 0x5ce   : > { %2841 = vmatpush1.bf16.msra.mxu0 %v5515_v62  ;;  %v1992_v62 = vld [vmem:[%s7114_s26 + $0x2f8] sm:$0xff] }
 0x5cf   : > { %2842 = vmatprep.subr.bf16.mxu0 %v5524_v50  ;;  %v5555_v50 = vcombine.low %v1980_v40, %v1984_v27  ;;  %v5564_v60 = vcombine.high %v1988_v11, %v1992_v62 }
 0x5d2   : > { %2843 = vmatpush1.bf16.msra.mxu0 %v5523_v55  ;;  %v2000_v55 = vld [vmem:[%s7114_s26 + $0x338] sm:$0xff] }
 0x5d3   : > { %2844 = vmatprep.subr.bf16.mxu0 %v5532_v48  ;;  %v5563_v48 = vcombine.low %v1988_v11, %v1992_v62  ;;  %v5572_v7 = vcombine.high %v1996_v3, %v2000_v55  ;;  %v5571_v51 = vcombine.low %v1996_v3, %v2000_v55  ;;  %v2024_v11 = vld [vmem:[%s7114_s26 + $0x3f8] sm:$0xff] }
 0x5d6   : > { %2845 = vmatpush1.bf16.msra.mxu0 %v5531_v10  ;;  %v2008_v10 = vld [vmem:[%s7114_s26 + $0x378] sm:$0xff] }
 0x5d7   : > { %2846 = vmatprep.subr.bf16.mxu0 %v5540_v5  ;;  %v5580_v54 = vcombine.high %v2004_v12, %v2008_v10  ;;  %v5579_v27 = vcombine.low %v2004_v12, %v2008_v10 }
 0x5da   : > { %2847 = vmatpush1.bf16.msra.mxu0 %v5539_v25  ;;  %v2012_v25 = vld [vmem:[%s7114_s26 + $0x398] sm:$0xff] }
 0x5db   : > { %2848 = vmatprep.subr.bf16.mxu0 %v5548_v45  ;;  %v2016_v45 = vld [vmem:[%s7114_s26 + $0x3b8] sm:$0xff] }
 0x5de   : > { %2849 = vmatpush1.bf16.msra.mxu0 %v5547_v57  ;;  %v5588_v57 = vcombine.high %v2012_v25, %v2016_v45 }
 0x5df   : > { %2850 = vmatprep.subr.bf16.mxu0 %v5556_v1  ;;  %v2020_v1 = vld [vmem:[%s7114_s26 + $0x3d8] sm:$0xff]  ;;  %s5697_s26 = sshll.u32 %s6694_s28, 8 }
 0x5e2   : > { %2851 = vmatpush1.bf16.msra.mxu0 %v5555_v50  ;;  %v5587_v50 = vcombine.low %v2012_v25, %v2016_v45 }
 0x5e3   : > { %2852 = vmatprep.subr.bf16.mxu0 %v5564_v60  ;;  %v5596_v60 = vcombine.high %v2020_v1, %v2024_v11 }
 0x5e6   : > { %2853 = vmatpush1.bf16.msra.mxu0 %v5563_v48  ;;  %v5595_v48 = vcombine.low %v2020_v1, %v2024_v11 }
 0x5e7   : > { %2854 = vmatprep.subr.bf16.mxu0 %v5572_v7 }
 0x5ea   : > { %2855 = vmatpush1.bf16.msra.mxu0 %v5571_v51 }
 0x5eb   : > { %2856 = vmatprep.subr.bf16.mxu0 %v5580_v54 }
 0x5ee   : > { %2857 = vmatpush1.bf16.msra.mxu0 %v5579_v27 }
 0x5ef   : > { %2858 = vmatprep.subr.bf16.mxu0 %v5588_v57 }
 0x5f2   : > { %2859 = vmatpush1.bf16.msra.mxu0 %v5587_v50 }
 0x5f3   : > { %v3315_v5 = vpop.permute.xlu1 %3314  ;;  %2860 = vmatprep.subr.bf16.mxu0 %v5596_v60 }
 0x5f4   : > { %v3318_v3 = vpop.permute.xlu0 %3317  ;;  %v3340_v12 = vrot.slane %v3315_v5, %v7500_v26 }
 0x5f5   : > { %v3344_v7 = vrot.slane %v3318_v3, %v7500_v26  ;;  %v7727_v3 = vpop.f32.mrb[16].mxu0 }
 0x5f6   : > { %2861 = vmatpush1.bf16.msra.mxu0 %v5595_v48 }
 0x5f7   : > { %v3321_v40 = vpop.permute.xlu1 %3320  ;;  %v3369_v45 = vsel %vm3221_vm1, %v3344_v7, %v3340_v12 }
 0x5f8   : > { %v3348_v10 = vrot.slane %v3321_v40, %v7500_v26 }
 0x5f9   : > { %2863 = vmatmul.mubr.bf16.vlgmr.msra.gmra.mrb[52].mxu0 %v7320_v36 }
 0x5fa   : > { %v3370_v57 = vsel %vm3223_vm2, %v3348_v10, %v3369_v45 }
 0x5fb   : > { %v3324_v62 = vpop.permute.xlu1 %3323 }
 0x5fc   : > { %v3352_v51 = vrot.slane %v3324_v62, %v7500_v26 }
 0x5fe   : > { %v3371_v11 = vsel %vm3225_vm3, %v3352_v51, %v3370_v57 }
 0x5ff   : > { %v3327_v47 = vpop.permute.xlu1 %3326 }
 0x600   : > { %v3356_v54 = vrot.slane %v3327_v47, %v7500_v26 }
 0x602   : > { %v3372_v5 = vsel %vm3227_vm4, %v3356_v54, %v3371_v11 }
 0x603   : > { %v3330_v55 = vpop.permute.xlu1 %3329 }
 0x604   : > { %v3360_v27 = vrot.slane %v3330_v55, %v7500_v26  ;;  %v7729_v55 = vpop.f32.mrb[17].mxu0 }
 0x605   : > { %v7731_v7 = vpop.f32.mrb[18].mxu0 }
 0x606   : > { %v3373_v62 = vsel %vm3229_vm5, %v3360_v27, %v3372_v5  ;;  %v7733_v12 = vpop.f32.mrb[19].mxu0 }
 0x607   : > { %v3333_v25 = vpop.permute.xlu1 %3332  ;;  %v7735_v10 = vpop.f32.mrb[20].mxu0 }
 0x608   : > { %v3364_v1 = vrot.slane %v3333_v25, %v7500_v26  ;;  %v7737_v51 = vpop.f32.mrb[21].mxu0 }
 0x609   : > { %v7739_v54 = vpop.f32.mrb[22].mxu0 }
 0x60a   : > { %v3374_v47 = vsel %vm3231_vm6, %v3364_v1, %v3373_v62  ;;  %v7741_v25 = vpop.f32.mrb[23].mxu0 }
 0x60b   : > { %v3336_v40 = vpop.permute.xlu1 %3335  ;;  %v7743_v45 = vpop.f32.mrb[24].mxu0 }
 0x60c   : > { %v3368_v50 = vrot.slane %v3336_v40, %v7500_v26  ;;  %8573 = vst [vmem:[#allocation82_spill] sm:$0xff] %v7743_v45  ;;  %v7745_v27 = vpop.f32.mrb[25].mxu0 }
 0x60d   : > { %8574 = vst [vmem:[#allocation83_spill] sm:$0xff] %v7745_v27  ;;  %v7747_v57 = vpop.f32.mrb[26].mxu0 }
 0x60e   : > { %v3375_v60 = vsel %vm3233_vm7, %v3368_v50, %v3374_v47  ;;  %8575 = vst [vmem:[#allocation84_spill] sm:$0xff] %v7747_v57  ;;  %v7749_v1 = vpop.f32.mrb[27].mxu0 }
 0x60f   : > { %v3377_v48 = vsel %vm3236_vm8, %v3375_v60, 0.0  ;;  %8576 = vst [vmem:[#allocation85_spill] sm:$0xff] %v7749_v1  ;;  %v7751_v11 = vpop.f32.mrb[28].mxu0 }
 0x610   : > { %3378 = vadd.xlane.f32.xlu1 %v3377_v48  ;;  %8577 = vst [vmem:[#allocation86_spill] sm:$0xff] %v7751_v11  ;;  %v7753_v5 = vpop.f32.mrb[29].mxu0 }
 0x611   : > { %8578 = vst [vmem:[#allocation87_spill] sm:$0xff] %v7753_v5  ;;  %v7755_v40 = vpop.f32.mrb[30].mxu0 }
 0x612   : > { %8579 = vst [vmem:[#allocation88_spill] sm:$0xff] %v7755_v40  ;;  %v7757_v62 = vpop.f32.mrb[31].mxu0 }
 0x613   : > { %8580 = vst [vmem:[#allocation89_spill] sm:$0xff] %v7757_v62 }
 0x64c   : > { %v7759_v50 = vpop.f32.mrb[32].mxu0 }
 0x64d   : > { %v7761_v47 = vpop.f32.mrb[33].mxu0 }
 0x64e   : > { %v7763_v60 = vpop.f32.mrb[34].mxu0 }
 0x64f   : > { %v7765_v48 = vpop.f32.mrb[35].mxu0 }
 0x654   : > { %v7767_v26 = vpop.f32.mrb[36].mxu0 }
 0x655   : > { %v7769_v36 = vpop.f32.mrb[37].mxu0 }
 0x656   : > { %v7771_v1 = vpop.f32.mrb[38].mxu0 }
 0x657   : > { %8581 = vst [vmem:[#allocation90_spill] sm:$0xff] %v7771_v1  ;;  %v7773_v11 = vpop.f32.mrb[39].mxu0 }
 0x658   : > { %8582 = vst [vmem:[#allocation91_spill] sm:$0xff] %v7773_v11 }
 0x65c   : > { %v7775_v5 = vpop.f32.mrb[40].mxu0 }
 0x65d   : > { %8583 = vst [vmem:[#allocation92_spill] sm:$0xff] %v7775_v5  ;;  %v7777_v40 = vpop.f32.mrb[41].mxu0 }
 0x65e   : > { %8584 = vst [vmem:[#allocation93_spill] sm:$0xff] %v7777_v40  ;;  %v7779_v62 = vpop.f32.mrb[42].mxu0 }
 0x65f   : > { %8585 = vst [vmem:[#allocation94_spill] sm:$0xff] %v7779_v62  ;;  %v7781_v57 = vpop.f32.mrb[43].mxu0 }
 0x660   : > { %8586 = vst [vmem:[#allocation95_spill] sm:$0xff] %v7781_v57 }
 0x664   : > { %v7783_v24 = vpop.f32.mrb[44].mxu0 }
 0x665   : > { %8587 = vst [vmem:[#allocation96_spill] sm:$0xff] %v7783_v24  ;;  %v7785_v23 = vpop.f32.mrb[45].mxu0 }
 0x666   : > { %8588 = vst [vmem:[#allocation97_spill] sm:$0xff] %v7785_v23  ;;  %v7787_v0 = vpop.f32.mrb[46].mxu0 }
 0x667   : > { %8589 = vst [vmem:[#allocation98_spill] sm:$0xff] %v7787_v0  ;;  %v7789_v41 = vpop.f32.mrb[47].mxu0 }
 0x668   : > { %8590 = vst [vmem:[#allocation99_spill] sm:$0xff] %v7789_v41 }
 0x68c   : > { %v7791_v27 = vpop.f32.mrb[48].mxu0 }
 0x68d   : > { %v7793_v1 = vpop.f32.mrb[49].mxu0 }
 0x68e   : > { %v2786_v11 = vpop.f32.mrb[50].mxu0 }
 0x68f   : > { %v2787_v5 = vpop.f32.mrb[51].mxu0 }
 0x69d   : > { %v3379_v45 = vpop.xlane.xlu1 %3378 }
 0x69e   : > { %v3384_v40 = vrot.slane %v3379_v45, %v7476_v63  ;;  %v3388_v62 = vrot.slane %v3379_v45, %v7434_v44  ;;  %v3392_v57 = vrot.slane %v3379_v45, %v7573_v52  ;;  %v3396_v23 = vrot.slane %v3379_v45, %v7576_v58 }
 0x69f   : > { %v3400_v41 = vrot.slane %v3379_v45, %v7586_v43  ;;  %v3404_v5 = vrot.slane %v3379_v45, %v7591_v9 }
 0x6a0   : > { %6038 = vrcp.f32 %v3384_v40 }
 0x6a1   : > { %6040 = vrcp.f32 %v3388_v62 }
 0x6a2   : > { %6042 = vrcp.f32 %v3392_v57  ;;  %v3408_v57 = vrot.slane %v3379_v45, %v7594_v37 }
 0x6a3   : > { %6044 = vrcp.f32 %v3396_v23  ;;  %v3412_v23 = vrot.slane %v3379_v45, %v7599_v53 }
 0x6a4   : > { %6046 = vrcp.f32 %v3400_v41 }
 0x6a5   : > { %6048 = vrcp.f32 %v3404_v5 }
 0x6a6   : > { %6050 = vrcp.f32 %v3408_v57 }
 0x6a7   : > { %6052 = vrcp.f32 %v3412_v23 }
 0x6aa   : > { %v6039_v0 = vpop.eup %6038 }
 0x6ab   : > { %v3422_v24 = vmul.f32 %v6039_v0, %v7603_v49  ;;  %v6041_v11 = vpop.eup %6040 }
 0x6ac   : > { %v3424_v22 = vmul.f32 %v6041_v11, %v7605_v2  ;;  %v6043_v40 = vpop.eup %6042 }
 0x6ad   : > { %3439 = vperm.xlu0 %5941, %v3422_v24   ;;  %v3426_v62 = vmul.f32 %v6043_v40, %v7611_v4  ;;  %v6045_v21 = vpop.eup %6044 }
 0x6ae   : > { %v3428_v0 = vmul.f32 %v6045_v21, %v7619_v8  ;;  %v6047_v24 = vpop.eup %6046  ;;  %v2025_v8 = vld [vmem:[%s7157_s20] sm:$0xff] }
 0x6af   : > { %v3430_v41 = vmul.f32 %v6047_v24, %v7624_v42  ;;  %v6049_v49 = vpop.eup %6048  ;;  %v2030_v5 = vrot.slane %v2025_v8, %v7476_v63  ;;  %v2034_v40 = vrot.slane %v2025_v8, %v7434_v44  ;;  %v2046_v42 = vrot.slane %v2025_v8, %v7586_v43 }
 0x6b0   : > { %v6051_v2 = vpop.eup %6050  ;;  %v2054_v43 = vrot.slane %v2025_v8, %v7594_v37 }
 0x6b1   : > { %3444 = vperm.xlu0 %5941, %v3424_v22   ;;  %v3432_v22 = vmul.f32 %v6049_v49, %v7629_v46  ;;  %v3434_v4 = vmul.f32 %v6051_v2, %v7635_v28  ;;  %v6053_v11 = vpop.eup %6052  ;;  %v7816_v57 = vadd.f32 %v7463_v59, %v2030_v5  ;;  %v7819_v46 = vadd.f32 %v7465_v61, %v2034_v40 }
 0x6b2   : > { %v3436_v45 = vmul.f32 %v6053_v11, %v7641_v6  ;;  %v2050_v28 = vrot.slane %v2025_v8, %v7591_v9  ;;  %v2038_v59 = vrot.slane %v2025_v8, %v7573_v52 }
 0x6b3   : > { %8591 = vst [vmem:[#allocation100_spill] sm:$0xff] %v7819_v46 }
 0x6b5   : > { %3449 = vperm.xlu0 %5941, %v3426_v62  }
 0x6b9   : > { %3454 = vperm.xlu0 %5941, %v3428_v0  }
 0x6bd   : > { %3459 = vperm.xlu0 %5941, %v3430_v41   ;;  %v7827_v41 = vadd.f32 %v7467_v56, %v2046_v42 }
 0x6c1   : > { %3464 = vperm.xlu0 %5941, %v3432_v22  }
 0x6c5   : > { %3469 = vperm.xlu0 %5941, %v3434_v4  }
 0x6c9   : > { %3474 = vperm.xlu0 %5941, %v3436_v45  }
 0x6cc   : > { %v2864_v21 = vpop.f32.mrb[52].mxu0 }
 0x6cd   : > { %v7834_v42 = vpop.f32.mrb[53].mxu0 }
 0x6ce   : > { %8592 = vst [vmem:[#allocation101_spill] sm:$0xff] %v7834_v42  ;;  %v2868_v52 = vpop.f32.mrb[54].mxu0 }
 0x72c   : > { %v3440_v62 = vpop.permute.xlu0 %3439 }
 0x72d   : > { %v3477_v6 = vmul.f32 %v3440_v62, %v7371_v13  ;;  %v3478_v23 = vmul.f32 %v3440_v62, %v7373_v14  ;;  %v3479_v0 = vmul.f32 %v3440_v62, %v7727_v3  ;;  %v3480_v24 = vmul.f32 %v3440_v62, %v7729_v55 }
 0x72e   : > { %v3481_v49 = vmul.f32 %v3440_v62, %v7403_v29  ;;  %v3482_v61 = vmul.f32 %v3440_v62, %v7405_v30  ;;  %v3483_v13 = vmul.f32 %v3440_v62, %v7759_v50  ;;  %v3484_v14 = vmul.f32 %v3440_v62, %v7761_v47  ;;  %v2869_v47 = vpop.f32.mrb[55].mxu0 }
 0x72f   : > { %v3541_v22 = vrot.slane %v3477_v6, 4  ;;  %v3547_v2 = vrot.slane %v3478_v23, 4  ;;  %v3553_v4 = vrot.slane %v3479_v0, 4  ;;  %v3559_v11 = vrot.slane %v3480_v24, 4 }
 0x730   : > { %v3565_v3 = vrot.slane %v3481_v49, 4  ;;  %v3571_v45 = vrot.slane %v3482_v61, 4  ;;  %v2042_v29 = vrot.slane %v2025_v8, %v7576_v58  ;;  %v7842_v8 = vadd.f32 %v7791_v27, %v2038_v59 }
 0x731   : > { %v3542_v55 = vadd.f32 %v3541_v22, %v3477_v6  ;;  %v3548_v5 = vadd.f32 %v3547_v2, %v3478_v23  ;;  %v3554_v56 = vadd.f32 %v3553_v4, %v3479_v0  ;;  %v3560_v40 = vadd.f32 %v3559_v11, %v3480_v24  ;;  %v3445_v0 = vpop.permute.xlu0 %3444 }
 0x732   : > { %v3566_v9 = vadd.f32 %v3565_v3, %v3481_v49  ;;  %v3572_v30 = vadd.f32 %v3571_v45, %v3482_v61  ;;  %v3577_v6 = vrot.slane %v3483_v13, 4  ;;  %v3583_v23 = vrot.slane %v3484_v14, 4 }
 0x733   : > { %v3543_v44 = vrot.slane %v3542_v55, 2  ;;  %v3549_v63 = vrot.slane %v3548_v5, 2  ;;  %v3555_v50 = vrot.slane %v3554_v56, 2  ;;  %v3561_v53 = vrot.slane %v3560_v40, 2 }
 0x734   : > { %v3567_v62 = vrot.slane %v3566_v9, 2  ;;  %v3573_v46 = vrot.slane %v3572_v30, 2  ;;  %v7839_v49 = vadd.f32 %v7469_v39, %v2050_v28  ;;  %v3485_v45 = vmul.f32 %v3445_v0, %v7375_v15 }
 0x735   : > { %v3544_v24 = vadd.f32 %v3543_v44, %v3542_v55  ;;  %v3550_v22 = vadd.f32 %v3549_v63, %v3548_v5  ;;  %v3556_v2 = vadd.f32 %v3555_v50, %v3554_v56  ;;  %v3562_v4 = vadd.f32 %v3561_v53, %v3560_v40  ;;  %v7859_v42 = vpop.permute.xlu0 %3449 }
 0x736   : > { %v3568_v52 = vadd.f32 %v3567_v62, %v3566_v9  ;;  %v3574_v61 = vadd.f32 %v3573_v46, %v3572_v30  ;;  %v3486_v47 = vmul.f32 %v3445_v0, %v7377_v16  ;;  %v7847_v37 = vadd.f32 %v7793_v1, %v2042_v29 }
 0x737   : > { %v3545_v11 = vrot.slane %v3544_v24, 1  ;;  %v3551_v3 = vrot.slane %v3550_v22, 1  ;;  %v3487_v44 = vmul.f32 %v3445_v0, %v7731_v7  ;;  %v3488_v63 = vmul.f32 %v3445_v0, %v7733_v12 }
 0x738   : > { %v7851_v39 = vadd.f32 %v2864_v21, %v2054_v43  ;;  %v3557_v53 = vrot.slane %v3556_v2, 1  ;;  %v3563_v27 = vrot.slane %v3562_v4, 1  ;;  %v7853_v28 = vadd.f32 %v3577_v6, %v3483_v13 }
 0x739   : > { %v7855_v9 = vadd.f32 %v3583_v23, %v3484_v14  ;;  %v3569_v46 = vrot.slane %v3568_v52, 1  ;;  %v3575_v59 = vrot.slane %v3574_v61, 1  ;;  %v3489_v15 = vmul.f32 %v3445_v0, %v7407_v31 }
 0x73a   : > { %8593 = vst [vmem:[#allocation102_spill] sm:$0xff] %v7851_v39  ;;  %v3490_v16 = vmul.f32 %v3445_v0, %v7409_v32  ;;  %v3546_v1 = vadd.f32 %v3545_v11, %v3544_v24  ;;  %v3552_v55 = vadd.f32 %v3551_v3, %v3550_v22  ;;  %v3589_v5 = vrot.slane %v3485_v45, 4 }
 0x73b   : > { %v3595_v7 = vrot.slane %v3486_v47, 4  ;;  %v3601_v56 = vrot.slane %v3487_v44, 4  ;;  %v3607_v12 = vrot.slane %v3488_v63, 4  ;;  %v3613_v43 = vrot.slane %v3489_v15, 4 }
 0x73c   : > { %v3619_v21 = vrot.slane %v3490_v16, 4  ;;  %v3558_v40 = vadd.f32 %v3557_v53, %v3556_v2  ;;  %v3564_v29 = vadd.f32 %v3563_v27, %v3562_v4  ;;  %v3590_v13 = vadd.f32 %v3589_v5, %v3485_v45 }
 0x73d   : > { %v3596_v30 = vadd.f32 %v3595_v7, %v3486_v47  ;;  %v3602_v14 = vadd.f32 %v3601_v56, %v3487_v44  ;;  %v3608_v50 = vadd.f32 %v3607_v12, %v3488_v63  ;;  %v3614_v62 = vadd.f32 %v3613_v43, %v3489_v15 }
 0x73e   : > { %v3620_v6 = vadd.f32 %v3619_v21, %v3490_v16  ;;  %v3570_v23 = vadd.f32 %v3569_v46, %v3568_v52  ;;  %v3576_v31 = vadd.f32 %v3575_v59, %v3574_v61  ;;  %v3591_v58 = vrot.slane %v3590_v13, 2 }
 0x73f   : > { %v3597_v32 = vrot.slane %v3596_v30, 2  ;;  %v3603_v24 = vrot.slane %v3602_v14, 2  ;;  %v3609_v22 = vrot.slane %v3608_v50, 2  ;;  %v3615_v11 = vrot.slane %v3614_v62, 2 }
 0x740   : > { %v3621_v3 = vrot.slane %v3620_v6, 2  ;;  %v3491_v39 = vmul.f32 %v3445_v0, %v7763_v60  ;;  %v3492_v2 = vmul.f32 %v3445_v0, %v7765_v48  ;;  %v3592_v4 = vadd.f32 %v3591_v58, %v3590_v13 }
 0x741   : > { %v3598_v45 = vadd.f32 %v3597_v32, %v3596_v30  ;;  %v3604_v47 = vadd.f32 %v3603_v24, %v3602_v14  ;;  %v3610_v44 = vadd.f32 %v3609_v22, %v3608_v50  ;;  %v3616_v63 = vadd.f32 %v3615_v11, %v3614_v62 }
 0x742   : > { %v3622_v53 = vadd.f32 %v3621_v3, %v3620_v6  ;;  %v3593_v52 = vrot.slane %v3592_v4, 1  ;;  %v3493_v27 = vmul.f32 %v7859_v42, %v7379_v17  ;;  %v3494_v46 = vmul.f32 %v7859_v42, %v7381_v18 }
 0x743   : > { %v3599_v61 = vrot.slane %v3598_v45, 1  ;;  %v3605_v59 = vrot.slane %v3604_v47, 1  ;;  %v3611_v15 = vrot.slane %v3610_v44, 1  ;;  %v3617_v16 = vrot.slane %v3616_v63, 1 }
 0x744   : > { %v3623_v60 = vrot.slane %v3622_v53, 1  ;;  %v3594_v5 = vadd.f32 %v3593_v52, %v3592_v4  ;;  %v3495_v58 = vmul.f32 %v7859_v42, %v7735_v10  ;;  %v3496_v0 = vmul.f32 %v7859_v42, %v7737_v51 }
 0x745   : > { %v3600_v48 = vadd.f32 %v3599_v61, %v3598_v45  ;;  %v3606_v7 = vadd.f32 %v3605_v59, %v3604_v47  ;;  %v3612_v56 = vadd.f32 %v3611_v15, %v3610_v44  ;;  %v3618_v12 = vadd.f32 %v3617_v16, %v3616_v63  ;;  %v7883_v45 = vpop.permute.xlu0 %3454 }
 0x746   : > { %v3624_v43 = vadd.f32 %v3623_v60, %v3622_v53  ;;  %v3989_v17 = vsel %vm3221_vm1, %v3594_v5, %v3546_v1  ;;  %v3497_v21 = vmul.f32 %v7859_v42, %v7411_v33  ;;  %v3498_v13 = vmul.f32 %v7859_v42, %v7413_v34 }
 0x747   : > { %v3996_v18 = vsel %vm3221_vm1, %v3600_v48, %v3552_v55  ;;  %v4003_v30 = vsel %vm3221_vm1, %v3606_v7, %v3558_v40  ;;  %v4010_v10 = vsel %vm3221_vm1, %v3612_v56, %v3564_v29  ;;  %v4017_v51 = vsel %vm3221_vm1, %v3618_v12, %v3570_v23 }
 0x748   : > { %v4024_v14 = vsel %vm3221_vm1, %v3624_v43, %v3576_v31  ;;  %v3625_v50 = vrot.slane %v3491_v39, 4  ;;  %v3631_v62 = vrot.slane %v3492_v2, 4  ;;  %v3637_v6 = vrot.slane %v3493_v27, 4 }
 0x749   : > { %v3643_v1 = vrot.slane %v3494_v46, 4  ;;  %v3649_v32 = vrot.slane %v3495_v58, 4  ;;  %v3655_v55 = vrot.slane %v3496_v0, 4  ;;  %v3661_v24 = vrot.slane %v3497_v21, 4 }
 0x74a   : > { %v3667_v22 = vrot.slane %v3498_v13, 4  ;;  %v3579_v33 = vrot.slane %v7853_v28, 2  ;;  %v3585_v34 = vrot.slane %v7855_v9, 2  ;;  %v3638_v11 = vadd.f32 %v3637_v6, %v3493_v27 }
 0x74b   : > { %v3644_v40 = vadd.f32 %v3643_v1, %v3494_v46  ;;  %v3650_v3 = vadd.f32 %v3649_v32, %v3495_v58  ;;  %v3656_v29 = vadd.f32 %v3655_v55, %v3496_v0  ;;  %v3662_v4 = vadd.f32 %v3661_v24, %v3497_v21 }
 0x74c   : > { %v3668_v23 = vadd.f32 %v3667_v22, %v3498_v13  ;;  %v7885_v31 = vadd.f32 %v3625_v50, %v3491_v39  ;;  %v7887_v47 = vadd.f32 %v3631_v62, %v3492_v2  ;;  %v3639_v44 = vrot.slane %v3638_v11, 2 }
 0x74d   : > { %v3645_v63 = vrot.slane %v3644_v40, 2  ;;  %v3651_v53 = vrot.slane %v3650_v3, 2  ;;  %v3657_v52 = vrot.slane %v3656_v29, 2  ;;  %v3663_v61 = vrot.slane %v3662_v4, 2 }
 0x74e   : > { %v3669_v59 = vrot.slane %v3668_v23, 2  ;;  %v3640_v15 = vadd.f32 %v3639_v44, %v3638_v11  ;;  %v3501_v27 = vmul.f32 %v7883_v45, %v7383_v19  ;;  %v3502_v46 = vmul.f32 %v7883_v45, %v7385_v20 }
 0x74f   : > { %v3646_v16 = vadd.f32 %v3645_v63, %v3644_v40  ;;  %v3652_v60 = vadd.f32 %v3651_v53, %v3650_v3  ;;  %v3658_v5 = vadd.f32 %v3657_v52, %v3656_v29  ;;  %v3664_v39 = vadd.f32 %v3663_v61, %v3662_v4  ;;  %v5982_v40 = vld [vmem:[%s7103_s4 + $0xc0] sm:$0xff]  }
 0x750   : > { %v3670_v48 = vadd.f32 %v3669_v59, %v3668_v23  ;;  %v3641_v2 = vrot.slane %v3640_v15, 1  ;;  %v3503_v0 = vmul.f32 %v7883_v45, %v7739_v54  ;;  %v3504_v7 = vmul.f32 %v7883_v45, %v7741_v25  ;;  %v5983_v4 = vld [vmem:[%s7103_s4 + $0x80] sm:$0xff]   ;;  %5729 = vmatprep.subr.bf16.mxu0 %v5982_v40 }
 0x751   : > { %v3647_v58 = vrot.slane %v3646_v16, 1  ;;  %v3653_v56 = vrot.slane %v3652_v60, 1  ;;  %v3659_v12 = vrot.slane %v3658_v5, 1  ;;  %v3665_v43 = vrot.slane %v3664_v39, 1  ;;  %5730 = vmatpush3.bf16.msra.mxu0 %v5983_v4 }
 0x752   : > { %v3671_v21 = vrot.slane %v3670_v48, 1  ;;  %v3642_v19 = vadd.f32 %v3641_v2, %v3640_v15  ;;  %v3505_v20 = vmul.f32 %v7883_v45, %v7415_v35  ;;  %v3506_v50 = vmul.f32 %v7883_v45, %v7417_v38 }
 0x753   : > { %v3648_v13 = vadd.f32 %v3647_v58, %v3646_v16  ;;  %v3654_v62 = vadd.f32 %v3653_v56, %v3652_v60  ;;  %v3660_v6 = vadd.f32 %v3659_v12, %v3658_v5  ;;  %v3666_v1 = vadd.f32 %v3665_v43, %v3664_v39  ;;  %v5985_v5 = vld [vmem:[%s7103_s4 + $0x88] sm:$0xff]  }
 0x754   : > { %v3672_v54 = vadd.f32 %v3671_v21, %v3670_v48  ;;  %v7903_v25 = vmul.f32 %v7859_v42, %v7767_v26  ;;  %v7907_v32 = vmul.f32 %v7859_v42, %v7769_v36  ;;  %v7910_v55 = vsel %vm3223_vm2, %v3642_v19, %v3989_v17  ;;  %v8594_v48 = vld [vmem:[#allocation48_spill] sm:$0xff]  ;;  %v8595_v58 = vld [vmem:[#allocation49_spill] sm:$0xff] }
 0x755   : > { %v7913_v35 = vsel %vm3223_vm2, %v3648_v13, %v3996_v18  ;;  %v7916_v38 = vsel %vm3223_vm2, %v3654_v62, %v4003_v30  ;;  %v7919_v24 = vsel %vm3223_vm2, %v3660_v6, %v4010_v10  ;;  %v7922_v26 = vsel %vm3223_vm2, %v3666_v1, %v4017_v51  ;;  %v8597_v62 = vld [vmem:[#allocation83_spill] sm:$0xff]  ;;  %v5987_v1 = vld [vmem:[%s7103_s4 + $0x90] sm:$0xff]  }
 0x756   : > { %v7925_v22 = vsel %vm3223_vm2, %v3672_v54, %v4024_v14  ;;  %v3685_v36 = vrot.slane %v3501_v27, 4  ;;  %v3691_v42 = vrot.slane %v3502_v46, 4  ;;  %v3697_v11 = vrot.slane %v3503_v0, 4  ;;  %v7931_v14 = vpop.permute.xlu0 %3459 }
 0x757   : > { %v3703_v17 = vrot.slane %v3504_v7, 4  ;;  %v3627_v18 = vrot.slane %v7885_v31, 2  ;;  %v3633_v3 = vrot.slane %v7887_v47, 2  ;;  %v3709_v30 = vrot.slane %v3505_v20, 4 }
 0x758   : > { %v3715_v29 = vrot.slane %v3506_v50, 4  ;;  %v3686_v10 = vadd.f32 %v3685_v36, %v3501_v27  ;;  %v3692_v51 = vadd.f32 %v3691_v42, %v3502_v46  ;;  %v3698_v23 = vadd.f32 %v3697_v11, %v3503_v0  ;;  %v5984_v27 = vld [vmem:[%s7103_s4 + $0xc8] sm:$0xff]  }
 0x759   : > { %v3704_v44 = vadd.f32 %v3703_v17, %v3504_v7  ;;  %v3673_v63 = vrot.slane %v7903_v25, 4  ;;  %v3679_v53 = vrot.slane %v7907_v32, 4  ;;  %v3710_v52 = vadd.f32 %v3709_v30, %v3505_v20  ;;  %v5986_v7 = vld [vmem:[%s7103_s4 + $0xd0] sm:$0xff]   ;;  %5731 = vmatprep.subr.bf16.mxu0 %v5984_v27  ;;  %v5988_v17 = vld [vmem:[%s7103_s4 + $0xd8] sm:$0xff]  }
 0x75a   : > { %v3716_v61 = vadd.f32 %v3715_v29, %v3506_v50  ;;  %v3687_v59 = vrot.slane %v3686_v10, 2  ;;  %v3693_v15 = vrot.slane %v3692_v51, 2  ;;  %v3699_v16 = vrot.slane %v3698_v23, 2  ;;  %v8596_v20 = vld [vmem:[#allocation82_spill] sm:$0xff]  ;;  %5732 = vmatpush3.bf16.msra.mxu0 %v5985_v5  ;;  %v8598_v29 = vld [vmem:[#allocation56_spill] sm:$0xff]  ;;  %v5989_v27 = vld [vmem:[%s7103_s4 + $0x98] sm:$0xff]  }
 0x75b   : > { %v3705_v60 = vrot.slane %v3704_v44, 2  ;;  %v3711_v46 = vrot.slane %v3710_v52, 2  ;;  %v3509_v2 = vmul.f32 %v7931_v14, %v8594_v48  ;;  %v3510_v0 = vmul.f32 %v7931_v14, %v8595_v58  ;;  %5733 = vmatprep.subr.bf16.mxu0 %v5986_v7  ;;  %v7965_v58 = vpop.permute.xlu0 %3464  ;;  %v5990_v7 = vld [vmem:[%s7103_s4 + $0xe0] sm:$0xff]  }
 0x75c   : > { %v3717_v39 = vrot.slane %v3716_v61, 2  ;;  %v3688_v56 = vadd.f32 %v3687_v59, %v3686_v10  ;;  %v3694_v12 = vadd.f32 %v3693_v15, %v3692_v51  ;;  %v3700_v43 = vadd.f32 %v3699_v16, %v3698_v23  ;;  %v8599_v10 = vld [vmem:[#allocation57_spill] sm:$0xff] }
 0x75d   : > { %v3706_v21 = vadd.f32 %v3705_v60, %v3704_v44  ;;  %v3712_v19 = vadd.f32 %v3711_v46, %v3710_v52  ;;  %v3511_v50 = vmul.f32 %v7931_v14, %v8596_v20  ;;  %v3512_v6 = vmul.f32 %v7931_v14, %v8597_v62  ;;  %v8600_v20 = vld [vmem:[#allocation50_spill] sm:$0xff] }
 0x75e   : > { %v3718_v13 = vadd.f32 %v3717_v39, %v3716_v61  ;;  %v3689_v54 = vrot.slane %v3688_v56, 1  ;;  %v3695_v36 = vrot.slane %v3694_v12, 1  ;;  %v3701_v42 = vrot.slane %v3700_v43, 1  ;;  %5734 = vmatpush3.bf16.msra.mxu0 %v5987_v1  ;;  %v8601_v1 = vld [vmem:[#allocation51_spill] sm:$0xff] }
 0x75f   : > { %v3707_v11 = vrot.slane %v3706_v21, 1  ;;  %v3713_v40 = vrot.slane %v3712_v19, 1  ;;  %v3513_v4 = vmul.f32 %v7931_v14, %v8598_v29  ;;  %v3514_v51 = vmul.f32 %v7931_v14, %v8599_v10  ;;  %5735 = vmatprep.subr.bf16.mxu0 %v5988_v17  ;;  %v8603_v29 = vld [vmem:[#allocation85_spill] sm:$0xff] }
 0x760   : > { %v3719_v30 = vrot.slane %v3718_v13, 1  ;;  %v3690_v23 = vadd.f32 %v3689_v54, %v3688_v56  ;;  %v3696_v44 = vadd.f32 %v3695_v36, %v3694_v12  ;;  %v3702_v52 = vadd.f32 %v3701_v42, %v3700_v43  ;;  %v5991_v54 = vld [vmem:[%s7103_s4 + $0xa0] sm:$0xff]  }
 0x761   : > { %v3708_v61 = vadd.f32 %v3707_v11, %v3706_v21  ;;  %v3714_v59 = vadd.f32 %v3713_v40, %v3712_v19  ;;  %v3733_v16 = vrot.slane %v3509_v2, 4  ;;  %v3739_v60 = vrot.slane %v3510_v0, 4  ;;  %v8602_v40 = vld [vmem:[#allocation84_spill] sm:$0xff] }
 0x762   : > { %v3720_v15 = vadd.f32 %v3719_v30, %v3718_v13  ;;  %v3991_v5 = vsel %vm3225_vm3, %v3690_v23, %v7910_v55  ;;  %v3998_v46 = vsel %vm3225_vm3, %v3696_v44, %v7913_v35  ;;  %v7959_v39 = vsel %vm3225_vm3, %v3702_v52, %v7916_v38  ;;  %5736 = vmatpush3.bf16.msra.mxu0 %v5989_v27 }
 0x763   : > { %v7963_v48 = vsel %vm3225_vm3, %v3708_v61, %v7919_v24  ;;  %v7970_v56 = vsel %vm3225_vm3, %v3714_v59, %v7922_v26  ;;  %v3734_v35 = vadd.f32 %v3733_v16, %v3509_v2  ;;  %v3740_v38 = vadd.f32 %v3739_v60, %v3510_v0  ;;  %5737 = vmatprep.subr.bf16.mxu0 %v5990_v7  ;;  %v5992_v0 = vld [vmem:[%s7103_s4 + $0xe8] sm:$0xff]   ;;  %v8605_v59 = vld [vmem:[#allocation60_spill] sm:$0xff] }
 0x764   : > { %v7974_v55 = vsel %vm3225_vm3, %v3720_v15, %v7925_v22  ;;  %v3745_v12 = vrot.slane %v3511_v50, 4  ;;  %v3751_v43 = vrot.slane %v3512_v6, 4  ;;  %v3757_v24 = vrot.slane %v3513_v4, 4  ;;  %v5993_v16 = vld [vmem:[%s7103_s4 + $0xa8] sm:$0xff]  }
 0x765   : > { %v3763_v21 = vrot.slane %v3514_v51, 4  ;;  %v3735_v19 = vrot.slane %v3734_v35, 2  ;;  %v3741_v13 = vrot.slane %v3740_v38, 2  ;;  %v3517_v62 = vmul.f32 %v7965_v58, %v8600_v20 }
 0x766   : > { %v3518_v26 = vmul.f32 %v7965_v58, %v8601_v1  ;;  %v3746_v36 = vadd.f32 %v3745_v12, %v3511_v50  ;;  %v3752_v22 = vadd.f32 %v3751_v43, %v3512_v6  ;;  %v3758_v42 = vadd.f32 %v3757_v24, %v3513_v4  ;;  %v8604_v4 = vld [vmem:[#allocation58_spill] sm:$0xff]  ;;  %5738 = vmatpush3.bf16.msra.mxu0 %v5991_v54 }
 0x767   : > { %v3764_v2 = vadd.f32 %v3763_v21, %v3514_v51  ;;  %v3736_v11 = vadd.f32 %v3735_v19, %v3734_v35  ;;  %v3742_v17 = vadd.f32 %v3741_v13, %v3740_v38  ;;  %v3519_v30 = vmul.f32 %v7965_v58, %v8602_v40  ;;  %5739 = vmatprep.subr.bf16.mxu0 %v5992_v0  ;;  %v5994_v38 = vld [vmem:[%s7103_s4 + $0xf0] sm:$0xff]  }
 0x768   : > { %v3520_v10 = vmul.f32 %v7965_v58, %v8603_v29  ;;  %v3747_v23 = vrot.slane %v3746_v36, 2  ;;  %v3753_v44 = vrot.slane %v3752_v22, 2  ;;  %v3759_v52 = vrot.slane %v3758_v42, 2 }
 0x769   : > { %v3765_v61 = vrot.slane %v3764_v2, 2  ;;  %v3737_v50 = vrot.slane %v3736_v11, 1  ;;  %v3743_v6 = vrot.slane %v3742_v17, 1  ;;  %v3521_v51 = vmul.f32 %v7965_v58, %v8604_v4 }
 0x76a   : > { %v3522_v15 = vmul.f32 %v7965_v58, %v8605_v59  ;;  %v3748_v60 = vadd.f32 %v3747_v23, %v3746_v36  ;;  %v3754_v27 = vadd.f32 %v3753_v44, %v3752_v22  ;;  %v3760_v7 = vadd.f32 %v3759_v52, %v3758_v42  ;;  %5740 = vmatpush3.bf16.msra.mxu0 %v5993_v16  ;;  %v5995_v42 = vld [vmem:[%s7103_s4 + $0xb0] sm:$0xff]  }
 0x76b   : > { %v3766_v35 = vadd.f32 %v3765_v61, %v3764_v2  ;;  %v3738_v12 = vadd.f32 %v3737_v50, %v3736_v11  ;;  %v3744_v43 = vadd.f32 %v3743_v6, %v3742_v17  ;;  %v3781_v24 = vrot.slane %v3517_v62, 4  ;;  %5741 = vmatprep.subr.bf16.mxu0 %v5994_v38  ;;  %v5996_v17 = vld [vmem:[%s7103_s4 + $0xf8] sm:$0xff]   ;;  %v7996_v50 = vpop.permute.xlu0 %3469  ;;  %v8607_v38 = vld [vmem:[#allocation53_spill] sm:$0xff] }
 0x76c   : > { %v3787_v21 = vrot.slane %v3518_v26, 4  ;;  %v3749_v19 = vrot.slane %v3748_v60, 1  ;;  %v3755_v13 = vrot.slane %v3754_v27, 1  ;;  %v3761_v20 = vrot.slane %v3760_v7, 1 }
 0x76d   : > { %v3767_v1 = vrot.slane %v3766_v35, 1  ;;  %v3992_v40 = vsel %vm3227_vm4, %v3738_v12, %v3991_v5  ;;  %v3999_v54 = vsel %vm3227_vm4, %v3744_v43, %v3998_v46  ;;  %v3782_v36 = vadd.f32 %v3781_v24, %v3517_v62 }
 0x76e   : > { %v3788_v22 = vadd.f32 %v3787_v21, %v3518_v26  ;;  %v3750_v2 = vadd.f32 %v3749_v19, %v3748_v60  ;;  %v3756_v0 = vadd.f32 %v3755_v13, %v3754_v27  ;;  %v3762_v29 = vadd.f32 %v3761_v20, %v3760_v7  ;;  %5742 = vmatpush3.bf16.msra.mxu0 %v5995_v42  ;;  %v5997_v60 = vld [vmem:[%s7103_s4 + $0xb8] sm:$0xff]   ;;  %v8608_v19 = vld [vmem:[#allocation86_spill] sm:$0xff] }
 0x76f   : > { %v3768_v11 = vadd.f32 %v3767_v1, %v3766_v35  ;;  %v3783_v23 = vrot.slane %v3782_v36, 2  ;;  %v3793_v52 = vrot.slane %v3519_v30, 4  ;;  %v3799_v61 = vrot.slane %v3520_v10, 4  ;;  %v8606_v35 = vld [vmem:[#allocation52_spill] sm:$0xff]  ;;  %5743 = vmatprep.subr.bf16.mxu0 %v5996_v17 }
 0x770   : > { %v3789_v44 = vrot.slane %v3788_v22, 2  ;;  %v4006_v5 = vsel %vm3227_vm4, %v3750_v2, %v7959_v39  ;;  %v4013_v46 = vsel %vm3227_vm4, %v3756_v0, %v7963_v48  ;;  %v4020_v62 = vsel %vm3227_vm4, %v3762_v29, %v7970_v56  ;;  %v8610_v0 = vld [vmem:[#allocation61_spill] sm:$0xff] }
 0x771   : > { %v4027_v26 = vsel %vm3227_vm4, %v3768_v11, %v7974_v55  ;;  %v3784_v6 = vadd.f32 %v3783_v23, %v3782_v36  ;;  %v3794_v59 = vadd.f32 %v3793_v52, %v3519_v30  ;;  %v3800_v16 = vadd.f32 %v3799_v61, %v3520_v10  ;;  %v8609_v10 = vld [vmem:[#allocation87_spill] sm:$0xff] }
 0x772   : > { %v3790_v4 = vadd.f32 %v3789_v44, %v3788_v22  ;;  %v3805_v27 = vrot.slane %v3521_v51, 4  ;;  %v3811_v7 = vrot.slane %v3522_v15, 4  ;;  %v3525_v39 = vmul.f32 %v7996_v50, %v8606_v35  ;;  %5744 = vmatpush3.bf16.msra.mxu0 %v5997_v60  ;;  %v8611_v11 = vld [vmem:[#allocation63_spill] sm:$0xff] }
 0x773   : > { %v3526_v48 = vmul.f32 %v7996_v50, %v8607_v38  ;;  %v3785_v12 = vrot.slane %v3784_v6, 1  ;;  %v3795_v43 = vrot.slane %v3794_v59, 2  ;;  %v3801_v24 = vrot.slane %v3800_v16, 2 }
 0x774   : > { %v3791_v56 = vrot.slane %v3790_v4, 1  ;;  %v3806_v55 = vadd.f32 %v3805_v27, %v3521_v51  ;;  %v3812_v21 = vadd.f32 %v3811_v7, %v3522_v15  ;;  %v3527_v30 = vmul.f32 %v7996_v50, %v8608_v19 }
 0x775   : > { %v3528_v13 = vmul.f32 %v7996_v50, %v8609_v10  ;;  %v3786_v20 = vadd.f32 %v3785_v12, %v3784_v6  ;;  %v3796_v36 = vadd.f32 %v3795_v43, %v3794_v59  ;;  %v3802_v22 = vadd.f32 %v3801_v24, %v3800_v16 }
 0x776   : > { %v3792_v1 = vadd.f32 %v3791_v56, %v3790_v4  ;;  %v3807_v42 = vrot.slane %v3806_v55, 2  ;;  %v3813_v2 = vrot.slane %v3812_v21, 2  ;;  %v3529_v29 = vmul.f32 %v7996_v50, %v8610_v0 }
 0x777   : > { %v3530_v51 = vmul.f32 %v7996_v50, %v8611_v11  ;;  %v3797_v15 = vrot.slane %v3796_v36, 1  ;;  %v3803_v17 = vrot.slane %v3802_v22, 1  ;;  %v3993_v23 = vsel %vm3229_vm5, %v3786_v20, %v3992_v40 }
 0x778   : > { %v4000_v44 = vsel %vm3229_vm5, %v3792_v1, %v3999_v54  ;;  %v3808_v52 = vadd.f32 %v3807_v42, %v3806_v55  ;;  %v3814_v61 = vadd.f32 %v3813_v2, %v3812_v21  ;;  %v3829_v6 = vrot.slane %v3525_v39, 4 }
 0x779   : > { %v3835_v4 = vrot.slane %v3526_v48, 4  ;;  %v3798_v59 = vadd.f32 %v3797_v15, %v3796_v36  ;;  %v3804_v16 = vadd.f32 %v3803_v17, %v3802_v22  ;;  %v3841_v60 = vrot.slane %v3527_v30, 4  ;;  %v8023_v22 = vpop.permute.xlu0 %3474  ;;  %v8612_v15 = vld [vmem:[#allocation54_spill] sm:$0xff] }
 0x77a   : > { %v3847_v27 = vrot.slane %v3528_v13, 4  ;;  %v3809_v7 = vrot.slane %v3808_v52, 1  ;;  %v3815_v35 = vrot.slane %v3814_v61, 1  ;;  %v3830_v38 = vadd.f32 %v3829_v6, %v3525_v39 }
 0x77b   : > { %v3836_v12 = vadd.f32 %v3835_v4, %v3526_v48  ;;  %v4007_v56 = vsel %vm3229_vm5, %v3798_v59, %v4006_v5  ;;  %v4014_v43 = vsel %vm3229_vm5, %v3804_v16, %v4013_v46  ;;  %v3842_v24 = vadd.f32 %v3841_v60, %v3527_v30  ;;  %v8614_v60 = vld [vmem:[#allocation88_spill] sm:$0xff] }
 0x77c   : > { %v3848_v40 = vadd.f32 %v3847_v27, %v3528_v13  ;;  %v3810_v19 = vadd.f32 %v3809_v7, %v3808_v52  ;;  %v3816_v54 = vadd.f32 %v3815_v35, %v3814_v61  ;;  %v3831_v55 = vrot.slane %v3830_v38, 2  ;;  %v8613_v52 = vld [vmem:[#allocation55_spill] sm:$0xff]  ;;  %v8615_v7 = vld [vmem:[#allocation89_spill] sm:$0xff] }
 0x77d   : > { %v3837_v21 = vrot.slane %v3836_v12, 2  ;;  %v3843_v10 = vrot.slane %v3842_v24, 2  ;;  %v3853_v1 = vrot.slane %v3529_v29, 4  ;;  %v3859_v36 = vrot.slane %v3530_v51, 4 }
 0x77e   : > { %v3849_v20 = vrot.slane %v3848_v40, 2  ;;  %v4021_v42 = vsel %vm3229_vm5, %v3810_v19, %v4020_v62  ;;  %v4028_v39 = vsel %vm3229_vm5, %v3816_v54, %v4027_v26  ;;  %v3832_v48 = vadd.f32 %v3831_v55, %v3830_v38  ;;  %v8616_v19 = vld [vmem:[#allocation64_spill] sm:$0xff]  ;;  %v8617_v55 = vld [vmem:[#allocation66_spill] sm:$0xff] }
 0x77f   : > { %v3838_v5 = vadd.f32 %v3837_v21, %v3836_v12  ;;  %v3844_v2 = vadd.f32 %v3843_v10, %v3842_v24  ;;  %v3854_v30 = vadd.f32 %v3853_v1, %v3529_v29  ;;  %v3860_v13 = vadd.f32 %v3859_v36, %v3530_v51 }
 0x780   : > { %v3850_v46 = vadd.f32 %v3849_v20, %v3848_v40  ;;  %v3833_v0 = vrot.slane %v3832_v48, 1  ;;  %v3533_v17 = vmul.f32 %v8023_v22, %v8612_v15  ;;  %v3534_v61 = vmul.f32 %v8023_v22, %v8613_v52 }
 0x781   : > { %v3839_v11 = vrot.slane %v3838_v5, 1  ;;  %v3845_v6 = vrot.slane %v3844_v2, 1  ;;  %v3855_v59 = vrot.slane %v3854_v30, 2  ;;  %v3861_v62 = vrot.slane %v3860_v13, 2 }
 0x782   : > { %v3851_v4 = vrot.slane %v3850_v46, 1  ;;  %v3834_v16 = vadd.f32 %v3833_v0, %v3832_v48  ;;  %v3535_v27 = vmul.f32 %v8023_v22, %v8614_v60  ;;  %v3536_v29 = vmul.f32 %v8023_v22, %v8615_v7  ;;  %v8618_v0 = vld [vmem:[#allocation90_spill] sm:$0xff] }
 0x783   : > { %v3840_v26 = vadd.f32 %v3839_v11, %v3838_v5  ;;  %v3846_v51 = vadd.f32 %v3845_v6, %v3844_v2  ;;  %v3856_v38 = vadd.f32 %v3855_v59, %v3854_v30  ;;  %v3862_v12 = vadd.f32 %v3861_v62, %v3860_v13 }
 0x784   : > { %v3852_v35 = vadd.f32 %v3851_v4, %v3850_v46  ;;  %v8036_v24 = vsel %vm3231_vm6, %v3834_v16, %v3993_v23  ;;  %v3537_v54 = vmul.f32 %v8023_v22, %v8616_v19  ;;  %v3538_v21 = vmul.f32 %v8023_v22, %v8617_v55 }
 0x785   : > { %v8039_v40 = vsel %vm3231_vm6, %v3840_v26, %v4000_v44  ;;  %v3857_v10 = vrot.slane %v3856_v38, 1  ;;  %v3863_v20 = vrot.slane %v3862_v12, 1  ;;  %v4008_v1 = vsel %vm3231_vm6, %v3846_v51, %v4007_v56 }
 0x786   : > { %v4015_v36 = vsel %vm3231_vm6, %v3852_v35, %v4014_v43  ;;  %v3877_v48 = vrot.slane %v3533_v17, 4  ;;  %v3883_v5 = vrot.slane %v3534_v61, 4  ;;  %v3889_v2 = vrot.slane %v3535_v27, 4 }
 0x787   : > { %v3895_v23 = vrot.slane %v3536_v29, 4  ;;  %v3858_v46 = vadd.f32 %v3857_v10, %v3856_v38  ;;  %v3864_v30 = vadd.f32 %v3863_v20, %v3862_v12  ;;  %v3901_v44 = vrot.slane %v3537_v54, 4  ;;  %v8619_v38 = vld [vmem:[#allocation92_spill] sm:$0xff] }
 0x788   : > { %v3907_v13 = vrot.slane %v3538_v21, 4  ;;  %v3507_v11 = vmul.f32 %v7883_v45, %v8618_v0  ;;  %v3878_v15 = vadd.f32 %v3877_v48, %v3533_v17  ;;  %v3890_v52 = vadd.f32 %v3889_v2, %v3535_v27  ;;  %v8621_v20 = vld [vmem:[#allocation96_spill] sm:$0xff] }
 0x789   : > { %v3896_v6 = vadd.f32 %v3895_v23, %v3536_v29  ;;  %v4022_v4 = vsel %vm3231_vm6, %v3858_v46, %v4021_v42  ;;  %v4029_v56 = vsel %vm3231_vm6, %v3864_v30, %v4028_v39  ;;  %v3902_v59 = vadd.f32 %v3901_v44, %v3537_v54  ;;  %v8622_v30 = vld [vmem:[#allocation98_spill] sm:$0xff] }
 0x78a   : > { %v3908_v43 = vadd.f32 %v3907_v13, %v3538_v21  ;;  %v3879_v62 = vrot.slane %v3878_v15, 2  ;;  %v3884_v16 = vadd.f32 %v3883_v5, %v3534_v61  ;;  %v3891_v26 = vrot.slane %v3890_v52, 2 }
 0x78b   : > { %v3897_v60 = vrot.slane %v3896_v6, 2  ;;  %v3674_v7 = vadd.f32 %v3673_v63, %v7903_v25  ;;  %v8057_v17 = vadd.f32 %v3679_v53, %v7907_v32  ;;  %v3903_v27 = vrot.slane %v3902_v59, 2  ;;  %v8620_v32 = vld [vmem:[#allocation94_spill] sm:$0xff] }
 0x78c   : > { %v3909_v29 = vrot.slane %v3908_v43, 2  ;;  %v3721_v42 = vrot.slane %v3507_v11, 4  ;;  %v3880_v51 = vadd.f32 %v3879_v62, %v3878_v15  ;;  %v3892_v39 = vadd.f32 %v3891_v26, %v3890_v52 }
 0x78d   : > { %v3898_v35 = vadd.f32 %v3897_v60, %v3896_v6  ;;  %v3515_v61 = vmul.f32 %v7931_v14, %v8619_v38  ;;  %v3904_v12 = vadd.f32 %v3903_v27, %v3902_v59  ;;  %v3580_v25 = vadd.f32 %v3579_v33, %v7853_v28 }
 0x78e   : > { %v3910_v19 = vadd.f32 %v3909_v29, %v3908_v43  ;;  %v3885_v63 = vrot.slane %v3884_v16, 2  ;;  %v3893_v54 = vrot.slane %v3892_v39, 1  ;;  %v3523_v53 = vmul.f32 %v7965_v58, %v8620_v32  ;;  %v8623_v29 = vld [vmem:[#allocation91_spill] sm:$0xff] }
 0x78f   : > { %v3899_v55 = vrot.slane %v3898_v35, 1  ;;  %v3905_v21 = vrot.slane %v3904_v12, 1  ;;  %v3531_v48 = vmul.f32 %v7996_v50, %v8621_v20  ;;  %v3628_v5 = vadd.f32 %v3627_v18, %v7885_v31 }
 0x790   : > { %v3911_v10 = vrot.slane %v3910_v19, 1  ;;  %v3881_v2 = vrot.slane %v3880_v51, 1  ;;  %v3894_v23 = vadd.f32 %v3893_v54, %v3892_v39  ;;  %v3539_v28 = vmul.f32 %v8023_v22, %v8622_v30 }
 0x791   : > { %v3900_v46 = vadd.f32 %v3899_v55, %v3898_v35  ;;  %v3906_v33 = vadd.f32 %v3905_v21, %v3904_v12  ;;  %v3581_v13 = vrot.slane %v3580_v25, 1  ;;  %v3629_v0 = vrot.slane %v3628_v5, 1 }
 0x792   : > { %v3912_v44 = vadd.f32 %v3911_v10, %v3910_v19  ;;  %v4009_v15 = vsel %vm3233_vm7, %v3894_v23, %v4008_v1  ;;  %v3675_v6 = vrot.slane %v3674_v7, 2  ;;  %v3722_v59 = vadd.f32 %v3721_v42, %v3507_v11 }
 0x793   : > { %v4016_v52 = vsel %vm3233_vm7, %v3900_v46, %v4015_v36  ;;  %v4023_v43 = vsel %vm3233_vm7, %v3906_v33, %v4022_v4  ;;  %v4055_v18 = vadd.f32 %v4009_v15, %v7842_v8  ;;  %v3882_v26 = vadd.f32 %v3881_v2, %v3880_v51  ;;  %v8624_v33 = vld [vmem:[#allocation93_spill] sm:$0xff] }
 0x794   : > { %v4030_v31 = vsel %vm3233_vm7, %v3912_v44, %v4029_v56  ;;  %v8079_v62 = vadd.f32 %v4016_v52, %v7847_v37  ;;  %v4057_v60 = vadd.f32 %v4023_v43, %v7827_v41  ;;  %v3676_v1 = vadd.f32 %v3675_v6, %v3674_v7  ;;  %v8625_v43 = vld [vmem:[#allocation95_spill] sm:$0xff] }
 0x795   : > { %v8083_v27 = vadd.f32 %v4030_v31, %v7839_v49  ;;  %v3508_v36 = vmul.f32 %v7883_v45, %v8623_v29  ;;  %v3886_v11 = vadd.f32 %v3885_v63, %v3884_v16  ;;  %v3723_v42 = vrot.slane %v3722_v59, 2 }
 0x796   : > { %v3769_v4 = vrot.slane %v3515_v61, 4  ;;  %v3582_v39 = vadd.f32 %v3581_v13, %v3580_v25  ;;  %v3630_v56 = vadd.f32 %v3629_v0, %v3628_v5  ;;  %v3677_v35 = vrot.slane %v3676_v1, 1 }
 0x797   : > { %v3817_v8 = vrot.slane %v3523_v53, 4  ;;  %v3724_v38 = vadd.f32 %v3723_v42, %v3722_v59  ;;  %v3865_v12 = vrot.slane %v3531_v48, 4  ;;  %v3913_v51 = vrot.slane %v3539_v28, 4 }
 0x798   : > { %v3770_v37 = vadd.f32 %v3769_v4, %v3515_v61  ;;  %v5617_v19 = vmul.f32 -1.442695, %v4055_v18  ;;  %v3678_v41 = vadd.f32 %v3677_v35, %v3676_v1  ;;  %v3995_v49 = vsel %vm3233_vm7, %v3882_v26, %v8036_v24 }
 0x799   : > { %v3818_v54 = vadd.f32 %v3817_v8, %v3523_v53  ;;  %v3887_v7 = vrot.slane %v3886_v11, 1  ;;  %v3725_v55 = vrot.slane %v3724_v38, 1  ;;  %v3866_v16 = vadd.f32 %v3865_v12, %v3531_v48 }
 0x79a   : > { %v3771_v45 = vrot.slane %v3770_v37, 2  ;;  %v3914_v32 = vadd.f32 %v3913_v51, %v3539_v28  ;;  %v4031_v25 = vsel %vm3221_vm1, %v3630_v56, %v3582_v39  ;;  %v4053_v21 = vadd.f32 %v3995_v49, %v7816_v57  ;;  %v8626_v39 = vld [vmem:[#allocation97_spill] sm:$0xff] }
 0x79b   : > { %v3819_v63 = vrot.slane %v3818_v54, 2  ;;  %v3726_v10 = vadd.f32 %v3725_v55, %v3724_v38  ;;  %v3867_v20 = vrot.slane %v3866_v16, 2  ;;  %v4032_v5 = vsel %vm3223_vm2, %v3678_v41, %v4031_v25 }
 0x79c   : > { %v3772_v61 = vadd.f32 %v3771_v45, %v3770_v37  ;;  %v3915_v53 = vrot.slane %v3914_v32, 2  ;;  %v5615_v23 = vmul.f32 -1.442695, %v4053_v21  ;;  %6054 = vpow2.f32 %v5617_v19  ;;  %v8628_v37 = vld [vmem:[#allocation102_spill] sm:$0xff] }
 0x79d   : > { %v3820_v2 = vadd.f32 %v3819_v63, %v3818_v54  ;;  %v3727_v24 = vrot.slane %v3508_v36, 4  ;;  %v3868_v30 = vadd.f32 %v3867_v20, %v3866_v16  ;;  %v4033_v48 = vsel %vm3225_vm3, %v3726_v10, %v4032_v5 }
 0x79e   : > { %v3773_v46 = vrot.slane %v3772_v61, 1  ;;  %v3516_v28 = vmul.f32 %v7931_v14, %v8624_v33  ;;  %v3916_v13 = vadd.f32 %v3915_v53, %v3914_v32  ;;  %6056 = vpow2.f32 %v5615_v23  ;;  %v8629_v23 = vld [vmem:[#allocation100_spill] sm:$0xff] }
 0x79f   : > { %v3821_v44 = vrot.slane %v3820_v2, 1  ;;  %v3888_v57 = vadd.f32 %v3887_v7, %v3886_v11  ;;  %v5619_v0 = vmul.f32 -1.442695, %v4057_v60  ;;  %v3869_v52 = vrot.slane %v3868_v30, 1 }
 0x7a0   : > { %v3774_v15 = vadd.f32 %v3773_v46, %v3772_v61  ;;  %v3917_v59 = vrot.slane %v3916_v13, 1  ;;  %v3524_v31 = vmul.f32 %v7965_v58, %v8625_v43  ;;  %v3586_v18 = vadd.f32 %v3585_v34, %v7855_v9 }
 0x7a1   : > { %v3822_v6 = vadd.f32 %v3821_v44, %v3820_v2  ;;  %v3870_v26 = vadd.f32 %v3869_v52, %v3868_v30  ;;  %v3634_v14 = vadd.f32 %v3633_v3, %v7887_v47  ;;  %v3681_v60 = vrot.slane %v8057_v17, 2  ;;  %v8627_v47 = vld [vmem:[#allocation99_spill] sm:$0xff] }
 0x7a2   : > { %v4034_v1 = vsel %vm3227_vm4, %v3774_v15, %v4033_v48  ;;  %v3918_v29 = vadd.f32 %v3917_v59, %v3916_v13  ;;  %v3587_v42 = vrot.slane %v3586_v18, 1  ;;  %v3728_v4 = vadd.f32 %v3727_v24, %v3508_v36  ;;  %v6138_v13 = vld [vmem:[%s7157_s20] sm:$0xff]  ;;  %s4985_s20 = scalar_lea.sflag [#allocation6], %s7077_s23 }
 0x7a3   : > { %v4035_v11 = vsel %vm3229_vm5, %v3822_v6, %v4034_v1  ;;  %v3532_v56 = vmul.f32 %v7996_v50, %v8626_v39  ;;  %v3635_v9 = vrot.slane %v3634_v14, 1  ;;  %v3682_v34 = vadd.f32 %v3681_v60, %v8057_v17 }
 0x7a4   : > { %v4036_v58 = vsel %vm3231_vm6, %v3870_v26, %v4035_v11  ;;  %v5618_v35 = vmul.f32 -1.442695, %v8079_v62  ;;  %v3540_v3 = vmul.f32 %v8023_v22, %v8627_v47  ;;  %v3729_v38 = vrot.slane %v3728_v4, 2 }
 0x7a5   : > { %v4037_v8 = vsel %vm3233_vm7, %v3918_v29, %v4036_v58  ;;  %6058 = vpow2.f32 %v5619_v0  ;;  %v3588_v36 = vadd.f32 %v3587_v42, %v3586_v18  ;;  %v3683_v51 = vrot.slane %v3682_v34, 1  ;;  %v8631_v29 = vld [vmem:[#allocation101_spill] sm:$0xff] }
 0x7a6   : > { %v4059_v12 = vadd.f32 %v4037_v8, %v8628_v37  ;;  %v6055_v19 = vpop.eup %6054  ;;  %v3636_v41 = vadd.f32 %v3635_v9, %v3634_v14  ;;  %v3730_v54 = vadd.f32 %v3729_v38, %v3728_v4  ;;  %v3775_v50 = vrot.slane %v3516_v28, 4  ;;  %v1033_v14 = vld [vmem:[%s7083_s12] sm:$0xff] }
 0x7a7   : > { %v3823_v49 = vrot.slane %v3524_v31, 4  ;;  %v4081_v7 = vadd.f32 1.0, %v6055_v19  ;;  %v3684_v17 = vadd.f32 %v3683_v51, %v3682_v34  ;;  %v3871_v62 = vrot.slane %v3532_v56, 4 }
 0x7a8   : > { %6060 = vtanh.f32 %v4059_v12  ;;  %v6057_v55 = vpop.eup %6056  ;;  %v3731_v45 = vrot.slane %v3730_v54, 1  ;;  %v3776_v16 = vadd.f32 %v3775_v50, %v3516_v28  ;;  %v3919_v22 = vrot.slane %v3540_v3, 4 }
 0x7a9   : > { %v3824_v63 = vadd.f32 %v3823_v49, %v3524_v31  ;;  %v4079_v32 = vadd.f32 1.0, %v6057_v55  ;;  %6062 = vrcp.f32 %v4081_v7  ;;  %v3872_v25 = vadd.f32 %v3871_v62, %v3532_v56 }
 0x7aa   : > { %v4002_v21 = vsel %vm3233_vm7, %v3888_v57, %v8039_v40  ;;  %v3732_v10 = vadd.f32 %v3731_v45, %v3730_v54  ;;  %v3777_v61 = vrot.slane %v3776_v16, 2  ;;  %v3920_v5 = vadd.f32 %v3919_v22, %v3540_v3  ;;  %v8630_v57 = vld [vmem:[#allocation81_spill] sm:$0xff] }
 0x7ab   : > { %v3825_v20 = vrot.slane %v3824_v63, 2  ;;  %6064 = vrcp.f32 %v4079_v32  ;;  %v3873_v2 = vrot.slane %v3872_v25, 2  ;;  %v4038_v53 = vsel %vm3221_vm1, %v3636_v41, %v3588_v36 }
 0x7ac   : > { %v4054_v24 = vadd.f32 %v4002_v21, %v8629_v23  ;;  %v3778_v46 = vadd.f32 %v3777_v61, %v3776_v16  ;;  %v3921_v48 = vrot.slane %v3920_v5, 2  ;;  %v4039_v33 = vsel %vm3223_vm2, %v3684_v17, %v4038_v53  ;;  %v5653_v53 = vld [vmem:[%s7140_s24 + $0x1] ss:$0 sm:$0xff]  ;;  %s8273_s24 = scalar_lea.hbm %s8660_s30, %s5697_s26 }
 0x7ad   : > { %v3826_v30 = vadd.f32 %v3825_v20, %v3824_v63  ;;  %v3874_v28 = vadd.f32 %v3873_v2, %v3872_v25  ;;  %v4040_v40 = vsel %vm3225_vm3, %v3732_v10, %v4039_v33  ;;  %6066 = vpow2.f32 %v5618_v35 }
 0x7ae   : > { %v5616_v44 = vmul.f32 -1.442695, %v4054_v24  ;;  %v2058_v0 = vrot.slane %v6138_v13, %v8630_v57  ;;  %v3779_v15 = vrot.slane %v3778_v46, 1  ;;  %v3922_v6 = vadd.f32 %v3921_v48, %v3920_v5  ;;  %v8632_v5 = vld [vmem:[#allocation47_spill] sm:$0xff] }
 0x7af   : > { %v3827_v52 = vrot.slane %v3826_v30, 1  ;;  %v6059_v59 = vpop.eup %6058  ;;  %v3875_v43 = vrot.slane %v3874_v28, 1  ;;  %v5620_v39 = vmul.f32 -1.442695, %v8083_v27 }
 0x7b0   : > { %6068 = vpow2.f32 %v5616_v44  ;;  %v3780_v31 = vadd.f32 %v3779_v15, %v3778_v46  ;;  %v3923_v26 = vrot.slane %v3922_v6, 1  ;;  %v2867_v11 = vadd.f32 %v8631_v29, %v2058_v0 }
 0x7b1   : > { %v3828_v18 = vadd.f32 %v3827_v52, %v3826_v30  ;;  %v3876_v60 = vadd.f32 %v3875_v43, %v3874_v28  ;;  %v4083_v9 = vadd.f32 1.0, %v6059_v59  ;;  %6070 = vpow2.f32 %v5620_v39  ;;  %v8633_v28 = vld [vmem:[#allocation73_spill] sm:$0xff]  ;;  %v8634_v43 = vld [vmem:[#allocation74_spill] sm:$0xff] }
 0x7b2   : > { %v6061_v1 = vpop.eup %6060  ;;  %v3924_v42 = vadd.f32 %v3923_v26, %v3922_v6  ;;  %v4041_v4 = vsel %vm3227_vm4, %v3780_v31, %v4040_v40 }
 0x7b3   : > { %v6063_v58 = vpop.eup %6062  ;;  %v4042_v56 = vsel %vm3229_vm5, %v3828_v18, %v4041_v4  ;;  %6072 = vrcp.f32 %v4083_v9  ;;  %v8636_v9 = vld [vmem:[#allocation65_spill] sm:$0xff] }
 0x7b4   : > { %v4099_v34 = vmul.f32 %v6063_v58, %v1033_v14  ;;  %v4043_v35 = vsel %vm3231_vm6, %v3876_v60, %v4042_v56 }
 0x7b5   : > { %v6065_v8 = vpop.eup %6064  ;;  %v4044_v47 = vsel %vm3233_vm7, %v3924_v42, %v4043_v35  ;;  %v8637_v35 = vld [vmem:[#allocation67_spill] sm:$0xff] }
 0x7b6   : > { %v4101_v3 = vmul.f32 %v6065_v8, %v6061_v1  ;;  %v4060_v38 = vadd.f32 %v4044_v47, %v2867_v11  ;;  %v8635_v11 = vld [vmem:[#allocation62_spill] sm:$0xff]  ;;  %v8638_v47 = vld [vmem:[#allocation69_spill] sm:$0xff] }
 0x7b7   : > { %v6067_v37 = vpop.eup %6066 }
 0x7b8   : > { %v4103_v12 = vadd.f32 %v4101_v3, %v4099_v34  ;;  %v4082_v36 = vadd.f32 1.0, %v6067_v37  ;;  %6074 = vtanh.f32 %v4060_v38  ;;  %v8639_v37 = vld [vmem:[#allocation68_spill] sm:$0xff] }
 0x7ba   : > { %v6069_v51 = vpop.eup %6068  ;;  %6076 = vtanh.f32 %v4103_v12 }
 0x7bb   : > { %v4080_v27 = vadd.f32 1.0, %v6069_v51  ;;  %6078 = vrcp.f32 %v4082_v36  ;;  %v6071_v19 = vpop.eup %6070  ;;  %v8640_v36 = vld [vmem:[#allocation70_spill] sm:$0xff] }
 0x7bc   : > { %v4084_v62 = vadd.f32 1.0, %v6071_v19 }
 0x7bd   : > { %6080 = vrcp.f32 %v4080_v27  ;;  %v6073_v41 = vpop.eup %6072  ;;  %v8641_v27 = vld [vmem:[#allocation71_spill] sm:$0xff] }
 0x7be   : > { %6082 = vrcp.f32 %v4084_v62 }
 0x7c2   : > { %v6075_v54 = vpop.eup %6074 }
 0x7c4   : > { %v6077_v50 = vpop.eup %6076 }
 0x7c5   : > { %v6079_v49 = vpop.eup %6078  ;;  %v4107_v7 = vmul.f32 %v6077_v50, %v6073_v41  ;;  %v8642_v41 = vld [vmem:[#allocation72_spill] sm:$0xff]  ;;  %v5670_v50 = vld [vmem:[%s7152_s2 + $0x1] ss:$0 sm:$0xff] }
 0x7c6   : > { %v4100_v55 = vmul.f32 %v6079_v49, %v1033_v14 }
 0x7c7   : > { %v6081_v17 = vpop.eup %6080 }
 0x7c8   : > { %v4102_v45 = vmul.f32 %v6081_v17, %v6075_v54  ;;  %v6083_v32 = vpop.eup %6082 }
 0x7ca   : > { %v4104_v16 = vadd.f32 %v4102_v45, %v4100_v55 }
 0x7cc   : > { %6084 = vtanh.f32 %v4104_v16  ;;  %v4110_v63 = vadd.f32 %v4104_v16, %v4103_v12 }
 0x7ce   : > { %v4111_v22 = vmul.f32 0.5, %v4110_v63 }
 0x7d0   : > { %4955 = vst [vmem:[%s7193_s21] sm:$0xff] %v4111_v22 }
 0x7d6   : > { %v6085_v25 = vpop.eup %6084 }
 0x7d7   : > { %v4108_v21 = vmul.f32 %v6085_v25, %v6083_v32 }
 0x7d9   : > { %v4113_v10 = vadd.f32 %v4108_v21, %v4107_v7 }
 0x7db   : > { %v8131_v61 = vmul.f32 0.5, %v4113_v10 }
 0x7dd   : > { %v4115_v20 = vpack.c.bf16 %v8131_v61, %v8131_v61 }
 0x7df   : > { %4282 = vmatprep.mubr.bf16.mxu0 %v4115_v20 }
 0x7e0   : > { %4283 = vmatmul.mubr.bf16.vlgmr.msra.gmra.mrb[56].mxu0 %v8632_v5 }
 0x8b3   : > { %v5745_v2 = vpop.f32.mrb[56].mxu0 }
 0x8b4   : > { %v5746_v23 = vpop.f32.mrb[57].mxu0 }
 0x8b5   : > { %v5747_v24 = vadd.f32 %v5746_v23, %v5745_v2  ;;  %v5748_v46 = vpop.f32.mrb[58].mxu0 }
 0x8b6   : > { %v5749_v30 = vpop.f32.mrb[59].mxu0 }
 0x8b7   : > { %v4285_v48 = vadd.f32 %v5747_v24, %v5653_v53 }
 0x8b9   : > { %v4291_v33 = vcombine.high %v4285_v48, %v4285_v48  ;;  %v4298_v40 = vrot.slane %v4285_v48, %v8633_v28  ;;  %v8643_v48 = vld [vmem:[#allocation75_spill] sm:$0xff] }
 0x8bb   : > { %v4305_v44 = vrot.slane %v4291_v33, %v8633_v28  ;;  %v4306_v13 = vcombine.high %v4298_v40, %v4298_v40  ;;  %v4314_v0 = vrot.slane %v4298_v40, %v8633_v28 }
 0x8bd   : > { %v4307_v15 = vcombine.high %v4305_v44, %v4305_v44  ;;  %v4321_v52 = vrot.slane %v4305_v44, %v8633_v28  ;;  %v4328_v6 = vrot.slane %v4306_v13, %v8633_v28  ;;  %v4336_v59 = vcombine.high %v4314_v0, %v4314_v0 }
 0x8be   : > { %v4343_v31 = vrot.slane %v4314_v0, %v8634_v43 }
 0x8bf   : > { %v4335_v18 = vrot.slane %v4307_v15, %v8633_v28  ;;  %v4337_v26 = vcombine.high %v4321_v52, %v4321_v52  ;;  %v4338_v1 = vcombine.high %v4328_v6, %v4328_v6  ;;  %v4347_v14 = vrot.slane %v4328_v6, %v8634_v43 }
 0x8c0   : > { %v4351_v60 = vrot.slane %v4336_v59, %v8634_v43  ;;  %v4359_v29 = vrot.slane %v4321_v52, %v8634_v43  ;;  %v4380_v42 = vadd.f32 %v4343_v31, %v8635_v11 }
 0x8c1   : > { %v4339_v4 = vcombine.high %v4335_v18, %v4335_v18  ;;  %v4355_v58 = vrot.slane %v4338_v1, %v8634_v43  ;;  %v4363_v39 = vrot.slane %v4335_v18, %v8634_v43  ;;  %v4367_v56 = vrot.slane %v4337_v26, %v8634_v43 }
 0x8c2   : > { %v4381_v34 = vadd.f32 %v4347_v14, %v8636_v9  ;;  %v4382_v8 = vadd.f32 %v4351_v60, %v8637_v35  ;;  %v4384_v3 = vadd.f32 %v4359_v29, %v8638_v47  ;;  %6086 = vtanh.f32 %v4380_v42  ;;  %v8645_v9 = vld [vmem:[#allocation76_spill] sm:$0xff]  ;;  %v8646_v35 = vld [vmem:[#allocation78_spill] sm:$0xff]  ;;  %v8647_v47 = vld [vmem:[#allocation77_spill] sm:$0xff] }
 0x8c3   : > { %v4371_v38 = vrot.slane %v4339_v4, %v8634_v43  ;;  %v4383_v12 = vadd.f32 %v4355_v58, %v8639_v37  ;;  %v4385_v51 = vadd.f32 %v4363_v39, %v8640_v36  ;;  %v4386_v19 = vadd.f32 %v4367_v56, %v8641_v27  ;;  %v8644_v39 = vld [vmem:[#allocation59_spill] sm:$0xff]  ;;  %v8648_v36 = vld [vmem:[#allocation80_spill] sm:$0xff] }
 0x8c4   : > { %6088 = vtanh.f32 %v4381_v34 }
 0x8c5   : > { %6090 = vtanh.f32 %v4382_v8  ;;  %v4387_v54 = vadd.f32 %v4371_v38, %v8642_v41 }
 0x8c6   : > { %6092 = vtanh.f32 %v4384_v3 }
 0x8c7   : > { %6094 = vtanh.f32 %v4383_v12 }
 0x8c8   : > { %6096 = vtanh.f32 %v4385_v51 }
 0x8c9   : > { %6098 = vtanh.f32 %v4386_v19 }
 0x8ca   : > { %6100 = vtanh.f32 %v4387_v54  ;;  %v8649_v54 = vld [vmem:[#allocation79_spill] sm:$0xff] }
 0x8cc   : > { %v6087_v49 = vpop.eup %6086 }
 0x8cd   : > { %v4401_v7 = vmul.f32 %v6087_v49, %v5670_v50 }
 0x8ce   : > { %v6089_v17 = vpop.eup %6088 }
 0x8cf   : > { %v6091_v62 = vpop.eup %6090  ;;  %4409 = vadd.xlane.f32.xlu1 %v4401_v7  ;;  %v4402_v55 = vmul.f32 %v6089_v17, %v5670_v50 }
 0x8d0   : > { %v4403_v45 = vmul.f32 %v6091_v62, %v5670_v50  ;;  %v6093_v16 = vpop.eup %6092 }
 0x8d1   : > { %4411 = vadd.xlane.f32.xlu0 %v4402_v55  ;;  %v4405_v63 = vmul.f32 %v6093_v16, %v5670_v50  ;;  %v6095_v22 = vpop.eup %6094 }
 0x8d2   : > { %v4404_v32 = vmul.f32 %v6095_v22, %v5670_v50  ;;  %v6097_v25 = vpop.eup %6096 }
 0x8d3   : > { %4413 = vadd.xlane.f32.xlu1 %v4403_v45  ;;  %v4406_v21 = vmul.f32 %v6097_v25, %v5670_v50  ;;  %v6099_v10 = vpop.eup %6098 }
 0x8d4   : > { %v4407_v20 = vmul.f32 %v6099_v10, %v5670_v50  ;;  %v6101_v5 = vpop.eup %6100 }
 0x8d5   : > { %v4408_v2 = vmul.f32 %v6101_v5, %v5670_v50 }
 0x8d7   : > { %4417 = vadd.xlane.f32.xlu1 %v4405_v63 }
 0x8db   : > { %4415 = vadd.xlane.f32.xlu1 %v4404_v32 }
 0x8df   : > { %4419 = vadd.xlane.f32.xlu1 %v4406_v21 }
 0x8e3   : > { %4421 = vadd.xlane.f32.xlu1 %v4407_v20 }
 0x8e7   : > { %4423 = vadd.xlane.f32.xlu1 %v4408_v2 }
 0x95c   : > { %v4410_v53 = vpop.xlane.xlu1 %4409 }
 0x95d   : > { %v4436_v28 = vrot.slane %v4410_v53, %v8643_v48 }
 0x95e   : > { %v4412_v46 = vpop.xlane.xlu0 %4411 }
 0x95f   : > { %v4440_v33 = vrot.slane %v4412_v46, %v8643_v48 }
 0x960   : > { %v4414_v23 = vpop.xlane.xlu1 %4413 }
 0x961   : > { %v4444_v40 = vrot.slane %v4414_v23, %v8643_v48  ;;  %v4465_v13 = vsel %vm3221_vm1, %v4440_v33, %v4436_v28 }
 0x963   : > { %v4466_v15 = vsel %vm3223_vm2, %v4444_v40, %v4465_v13 }
 0x964   : > { %v4418_v24 = vpop.xlane.xlu1 %4417 }
 0x965   : > { %v4452_v31 = vrot.slane %v4418_v24, %v8643_v48 }
 0x968   : > { %v4416_v30 = vpop.xlane.xlu1 %4415 }
 0x969   : > { %v4448_v0 = vrot.slane %v4416_v30, %v8643_v48 }
 0x96b   : > { %v4467_v6 = vsel %vm3225_vm3, %v4448_v0, %v4466_v15 }
 0x96c   : > { %v4420_v44 = vpop.xlane.xlu1 %4419  ;;  %v4468_v1 = vsel %vm3227_vm4, %v4452_v31, %v4467_v6 }
 0x96d   : > { %v4456_v59 = vrot.slane %v4420_v44, %v8643_v48 }
 0x96f   : > { %v4469_v60 = vsel %vm3229_vm5, %v4456_v59, %v4468_v1 }
 0x970   : > { %v4422_v52 = vpop.xlane.xlu1 %4421 }
 0x971   : > { %v4460_v18 = vrot.slane %v4422_v52, %v8643_v48 }
 0x973   : > { %v4470_v29 = vsel %vm3231_vm6, %v4460_v18, %v4469_v60 }
 0x974   : > { %v4424_v26 = vpop.xlane.xlu1 %4423 }
 0x975   : > { %v4464_v14 = vrot.slane %v4424_v26, %v8643_v48 }
 0x977   : > { %v4471_v11 = vsel %vm3233_vm7, %v4464_v14, %v4470_v29 }
 0x978   : > { %v4473_v42 = vsel %vm3236_vm8, %v4471_v11, -inf }
 0x979   : > { %4474 = vmax.xlane.f32.xlu1 %v4473_v42 }
 0xa06   : > { %v4475_v4 = vpop.xlane.xlu1 %4474 }
 0xa07   : > { %v4480_v58 = vrot.slane %v4475_v4, %v8634_v43  ;;  %v4484_v56 = vrot.slane %v4475_v4, %v8644_v39  ;;  %v4488_v34 = vrot.slane %v4475_v4, %v8645_v9  ;;  %v4496_v8 = vrot.slane %v4475_v4, %v8646_v35 }
 0xa08   : > { %v4492_v3 = vrot.slane %v4475_v4, %v8647_v47  ;;  %v4504_v51 = vrot.slane %v4475_v4, %v8648_v36  ;;  %v4500_v50 = vrot.slane %v4475_v4, %v8649_v54  ;;  %v4508_v55 = vrot.slane %v4475_v4, %v8630_v57 }
 0xa09   : > { %v4517_v38 = vsub.f32 %v4410_v53, %v4480_v58  ;;  %v4518_v37 = vsub.f32 %v4412_v46, %v4484_v56  ;;  %v4519_v12 = vsub.f32 %v4414_v23, %v4488_v34  ;;  %v4521_v27 = vsub.f32 %v4418_v24, %v4496_v8 }
 0xa0a   : > { %v4520_v49 = vsub.f32 %v4416_v30, %v4492_v3  ;;  %v4523_v17 = vsub.f32 %v4422_v52, %v4504_v51  ;;  %v4522_v45 = vsub.f32 %v4420_v44, %v4500_v50  ;;  %v4524_v22 = vsub.f32 %v4424_v26, %v4508_v55 }
 0xa0b   : > { %v4525_v19 = vmul.f32 1.442695, %v4517_v38  ;;  %v4527_v41 = vmul.f32 1.442695, %v4518_v37  ;;  %v4529_v7 = vmul.f32 1.442695, %v4519_v12 }
 0xa0c   : > { %v4533_v62 = vmul.f32 1.442695, %v4521_v27  ;;  %v4531_v16 = vmul.f32 1.442695, %v4520_v49  ;;  %v4537_v63 = vmul.f32 1.442695, %v4523_v17 }
 0xa0d   : > { %6102 = vpow2.f32 %v4525_v19  ;;  %v4535_v32 = vmul.f32 1.442695, %v4522_v45  ;;  %v4539_v10 = vmul.f32 1.442695, %v4524_v22  ;;  %v5998_v45 = vld [vmem:[%s7117_s5] sm:$0xff]   ;;  %v6000_v22 = vld [vmem:[%s7117_s5 + $0x10] sm:$0xff]  }
 0xa0e   : > { %6104 = vpow2.f32 %v4527_v41 }
 0xa0f   : > { %6106 = vpow2.f32 %v4529_v7 }
 0xa10   : > { %6108 = vpow2.f32 %v4533_v62 }
 0xa11   : > { %6110 = vpow2.f32 %v4531_v16  ;;  %v6576_v16 = vmov 0.0  }
 0xa12   : > { %6112 = vpow2.f32 %v4537_v63  ;;  %5780 = vmatprep.subr.bf16.mxu1 %v6576_v16  ;;  %v5999_v63 = vld [vmem:[%s7117_s5 + $0x8] sm:$0xff]   ;;  %5796 = vmatprep.mubr.msk.bf16.mxu1 %vm6577_vm9, %v6576_v16 }
 0xa13   : > { %6114 = vpow2.f32 %v4535_v32  ;;  %5781 = vmatpush3.bf16.msra.mxu1 %v5998_v45  ;;  %v6001_v32 = vld [vmem:[%s7117_s5 + $0x18] sm:$0xff]  }
 0xa14   : > { %6116 = vpow2.f32 %v4539_v10  ;;  %5782 = vmatprep.subr.bf16.mxu1 %v6576_v16  ;;  %v6004_v10 = vld [vmem:[%s7117_s5 + $0x30] sm:$0xff]  }
 0xa17   : > { %v8184_v25 = vpop.eup %6102  ;;  %5783 = vmatpush3.bf16.msra.mxu1 %v5999_v63 }
 0xa18   : > { %v6105_v21 = vpop.eup %6104  ;;  %4550 = vperm.xlu1 %5940, %v8184_v25   ;;  %5784 = vmatprep.subr.bf16.mxu1 %v6576_v16 }
 0xa19   : > { %4553 = vperm.xlu0 %5941, %v6105_v21   ;;  %v6107_v20 = vpop.eup %6106 }
 0xa1a   : > { %v8187_v5 = vpop.eup %6108 }
 0xa1b   : > { %v6111_v2 = vpop.eup %6110  ;;  %5785 = vmatpush3.bf16.msra.mxu1 %v6000_v22  ;;  %v8657_v22 = vld [vmem:[#allocation46_spill] sm:$0xff] }
 0xa1c   : > { %4556 = vperm.xlu1 %5940, %v6107_v20   ;;  %v8190_v53 = vpop.eup %6112  ;;  %5786 = vmatprep.subr.bf16.mxu1 %v6576_v16 }
 0xa1d   : > { %4562 = vperm.xlu0 %5941, %v8187_v5   ;;  %v6115_v23 = vpop.eup %6114 }
 0xa1e   : > { %v8193_v24 = vpop.eup %6116 }
 0xa1f   : > { %5787 = vmatpush3.bf16.msra.mxu1 %v6001_v32 }
 0xa20   : > { %4559 = vperm.xlu1 %5940, %v6111_v2   ;;  %5788 = vmatprep.subr.bf16.mxu1 %v6576_v16 }
 0xa21   : > { %4568 = vperm.xlu0 %5941, %v8190_v53  }
 0xa24   : > { %4565 = vperm.xlu1 %5940, %v6115_v23  }
 0xa28   : > { %4571 = vperm.xlu1 %5940, %v8193_v24  }
 0xa97   : > { %v4551_v46 = vpop.permute.xlu1 %4550 }
 0xa98   : > { %v4554_v30 = vpop.permute.xlu0 %4553  ;;  %v4576_v40 = vrot.slane %v4551_v46, %v8643_v48 }
 0xa99   : > { %v4580_v28 = vrot.slane %v4554_v30, %v8643_v48 }
 0xa9b   : > { %v4557_v33 = vpop.permute.xlu1 %4556  ;;  %v4605_v15 = vsel %vm3221_vm1, %v4580_v28, %v4576_v40  ;;  %v8652_v40 = vld [vmem:[#allocation39_spill] sm:$0xff] }
 0xa9c   : > { %v4584_v44 = vrot.slane %v4557_v33, %v8643_v48  ;;  %v4563_v13 = vpop.permute.xlu0 %4562 }
 0xa9d   : > { %v4592_v31 = vrot.slane %v4563_v13, %v8643_v48 }
 0xa9e   : > { %v4606_v6 = vsel %vm3223_vm2, %v4584_v44, %v4605_v15 }
 0xa9f   : > { %v4560_v0 = vpop.permute.xlu1 %4559 }
 0xaa0   : > { %v4588_v52 = vrot.slane %v4560_v0, %v8643_v48  ;;  %v4569_v26 = vpop.permute.xlu0 %4568 }
 0xaa1   : > { %v4600_v29 = vrot.slane %v4569_v26, %v8643_v48 }
 0xaa2   : > { %v4607_v59 = vsel %vm3225_vm3, %v4588_v52, %v4606_v6 }
 0xaa3   : > { %v4566_v18 = vpop.permute.xlu1 %4565  ;;  %v4608_v14 = vsel %vm3227_vm4, %v4592_v31, %v4607_v59  ;;  %v8653_v59 = vld [vmem:[#allocation42_spill] sm:$0xff] }
 0xaa4   : > { %v4596_v1 = vrot.slane %v4566_v18, %v8643_v48 }
 0xaa6   : > { %v4609_v60 = vsel %vm3229_vm5, %v4596_v1, %v4608_v14 }
 0xaa7   : > { %v4572_v11 = vpop.permute.xlu1 %4571  ;;  %v4610_v4 = vsel %vm3231_vm6, %v4600_v29, %v4609_v60 }
 0xaa8   : > { %v4604_v42 = vrot.slane %v4572_v11, %v8643_v48 }
 0xaaa   : > { %v4611_v58 = vsel %vm3233_vm7, %v4604_v42, %v4610_v4  ;;  %v8654_v42 = vld [vmem:[#allocation43_spill] sm:$0xff] }
 0xaab   : > { %v4613_v56 = vsel %vm3236_vm8, %v4611_v58, 0.0 }
 0xaac   : > { %4614 = vadd.xlane.f32.xlu0 %v4613_v56 }
 0xb39   : > { %v4615_v34 = vpop.xlane.xlu0 %4614 }
 0xb3a   : > { %v4624_v8 = vrot.slane %v4615_v34, %v8644_v39  ;;  %v4628_v3 = vrot.slane %v4615_v34, %v8645_v9  ;;  %v4620_v38 = vrot.slane %v4615_v34, %v8634_v43  ;;  %v4632_v37 = vrot.slane %v4615_v34, %v8647_v47 }
 0xb3b   : > { %v4636_v12 = vrot.slane %v4615_v34, %v8646_v35  ;;  %v4640_v19 = vrot.slane %v4615_v34, %v8649_v54  ;;  %v4644_v9 = vrot.slane %v4615_v34, %v8648_v36  ;;  %v4648_v47 = vrot.slane %v4615_v34, %v8630_v57 }
 0xb3c   : > { %6118 = vrcp.f32 %v4624_v8 }
 0xb3d   : > { %6120 = vrcp.f32 %v4628_v3 }
 0xb3e   : > { %6122 = vrcp.f32 %v4620_v38 }
 0xb3f   : > { %6124 = vrcp.f32 %v4632_v37 }
 0xb40   : > { %6126 = vrcp.f32 %v4636_v12  ;;  %v8655_v12 = vld [vmem:[#allocation44_spill] sm:$0xff] }
 0xb41   : > { %6128 = vrcp.f32 %v4640_v19 }
 0xb42   : > { %6130 = vrcp.f32 %v4644_v9 }
 0xb43   : > { %6132 = vrcp.f32 %v4648_v47 }
 0xb46   : > { %v6119_v48 = vpop.eup %6118 }
 0xb47   : > { %v4660_v51 = vmul.f32 %v6119_v48, %v6105_v21  ;;  %v6121_v27 = vpop.eup %6120  ;;  %v6003_v21 = vld [vmem:[%s7117_s5 + $0x28] sm:$0xff]  }
 0xb48   : > { %v4662_v39 = vmul.f32 %v6121_v27, %v6107_v20  ;;  %v6123_v41 = vpop.eup %6122  ;;  %v6005_v20 = vld [vmem:[%s7117_s5 + $0x38] sm:$0xff]  }
 0xb49   : > { %4680 = vperm.xlu1 %5940, %v4660_v51   ;;  %v4658_v43 = vmul.f32 %v6123_v41, %v8184_v25  ;;  %v6125_v50 = vpop.eup %6124  ;;  %v6002_v25 = vld [vmem:[%s7117_s5 + $0x20] sm:$0xff]   ;;  %s5003_s5 = sshll.u32 %s7193_s21, 4  ;;  %s8275_s5 = int_to_ptr.vmem [resolvable:$true] %s5003_s5 }
 0xb4a   : > { %v4664_v35 = vmul.f32 %v6125_v50, %v6111_v2  ;;  %v6127_v49 = vpop.eup %6126  ;;  %5789 = vmatpush3.bf16.msra.mxu1 %v6002_v25  ;;  %v8650_v2 = vld [vmem:[#allocation40_spill] sm:$0xff]  ;;  %v8656_v50 = vld [vmem:[#allocation45_spill] sm:$0xff]  ;;  %s6403_s17 = scalar_lea.vmem %s8275_s5, 256 }
 0xb4b   : > { %v4666_v54 = vmul.f32 %v6127_v49, %v8187_v5  ;;  %v6129_v7 = vpop.eup %6128  ;;  %5790 = vmatprep.subr.bf16.mxu1 %v6576_v16  ;;  %p6404_p5 = scmp.ne.s32.totalorder %s8275_s5, %s6403_s17 }
 0xb4c   : > { %v4668_v17 = vmul.f32 %v6129_v7, %v6115_v23  ;;  %v6131_v36 = vpop.eup %6130  ;;  %v4770_v7 = vrot.slane %v8131_v61, 1 }
 0xb4d   : > { %4685 = vperm.xlu1 %5940, %v4662_v39   ;;  %v4670_v62 = vmul.f32 %v6131_v36, %v8190_v53  ;;  %v6133_v55 = vpop.eup %6132  ;;  %p6405_p0 = pnand %p6404_p5, %p8661_p12 }
 0xb4e   : > { %v4672_v57 = vmul.f32 %v6133_v55, %v8193_v24  ;;  %5791 = vmatpush3.bf16.msra.mxu1 %v6003_v21  ;;  %v8651_v24 = vld [vmem:[#allocation41_spill] sm:$0xff]  ;;  %v4771_v21 = vrot.slane %v8131_v61, 2 }
 0xb4f   : > { %5792 = vmatprep.subr.bf16.mxu1 %v6576_v16  ;;  %p6406_p11 = pneg %p6405_p0 }
 0xb51   : > { %4675 = vperm.xlu1 %5940, %v4658_v43  }
 0xb52   : > { %5793 = vmatpush3.bf16.msra.mxu1 %v6004_v10  ;;  %v4772_v10 = vrot.slane %v8131_v61, 3 }
 0xb53   : > { %5794 = vmatprep.subr.bf16.mxu1 %v6576_v16 }
 0xb55   : > { %4690 = vperm.xlu1 %5940, %v4664_v35  }
 0xb56   : > { %5795 = vmatpush3.bf16.msra.mxu1 %v6005_v20 }
 0xb59   : > { %4695 = vperm.xlu1 %5940, %v4666_v54  }
 0xb5d   : > { %4700 = vperm.xlu1 %5940, %v4668_v17  }
 0xb61   : > { %4705 = vperm.xlu1 %5940, %v4670_v62  }
 0xb65   : > { %4710 = vperm.xlu1 %5940, %v4672_v57  }
 0xbc8   : > { %v4681_v5 = vpop.permute.xlu1 %4680 }
 0xbc9   : > { %v4714_v53 = vmul.f32 %v4681_v5, %v8650_v2  ;;  %v4773_v5 = vrot.slane %v8131_v61, 4 }
 0xbcb   : > { %v4727_v30 = vrot.slane %v4714_v53, 4 }
 0xbcc   : > { %v4686_v23 = vpop.permute.xlu1 %4685 }
 0xbcd   : > { %v4715_v46 = vmul.f32 %v4686_v23, %v8651_v24  ;;  %v4728_v13 = vadd.f32 %v4727_v30, %v4714_v53 }
 0xbcf   : > { %v4733_v33 = vrot.slane %v4715_v46, 4  ;;  %v4729_v18 = vrot.slane %v4728_v13, 2 }
 0xbd0   : > { %v4676_v28 = vpop.permute.xlu1 %4675 }
 0xbd1   : > { %v4713_v44 = vmul.f32 %v4676_v28, %v8652_v40  ;;  %v4734_v0 = vadd.f32 %v4733_v33, %v4715_v46  ;;  %v4730_v29 = vadd.f32 %v4729_v18, %v4728_v13 }
 0xbd3   : > { %v4721_v15 = vrot.slane %v4713_v44, 4  ;;  %v4735_v26 = vrot.slane %v4734_v0, 2  ;;  %v4731_v38 = vrot.slane %v4730_v29, 1 }
 0xbd4   : > { %v4691_v52 = vpop.permute.xlu1 %4690 }
 0xbd5   : > { %v4722_v6 = vadd.f32 %v4721_v15, %v4713_v44  ;;  %v4716_v31 = vmul.f32 %v4691_v52, %v8653_v59  ;;  %v4736_v58 = vadd.f32 %v4735_v26, %v4734_v0  ;;  %v4732_v35 = vadd.f32 %v4731_v38, %v4730_v29 }
 0xbd6   : > { %v4774_v0 = vrot.slane %v8131_v61, 5  ;;  %v4775_v26 = vrot.slane %v8131_v61, 6 }
 0xbd7   : > { %v4739_v1 = vrot.slane %v4716_v31, 4  ;;  %v4723_v14 = vrot.slane %v4722_v6, 2  ;;  %v4737_v27 = vrot.slane %v4736_v58, 1  ;;  %v4786_v25 = vadd.f32 %v4770_v7, %v4732_v35 }
 0xbd8   : > { %v4696_v60 = vpop.permute.xlu1 %4695 }
 0xbd9   : > { %v4740_v11 = vadd.f32 %v4739_v1, %v4716_v31  ;;  %v4717_v4 = vmul.f32 %v4696_v60, %v8654_v42  ;;  %v4724_v56 = vadd.f32 %v4723_v14, %v4722_v6  ;;  %v4738_v17 = vadd.f32 %v4737_v27, %v4736_v58 }
 0xbda   : > { %v4794_v13 = vpack.c.bf16 %v4786_v25, %v4786_v25  ;;  %v4964_v42 = vrot.slane %v4786_v25, 7 }
 0xbdb   : > { %v4741_v34 = vrot.slane %v4740_v11, 2  ;;  %v4745_v8 = vrot.slane %v4717_v4, 4  ;;  %v4725_v19 = vrot.slane %v4724_v56, 1  ;;  %v4787_v24 = vadd.f32 %v4771_v21, %v4738_v17 }
 0xbdc   : > { %v4701_v3 = vpop.permute.xlu1 %4700 }
 0xbdd   : > { %v4742_v37 = vadd.f32 %v4741_v34, %v4740_v11  ;;  %v4746_v48 = vadd.f32 %v4745_v8, %v4717_v4  ;;  %v4718_v51 = vmul.f32 %v4701_v3, %v8655_v12  ;;  %v4726_v62 = vadd.f32 %v4725_v19, %v4724_v56 }
 0xbde   : > { %v4795_v59 = vpack.c.bf16 %v4787_v24, %v4787_v24  ;;  %v4833_v11 = vunpack.c.l.b16 %v4794_v13  ;;  %v4776_v4 = vrot.slane %v8131_v61, 7  ;;  %v4966_v58 = vrot.slane %v4787_v24, 6 }
 0xbdf   : > { %v4743_v39 = vrot.slane %v4742_v37, 1  ;;  %v4747_v41 = vrot.slane %v4746_v48, 2  ;;  %v4751_v9 = vrot.slane %v4718_v51, 4  ;;  %v4785_v46 = vadd.f32 %v4726_v62, %v8131_v61 }
 0xbe0   : > { %v4706_v43 = vpop.permute.xlu1 %4705  ;;  %v4834_v12 = vunpack.c.l.b16 %v4795_v59 }
 0xbe1   : > { %v4719_v47 = vmul.f32 %v4706_v43, %v8656_v50  ;;  %v4748_v49 = vadd.f32 %v4747_v41, %v4746_v48  ;;  %v4752_v54 = vadd.f32 %v4751_v9, %v4718_v51  ;;  %v4744_v55 = vadd.f32 %v4743_v39, %v4742_v37 }
 0xbe2   : > { %v4793_v31 = vpack.c.bf16 %v4785_v46, %v4785_v46  ;;  %v4965_v38 = vsel %vm3221_vm1, %v4964_v42, %v4785_v46  ;;  %v4840_v39 = vrot.slane %v4833_v11, 7  ;;  %v4842_v17 = vrot.slane %v4834_v12, 6  ;;  %v1032_v46 = vld [vmem:[#allocation3] sm:$0xff] }
 0xbe3   : > { %v4757_v36 = vrot.slane %v4719_v47, 4  ;;  %v4749_v57 = vrot.slane %v4748_v49, 1  ;;  %v4753_v45 = vrot.slane %v4752_v54, 2  ;;  %v4788_v30 = vadd.f32 %v4772_v10, %v4744_v55  ;;  %4982 = vst [vmem:[#allocation22] sm:$0xff] %v1032_v46 }
 0xbe4   : > { %v4711_v16 = vpop.permute.xlu1 %4710  ;;  %v4832_v3 = vunpack.c.l.b16 %v4793_v31  ;;  %v4967_v50 = vsel %vm3223_vm2, %v4966_v58, %v4965_v38 }
 0xbe5   : > { %v4758_v63 = vadd.f32 %v4757_v36, %v4719_v47  ;;  %v4720_v32 = vmul.f32 %v4711_v16, %v8657_v22  ;;  %v4750_v20 = vadd.f32 %v4749_v57, %v4748_v49  ;;  %v4754_v2 = vadd.f32 %v4753_v45, %v4752_v54 }
 0xbe6   : > { %v4796_v18 = vpack.c.bf16 %v4788_v30, %v4788_v30  ;;  %v4968_v48 = vrot.slane %v4788_v30, 5  ;;  %v4841_v35 = vsel %vm3221_vm1, %v4840_v39, %v4832_v3  ;;  %v5671_v30 = vld [vmem:[%s892_s9] ss:$0 sm:$0xff]  ;;  %s6407_s9 = sshll.u32 %s6578_s18, 4  ;;  %s6408_s9 = int_to_ptr.vmem [resolvable:$false] %s6407_s9 }
 0xbe7   : > { %v4759_v53 = vrot.slane %v4758_v63, 2  ;;  %v4763_v23 = vrot.slane %v4720_v32, 4  ;;  %v4789_v33 = vadd.f32 %v4773_v5, %v4750_v20  ;;  %v4755_v28 = vrot.slane %v4754_v2, 1  ;;  %s6409_s3 = scalar_lea.vmem %s6408_s9, 512  ;;  %p6410_p13 = scmp.lt.s32.totalorder %s8275_s5, %s6408_s9 }
 0xbe8   : > { %v4835_v37 = vunpack.c.l.b16 %v4796_v18  ;;  %v4969_v54 = vsel %vm3225_vm3, %v4968_v48, %v4967_v50  ;;  %p6411_p9 = scmp.lt.s32.totalorder %s6409_s3, %s6403_s17 }
 0xbe9   : > { %v4760_v40 = vadd.f32 %v4759_v53, %v4758_v63  ;;  %v4764_v44 = vadd.f32 %v4763_v23, %v4720_v32  ;;  %v4756_v15 = vadd.f32 %v4755_v28, %v4754_v2  ;;  %v4797_v1 = vpack.c.bf16 %v4789_v33, %v4789_v33 }
 0xbea   : > { %v4970_v27 = vrot.slane %v4789_v33, 4  ;;  %v4844_v49 = vrot.slane %v4835_v37, 5  ;;  %v4843_v63 = vsel %vm3223_vm2, %v4842_v17, %v4841_v35  ;;  %p6412_p1 = por %p6411_p9, %p6410_p13 }
 0xbeb   : > { %v4761_v52 = vrot.slane %v4760_v40, 1  ;;  %v4765_v6 = vrot.slane %v4764_v44, 2  ;;  %v4790_v14 = vadd.f32 %v4774_v0, %v4756_v15  ;;  %v4836_v51 = vunpack.c.l.b16 %v4797_v1 }
 0xbec   : > { %v4971_v62 = vsel %vm3227_vm4, %v4970_v27, %v4969_v54  ;;  %v4845_v25 = vsel %vm3225_vm3, %v4844_v49, %v4843_v63  ;;  %p6413_p4 = pnand %p6412_p1, %p6406_p11 }
 0xbed   : > { %v4762_v60 = vadd.f32 %v4761_v52, %v4760_v40  ;;  %v4766_v29 = vadd.f32 %v4765_v6, %v4764_v44  ;;  %v4798_v56 = vpack.c.bf16 %v4790_v14, %v4790_v14  ;;  %v4972_v9 = vrot.slane %v4790_v14, 3 }
 0xbee   : > { %v4846_v36 = vrot.slane %v4836_v51, 4 }
 0xbef   : > { %v4791_v34 = vadd.f32 %v4775_v26, %v4762_v60  ;;  %v4767_v8 = vrot.slane %v4766_v29, 1  ;;  %v4837_v41 = vunpack.c.l.b16 %v4798_v56  ;;  %v4973_v57 = vsel %vm3229_vm5, %v4972_v9, %v4971_v62 }
 0xbf0   : > { %v4847_v20 = vsel %vm3227_vm4, %v4846_v36, %v4845_v25 }
 0xbf1   : > { %v4799_v19 = vpack.c.bf16 %v4791_v34, %v4791_v34  ;;  %v4768_v43 = vadd.f32 %v4767_v8, %v4766_v29  ;;  %v4974_v47 = vrot.slane %v4791_v34, 2  ;;  %v4848_v55 = vrot.slane %v4837_v41, 3 }
 0xbf3   : > { %v4838_v61 = vunpack.c.l.b16 %v4799_v19  ;;  %v4792_v7 = vadd.f32 %v4776_v4, %v4768_v43  ;;  %v4975_v32 = vsel %vm3231_vm6, %v4974_v47, %v4973_v57  ;;  %v4849_v2 = vsel %vm3229_vm5, %v4848_v55, %v4847_v20 }
 0xbf5   : > { %v4800_v45 = vpack.c.bf16 %v4792_v7, %v4792_v7  ;;  %v4976_v16 = vrot.slane %v4792_v7, 1  ;;  %v4850_v22 = vrot.slane %v4838_v61, 2 }
 0xbf7   : > { %v4839_v21 = vunpack.c.l.b16 %v4800_v45  ;;  %v4977_v10 = vsel %vm3233_vm7, %v4976_v16, %v4975_v32  ;;  %v4851_v53 = vsel %vm3231_vm6, %v4850_v22, %v4849_v2 }
 0xbf8   : > { %5680 = vst [vmem:[%s7193_s21 + $0x8] sm:$0xff] %v4977_v10  ;;  %4983 = vst [vmem:[#allocation2] sm:$0xff] %v4977_v10 }
 0xbf9   : > { %v4852_v5 = vrot.slane %v4839_v21, 1 }
 0xbfb   : > { %v4853_v23 = vsel %vm3233_vm7, %v4852_v5, %v4851_v53 }
 0xbfc   : > { %v4854_v24 = vpack.c.b16 %v4853_v23, %v4853_v23 }
 0xbfe   : > { %5797 = vmatmul.mubr.bf16.vlgmr.msra.gmra.mrb[44].mxu1 %v4854_v24 }
 0xcd1   : > { %v4938_v33 = vpop.f32.mrb[44].mxu1 }
 0xcd2   : > { %v4939_v28 = vadd.f32 %v5671_v30, %v4938_v33  ;;  %v5798_v40 = vpop.f32.mrb[45].mxu1 }
 0xcd3   : > { %v4941_v44 = vpop.f32.mrb[46].mxu1 }
 0xcd4   : > { %v5799_v13 = vpop.f32.mrb[47].mxu1  ;;  %v4944_v0 = vmul.f32 %v4939_v28, %v1032_v46 }
 0xcd6   : > { %4945 = vmax.xlane.f32.xlu0 %v4944_v0 }
 0xd63   : > { %v4946_v15 = vpop.xlane.xlu0 %4945 }
 0xd64   : > { %v4947_v52 = vsub.f32 %v4944_v0, %v4946_v15 }
 0xd66   : > { %v4948_v6 = vmul.f32 1.442695, %v4947_v52 }
 0xd68   : > { %6134 = vpow2.f32 %v4948_v6 }
 0xd72   : > { %v6135_v59 = vpop.eup %6134 }
 0xd73   : > { %4950 = vadd.xlane.f32.xlu1 %v6135_v59 }
 0xd74   : > { %6416 = shalt.err (!%p6413_p4)
}
 0xd75   : > { %s6417_s21 = scalar_lea.hbm %s8273_s24, 256  ;;  %s6421_s15 = scalar_lea.hbm %s8660_s30, 512 }
 0xd76   : > { %p6418_p6 = scmp.ne.s32.totalorder %s8273_s24, %s6417_s21  ;;  %p6422_p7 = scmp.lt.u32.totalorder %s8273_s24, %s8660_s30 }
 0xd77   : > { %p6423_p8 = scmp.lt.u32.totalorder %s6421_s15, %s6417_s21  ;;  %p6425_p5 = scmp.lt.u32.totalorder %s6417_s21, %s8273_s24 }
 0xd78   : > { %p6419_p10 = pnand %p6418_p6, %p8661_p12 }
 0xd79   : > { %p6424_p2 = por %p6423_p8, %p6422_p7 }
 0xd7a   : > { %p6420_p3 = pneg %p6419_p10 }
 0xd7b   : > { %p6426_p0 = por %p6425_p5, %p6424_p2 }
 0xd7d   : > { %p6427_p11 = pnand %p6426_p0, %p6420_p3 }
 0xd7f   : > { %6430 = shalt.err (!%p6427_p11)
}
 0xd80   : > { %s6579_s8 = smov 128   ;;  %s6580_s2 = smov 8  }
 0xd81   : > { %5824 = dma.vmem_to_hbm [thread:$0]  (%p8661_p12), %s8275_s5, 256, %s8273_s24, %s4985_s20, %s6579_s8, %s6579_s8, %s6580_s2  }
 0xd82   : > { %s5685_s12 = sshll.u32 %s6694_s28, 7  ;;  %s5019_s4 = sshll.u32 %s7195_s6, 4  ;;  %s8308_s4 = int_to_ptr.vmem [resolvable:$true] %s5019_s4 }
 0xd83   : > { %s6581_s26 = smov [#allocation22]   ;;  %s8662_s18 = sld [smem:[#allocation116_spill]] }
 0xd84   : > { %s5030_s29 = sshll.u32 %s6581_s26, 4  ;;  %s4990_s23 = scalar_lea.sflag [#allocation21], %s7074_s19  ;;  %s8310_s29 = int_to_ptr.vmem [resolvable:$true] %s5030_s29 }
 0xd85   : > { %s6431_s5 = scalar_lea.vmem %s8308_s4, 128  ;;  %s6582_s24 = smov [#allocation20]  }
 0xd86   : > { %p6432_p13 = scmp.ne.s32.totalorder %s8308_s4, %s6431_s5  ;;  %s6435_s20 = sshll.u32 %s6582_s24, 4  ;;  %s6436_s20 = int_to_ptr.vmem [resolvable:$false] %s6435_s20 }
 0xd87   : > { %s6437_s3 = scalar_lea.vmem %s6436_s20, 256  ;;  %p6438_p4 = scmp.lt.s32.totalorder %s8308_s4, %s6436_s20 }
 0xd88   : > { %p6433_p9 = pnand %p6432_p13, %p8661_p12  ;;  %p6439_p6 = scmp.lt.s32.totalorder %s6437_s3, %s6431_s5 }
 0xd89   : > { %s8306_s9 = scalar_lea.hbm %s8662_s18, %s5685_s12 }
 0xd8a   : > { %p6434_p1 = pneg %p6433_p9  ;;  %p6440_p10 = por %p6439_p6, %p6438_p4 }
 0xd8c   : > { %p6441_p3 = pnand %p6440_p10, %p6434_p1 }
 0xe00   : > { %v4951_v31 = vpop.xlane.xlu1 %4950 }
 0xe01   : > { %6136 = vlog2.f32 %v4951_v31 }
 0xe0b   : > { %v6137_v18 = vpop.eup %6136 }
 0xe0c   : > { %v4953_v26 = vmul.f32 0.6931472, %v6137_v18 }
 0xe0e   : > { %v4954_v1 = vsub.f32 %v4947_v52, %v4953_v26 }
 0xe10   : > { %4981 = vst [vmem:[%s7195_s6] sm:$0xff] %v4954_v1 }
 0xe11   : > { %6444 = shalt.err (!%p6441_p3)
}
 0xe12   : > { %s6445_s19 = scalar_lea.hbm %s8306_s9, 128  ;;  %s6449_s14 = scalar_lea.hbm %s8662_s18, 256 }
 0xe13   : > { %p6446_p7 = scmp.ne.s32.totalorder %s8306_s9, %s6445_s19  ;;  %p6450_p5 = scmp.lt.u32.totalorder %s8306_s9, %s8662_s18 }
 0xe14   : > { %p6451_p0 = scmp.lt.u32.totalorder %s6449_s14, %s6445_s19  ;;  %p6453_p13 = scmp.lt.u32.totalorder %s6445_s19, %s8306_s9 }
 0xe15   : > { %p6447_p8 = pnand %p6446_p7, %p8661_p12 }
 0xe16   : > { %p6452_p11 = por %p6451_p0, %p6450_p5 }
 0xe17   : > { %p6448_p2 = pneg %p6447_p8 }
 0xe18   : > { %p6454_p9 = por %p6453_p13, %p6452_p11 }
 0xe1a   : > { %p6455_p1 = pnand %p6454_p9, %p6448_p2 }
 0xe1c   : > { %6458 = shalt.err (!%p6455_p1)
}
 0xe1d   : > { %5825 = dma.vmem_to_hbm [thread:$0]  (%p8661_p12), %s8308_s4, 128, %s8306_s9, %s4990_s23  }
 0xe1e   : > { %s6459_s1 = scalar_lea.vmem %s8310_s29, 128  ;;  %p8663_p6 = scmp.eq.s32.totalorder %s6694_s28, 1 }
 0xe1f   : > { %p6460_p4 = scmp.ne.s32.totalorder %s8310_s29, %s6459_s1  ;;  %p6466_p7 = scmp.lt.s32.totalorder %s8310_s29, %s8310_s29 }
 0xe20   : > { %p6467_p8 = scmp.lt.s32.totalorder %s6459_s1, %s6459_s1 }
 0xe21   : > { %p6461_p10 = pnand %p6460_p4, %p8663_p6 }
 0xe22   : > { %p6468_p5 = por %p6467_p8, %p6466_p7 }
 0xe23   : > { %p6462_p3 = pneg %p6461_p10 }
 0xe25   : > { %p6469_p2 = pnand %p6468_p5, %p6462_p3 }
 0xe27   : > { %6472 = shalt.err (!%p6469_p2)
}
 0xe28   : > { %s8664_s8 = sld [smem:[#allocation117_spill]]  ;;  %p8665_p0 = pmov %p8663_p6 }
 0xe2e   : > { %s6473_s2 = scalar_lea.hbm %s8664_s8, 128 }
 0xe2f   : > { %p6474_p12 = scmp.ne.s32.totalorder %s8664_s8, %s6473_s2  ;;  %p6479_p9 = scmp.lt.u32.totalorder %s6473_s2, %s8664_s8 }
 0xe31   : > { %p6475_p11 = pnand %p6474_p12, %p8665_p0 }
 0xe33   : > { %p6476_p13 = pneg %p6475_p11 }
 0xe35   : > { %p6481_p1 = pnand %p6479_p9, %p6476_p13 }
 0xe37   : > { %6484 = shalt.err (!%p6481_p1)
}
 0xe38   : > { %p8666_p4 = pmov %p8665_p0  ;;  %p8667_p6 = pmov %p8665_p0 }
 0xe3a   : > { %5827 = dma.vmem_to_hbm [thread:$0]  (%p8666_p4), %s8310_s29, 128, %s8664_s8, [#allocation21]  }
 0xe3b   : > { %6530 = dma.done.wait (%p8667_p6), [#allocation21], 128   ;;  %p8668_p10 = pmov %p8665_p0 }
 0xe3d   : > { %6532 = vsyncadd (%p8668_p10), [#allocation21], 4294967168 }
 0xe3e PF: > { %s8669_s23 = sld [smem:[#allocation33_spill]]  ;;  %s8670_s5 = sld [smem:[#allocation38_spill]] }
 0xe3f   : > { %p8672_p7 = scmp.ge.s32.totalorder %s6555_s27, 2 }
 0xe44   : > { %s5046_s24 = sand.u32 1, %s8669_s23   ;;  %p8671_p3 = scmp.ne.s32.totalorder %s8670_s5, 0 }
 0xe45   : > { %s5047_s20 = scalar_lea.sflag [#allocation6], %s5046_s24 }
 0xe46   : > { %p5862_p8 = pnand %p8672_p7, %p8671_p3 }
 0xe48   : > { %6534 = dma.done.wait (!%p5862_p8), %s5047_s20, 256  }
 0xe49   : > { %6536 = vsyncadd (!%p5862_p8), %s5047_s20, 4294967040  ;;  %s8673_s3 = sadd.s32 4294967294, %s6555_s27  }
 0xe4a   : > { %s5055_s19 = sand.u32 1, %s8673_s3  }
 0xe4b   : > { %s5056_s29 = scalar_lea.sflag [#allocation21], %s5055_s19 }
 0xe4c   : > { %6538 = dma.done.wait (!%p5862_p8), %s5056_s29, 128  }
 0xe4d   : > { %6540 = vsyncadd (!%p5862_p8), %s5056_s29, 4294967168  ;;  %s8674_s27 = sld [smem:[#allocation35_spill]]  ;;  %s8675_s28 = sld [smem:[#allocation34_spill]] }
 0xe4e   : > { %s8676_s26 = sld [smem:[#allocation36_spill]]  ;;  %s8677_s24 = smov %s6547_s25 }
 0xe53   : > { %p42_p5 = scmp.ge.s32.totalorder %s8674_s27, 4   ;;  %s8678_s25 = smov %s8675_s28 }
 0xe55   :  { %44 = sbr.rel (!%p42_p5) target bundleno = 29 (0x1d), region = 244 }
 0xe5c   :  { %5061 = vsyncpa [#allocation5], 1 }
 0xe5d   :  { %5063 = vsyncpa [#allocation5 + $0x1], 1 }
 0xe5e   :  { %5064 = vsyncpa [#allocation8], 1 }
 0xe5f   :  { %5065 = vsyncpa [#allocation12], 1 }
 0xe60   :  { %5067 = vsyncpa [#allocation12 + $0x1], 1 }
 0xe61   :  { %5068 = vsyncpa [#allocation15], 1 }
 0xe62   :  { %5070 = vsyncpa [#allocation15 + $0x1], 1 }
 0xe63   :  { %5071 = vsyncpa [#allocation18], 1 }
 0xe64   :  { %5073 = vsyncpa [#allocation18 + $0x1], 1 }
 0xe65   :  { %5074 = vsyncpa [#allocation6], 1 }
 0xe66   :  { %5076 = vsyncpa [#allocation6 + $0x1], 1 }
 0xe67   :  { %5077 = vsyncpa [#allocation21], 1 }
 0xe68   :  { %5079 = vsyncpa [#allocation21 + $0x1], 1 }

</bundles_post_ra>
